<compile_context>
chip_gen: v5e
topology: v5e:2x2
jax: 0.10.0
libtpu: 0.0.40
codegen_flags: <defaults>
</compile_context>

<pallas_src>
import functools

import jax
import jax.numpy as jnp
from jax import lax
from jax.experimental import pallas as pl
from jax.experimental.pallas import tpu as pltpu

LN_EPS = 1e-5  # torch.nn.LayerNorm default eps


def custom_model_kernel(x_ref, wt_ref, lnb_ref, w1_ref, w2_ref, o_ref):
    """CrossNet (cross layers + LayerNorm) + 2-layer ReLU MLP on one batch tile.

    x_ref   : (TB, n_in)       f32  input tile (full precision for elementwise math)
    wt_ref  : (L, n_in, n_in)  mm   pre-transposed cross weights (W.T), resident
    lnb_ref : (L, 3, n_in)     f32  fused [b.T ; gamma ; beta] per cross layer
    w1_ref  : (n_in, n_hid)    mm   MLP weight 1
    w2_ref  : (n_hid, 128pad)  mm   MLP weight 2, zero-padded to 128 lane-dense cols
    o_ref   : (TB, 128pad)     f32
    """
    mm_dtype = wt_ref.dtype                  # bf16 (fast path) or f32
    n_layers = wt_ref.shape[0]

    x0 = x_ref[...]                          # f32
    xi = x0

    # ---- CrossNet: statically unrolled cross layers ----
    for i in range(n_layers):
        p = lnb_ref[i]                       # (3, n_in)
        b_t = p[0:1, :]
        gamma = p[1:2, :]
        beta = p[2:3, :]

        # torch: x_w = W @ x_i.T + b  ->  x_w.T = x_i @ W.T + b.T  (W.T pre-transposed)
        xw = jnp.dot(xi.astype(mm_dtype), wt_ref[i],
                     preferred_element_type=jnp.float32) + b_t
        h = x0 * xw + xi                     # (TB, n_in), f32 elementwise

        # Two-pass LayerNorm over the feature axis (numerically stable).
        mean = jnp.mean(h, axis=-1, keepdims=True)
        d = h - mean
        var = jnp.mean(d * d, axis=-1, keepdims=True)
        hn = d * lax.rsqrt(var + LN_EPS)
        xi = hn * gamma + beta               # affine

    # ---- NNModel: ReLU after every matmul (including the last, per the PyTorch loop) ----
    y = jnp.maximum(jnp.dot(xi.astype(mm_dtype), w1_ref[...],
                            preferred_element_type=jnp.float32), 0.0)
    y = jnp.maximum(jnp.dot(y.astype(mm_dtype), w2_ref[...],
                            preferred_element_type=jnp.float32), 0.0)
    o_ref[...] = y.astype(o_ref.dtype)


def _tensorcores_per_chip():
    """Best-effort: does this chip expose 2 TensorCores to one Pallas grid?"""
    try:
        kind = jax.devices()[0].device_kind.lower()
    except Exception:
        return 1
    # v7x, v4 / v5p megacore: 2 TensorCores per chip; v5e / v6e: 1.
    if any(tag in kind for tag in ("v7", "v4", "v5p")):
        return 2
    return 1


def _plan_batch(batch, num_cores, max_tile):
    """Return (padded_batch, tile_b, grid_steps). tile_b is a multiple of 8."""
    bp = ((batch + 7) // 8) * 8
    if num_cores >= 2 and bp >= 16:
        # Even grid so both TensorCores get identical work.
        tile = max(8, (min(bp // 2, max_tile) // 8) * 8)
        steps = pl.cdiv(bp, tile)
        if steps % 2:
            steps += 1
    else:
        # Single TensorCore (v5e / v6e): one grid step when the whole batch fits the tile cap.
        tile = max(8, (min(bp, max_tile) // 8) * 8)
        steps = pl.cdiv(bp, tile)
    return steps * tile, tile, steps


def prepare_params(w_stack, b_stack, gamma, beta, w1, w2, *, use_bf16=True):
    """One-time parameter preprocessing (hoisted out of the per-call hot path).

    w_stack:(L,n_in,n_in); b_stack:(L,n_in,1) (torch layout); gamma/beta:(L,n_in);
    w1:(n_in,n_hid); w2:(n_hid,n_out).
    """
    n_layers, n_in, _ = w_stack.shape
    n_hid, n_out = w2.shape
    mm_dtype = jnp.bfloat16 if use_bf16 else jnp.float32

    wt_stack = jnp.swapaxes(w_stack, 1, 2).astype(mm_dtype)        # (L, n_in, n_in) == W.T
    # Fuse b.T, gamma, beta into a single resident (L, 3, n_in) tensor (one DMA, one spec).
    lnb = jnp.stack([b_stack[:, :, 0], gamma, beta], axis=1).astype(jnp.float32)

    # Lane-dense output: zero-pad W2's output columns to a multiple of 128 (ReLU(0)=0 keeps it exact).
    out_pad = ((n_out + 127) // 128) * 128
    w2p = w2 if out_pad == n_out else jnp.pad(w2, ((0, 0), (0, out_pad - n_out)))

    return dict(
        wt=wt_stack,
        lnb=lnb,
        w1=w1.astype(mm_dtype),
        w2=w2p.astype(mm_dtype),
        n_out=int(n_out),
        out_pad=int(out_pad),
    )


def custom_model_forward(params, x, *, max_tile_b=2048):
    """x:(B, n_in) f32. Returns (B, n_out) f32."""
    B, n_in = x.shape
    wt, lnb, w1, w2p = params["wt"], params["lnb"], params["w1"], params["w2"]
    n_layers = wt.shape[0]
    n_hid = w1.shape[1]
    out_pad = params["out_pad"]
    n_out = params["n_out"]

    num_cores = _tensorcores_per_chip()
    bp, tile_b, steps = _plan_batch(B, num_cores, max_tile_b)

    xp = x.astype(jnp.float32)
    if bp != B:
        xp = jnp.pad(xp, ((0, bp - B), (0, 0)))

    # Advisory cost hint: tiny latency-bound kernel; keeps XLA from over-serializing around it.
    flops = 2 * bp * (n_layers * n_in * n_in + n_in * n_hid + n_hid * out_pad)
    bytes_accessed = (bp * n_in * 4 + wt.size * wt.dtype.itemsize + lnb.size * 4
                      + w1.size * w1.dtype.itemsize + w2p.size * w2p.dtype.itemsize
                      + bp * out_pad * 4)
    cost = pl.CostEstimate(flops=flops, transcendentals=bp * n_layers,
                           bytes_accessed=bytes_accessed)

    full = lambda shape: pl.BlockSpec(shape, lambda i: (0,) * len(shape))

    out = pl.pallas_call(
        custom_model_kernel,
        out_shape=jax.ShapeDtypeStruct((bp, out_pad), jnp.float32),
        grid_spec=pltpu.PrefetchScalarGridSpec(
            num_scalar_prefetch=0,
            grid=(steps,),
            in_specs=[
                pl.BlockSpec((tile_b, n_in), lambda i: (i, 0)),   # x tile (f32)
                full((n_layers, n_in, n_in)),                     # cross W.T, resident
                full((n_layers, 3, n_in)),                        # fused b.T / gamma / beta
                full((n_in, n_hid)),                              # MLP W1
                full((n_hid, out_pad)),                           # MLP W2 (lane-padded)
            ],
            out_specs=pl.BlockSpec((tile_b, out_pad), lambda i: (i, 0)),
        ),
        compiler_params=pltpu.CompilerParams(
            dimension_semantics=("parallel",)),
        cost_estimate=cost,
    )(xp, wt, lnb, w1, w2p)

    return out[:B, :n_out]


def reference_forward(x, w_stack, b_stack, gamma, beta, w1, w2, mm_dtype=jnp.float32):
    """Pure-JAX mirror of the PyTorch forward. mm_dtype=bfloat16 mirrors the kernel's
    bf16 MXU operands (all elementwise / LayerNorm math and accumulation stay f32)."""
    def mm(a, b):
        return jnp.dot(a.astype(mm_dtype), b.astype(mm_dtype),
                       preferred_element_type=jnp.float32,
                       precision=lax.Precision.HIGHEST)

    x0 = x.astype(jnp.float32)
    xi = x0
    for i in range(w_stack.shape[0]):
        xw = mm(w_stack[i], xi.T) + b_stack[i]                    # (n_in, B)
        h = x0 * xw.T + xi
        mean = jnp.mean(h, axis=-1, keepdims=True)
        var = jnp.mean((h - mean) ** 2, axis=-1, keepdims=True)
        hn = (h - mean) / jnp.sqrt(var + LN_EPS)
        xi = hn * gamma[i][None, :] + beta[i][None, :]
    y = jnp.maximum(mm(xi, w1), 0.0)
    y = jnp.maximum(mm(y, w2), 0.0)
    return y


if __name__ == "__main__":
    key = jax.random.PRNGKey(0)
    kx, kw, kb, k1, k2 = jax.random.split(key, 5)

    B, N_INPUT, N_HIDDEN, N_OUTPUT, N_LAYERS = 256, 32, 128, 16, 3

    x = jax.random.normal(kx, (B, N_INPUT), dtype=jnp.float32)
    # CrossNet params: torch.randn init; bias is (n_input, 1) in torch layout.
    w_stack = jax.random.normal(kw, (N_LAYERS, N_INPUT, N_INPUT), dtype=jnp.float32)
    b_stack = jax.random.normal(kb, (N_LAYERS, N_INPUT, 1), dtype=jnp.float32)
    # LayerNorm affine params: torch default init (ones / zeros).
    gamma = jnp.ones((N_LAYERS, N_INPUT), dtype=jnp.float32)
    beta = jnp.zeros((N_LAYERS, N_INPUT), dtype=jnp.float32)
    # NNModel params: torch.randn init (n_hidden = 128, the module default); no biases in the module.
    w1 = jax.random.normal(k1, (N_INPUT, N_HIDDEN), dtype=jnp.float32)
    w2 = jax.random.normal(k2, (N_HIDDEN, N_OUTPUT), dtype=jnp.float32)

    # --- exact-semantics path (f32 MXU operands): torch-faithful check ---
    params_f32 = prepare_params(w_stack, b_stack, gamma, beta, w1, w2, use_bf16=False)
    fwd_f32 = jax.jit(functools.partial(custom_model_forward, params_f32))
    out_f32 = jax.block_until_ready(fwd_f32(x))
    ref_f32 = reference_forward(x, w_stack, b_stack, gamma, beta, w1, w2)
    assert out_f32.shape == (B, N_OUTPUT)
    assert jnp.allclose(out_f32, ref_f32, rtol=1e-3, atol=1e-2), "f32 kernel mismatch vs reference"

    # --- fast path (bf16 MXU operands only; f32 elementwise / LayerNorm / accumulation) ---
    params_bf16 = prepare_params(w_stack, b_stack, gamma, beta, w1, w2, use_bf16=True)
    fwd_bf16 = jax.jit(functools.partial(custom_model_forward, params_bf16))
    out_bf16 = jax.block_until_ready(fwd_bf16(x))
    ref_bf16 = reference_forward(x, w_stack, b_stack, gamma, beta, w1, w2,
                                 mm_dtype=jnp.bfloat16)
    assert out_bf16.shape == (B, N_OUTPUT)
    assert jnp.allclose(out_bf16, ref_bf16, rtol=5e-2, atol=5e-1), "bf16 kernel mismatch vs reference"

    print("KERNEL_OK")
</pallas_src>

<mosaic_0001>
module attributes {stable_mosaic.version = 11 : i64} {
  func.func @custom_model_kernel(%arg0: i32, %arg1: memref<256x32xf32, #tpu.memory_space<vmem>>, %arg2: memref<3x32x32xf32, #tpu.memory_space<vmem>>, %arg3: memref<3x3x32xf32, #tpu.memory_space<vmem>>, %arg4: memref<32x128xf32, #tpu.memory_space<vmem>>, %arg5: memref<128x128xf32, #tpu.memory_space<vmem>>, %arg6: memref<256x128xf32, #tpu.memory_space<vmem>>) attributes {dimension_semantics = [#tpu.dimension_semantics<parallel>], iteration_bounds = array<i64: 1>, scalar_prefetch = 0 : i64, scratch_operands = 0 : i64, tpu.core_type = #tpu.core_type<tc>, window_params = [{transform_indices = @transform_0, window_bounds = array<i64: 256, 32>}, {pipeline_mode = #tpu.pipeline_mode<synchronous>, transform_indices = @transform_1, window_bounds = array<i64: 3, 32, 32>}, {pipeline_mode = #tpu.pipeline_mode<synchronous>, transform_indices = @transform_2, window_bounds = array<i64: 3, 3, 32>}, {pipeline_mode = #tpu.pipeline_mode<synchronous>, transform_indices = @transform_3, window_bounds = array<i64: 32, 128>}, {pipeline_mode = #tpu.pipeline_mode<synchronous>, transform_indices = @transform_4, window_bounds = array<i64: 128, 128>}, {transform_indices = @transform_5, window_bounds = array<i64: 256, 128>}]} {
    %c0 = arith.constant 0 : index
    %c0_0 = arith.constant 0 : index
    %0 = vector.load %arg1[%c0, %c0_0] : memref<256x32xf32, #tpu.memory_space<vmem>>, vector<256x32xf32>
    %c0_1 = arith.constant 0 : index
    %c0_2 = arith.constant 0 : index
    %c0_3 = arith.constant 0 : index
    %1 = vector.load %arg3[%c0_1, %c0_2, %c0_3] : memref<3x3x32xf32, #tpu.memory_space<vmem>>, vector<1x3x32xf32>
    %2 = vector.shape_cast %1 : vector<1x3x32xf32> to vector<3x32xf32>
    %3 = vector.extract_strided_slice %2 {offsets = [0, 0], sizes = [1, 32], strides = [1, 1]} : vector<3x32xf32> to vector<1x32xf32>
    %4 = vector.extract_strided_slice %2 {offsets = [1, 0], sizes = [1, 32], strides = [1, 1]} : vector<3x32xf32> to vector<1x32xf32>
    %5 = vector.extract_strided_slice %2 {offsets = [2, 0], sizes = [1, 32], strides = [1, 1]} : vector<3x32xf32> to vector<1x32xf32>
    %c0_4 = arith.constant 0 : index
    %c0_5 = arith.constant 0 : index
    %c0_6 = arith.constant 0 : index
    %6 = vector.load %arg2[%c0_4, %c0_5, %c0_6] : memref<3x32x32xf32, #tpu.memory_space<vmem>>, vector<1x32x32xf32>
    %7 = vector.shape_cast %6 : vector<1x32x32xf32> to vector<32x32xf32>
    %cst = arith.constant dense<0.000000e+00> : vector<256x32xf32>
    %8 = tpu.matmul %0, %7, %cst {dimension_numbers = #tpu.dot_dimension_numbers<[1], [0], [0], [1], [0, 0, 1, 1], [], []>} : vector<256x32xf32>, vector<32x32xf32>, vector<256x32xf32> -> vector<256x32xf32>
    %9 = vector.broadcast %3 : vector<1x32xf32> to vector<256x32xf32>
    %10 = arith.addf %8, %9 : vector<256x32xf32>
    %11 = arith.mulf %0, %10 : vector<256x32xf32>
    %12 = arith.addf %11, %0 : vector<256x32xf32>
    %cst_7 = arith.constant dense<0.000000e+00> : vector<256xf32>
    %13 = vector.multi_reduction <add>, %12, %cst_7 [1] : vector<256x32xf32> to vector<256xf32>
    %14 = vector.shape_cast %13 : vector<256xf32> to vector<256x1xf32>
    %cst_8 = arith.constant 3.200000e+01 : f32
    %15 = vector.broadcast %cst_8 : f32 to vector<256x1xf32>
    %16 = arith.divf %14, %15 : vector<256x1xf32>
    %17 = vector.broadcast %16 : vector<256x1xf32> to vector<256x32xf32>
    %18 = arith.subf %12, %17 : vector<256x32xf32>
    %19 = arith.mulf %18, %18 : vector<256x32xf32>
    %cst_9 = arith.constant dense<0.000000e+00> : vector<256xf32>
    %20 = vector.multi_reduction <add>, %19, %cst_9 [1] : vector<256x32xf32> to vector<256xf32>
    %21 = vector.shape_cast %20 : vector<256xf32> to vector<256x1xf32>
    %cst_10 = arith.constant 3.200000e+01 : f32
    %22 = vector.broadcast %cst_10 : f32 to vector<256x1xf32>
    %23 = arith.divf %21, %22 : vector<256x1xf32>
    %cst_11 = arith.constant 9.99999974E-6 : f32
    %24 = vector.broadcast %cst_11 : f32 to vector<256x1xf32>
    %25 = arith.addf %23, %24 : vector<256x1xf32>
    %26 = math.rsqrt %25 : vector<256x1xf32>
    %27 = vector.broadcast %26 : vector<256x1xf32> to vector<256x32xf32>
    %28 = arith.mulf %18, %27 : vector<256x32xf32>
    %29 = vector.broadcast %4 : vector<1x32xf32> to vector<256x32xf32>
    %30 = arith.mulf %28, %29 : vector<256x32xf32>
    %31 = vector.broadcast %5 : vector<1x32xf32> to vector<256x32xf32>
    %32 = arith.addf %30, %31 : vector<256x32xf32>
    %c1 = arith.constant 1 : index
    %c0_12 = arith.constant 0 : index
    %c0_13 = arith.constant 0 : index
    %33 = vector.load %arg3[%c1, %c0_12, %c0_13] : memref<3x3x32xf32, #tpu.memory_space<vmem>>, vector<1x3x32xf32>
    %34 = vector.shape_cast %33 : vector<1x3x32xf32> to vector<3x32xf32>
    %35 = vector.extract_strided_slice %34 {offsets = [0, 0], sizes = [1, 32], strides = [1, 1]} : vector<3x32xf32> to vector<1x32xf32>
    %36 = vector.extract_strided_slice %34 {offsets = [1, 0], sizes = [1, 32], strides = [1, 1]} : vector<3x32xf32> to vector<1x32xf32>
    %37 = vector.extract_strided_slice %34 {offsets = [2, 0], sizes = [1, 32], strides = [1, 1]} : vector<3x32xf32> to vector<1x32xf32>
    %c1_14 = arith.constant 1 : index
    %c0_15 = arith.constant 0 : index
    %c0_16 = arith.constant 0 : index
    %38 = vector.load %arg2[%c1_14, %c0_15, %c0_16] : memref<3x32x32xf32, #tpu.memory_space<vmem>>, vector<1x32x32xf32>
    %39 = vector.shape_cast %38 : vector<1x32x32xf32> to vector<32x32xf32>
    %cst_17 = arith.constant dense<0.000000e+00> : vector<256x32xf32>
    %40 = tpu.matmul %32, %39, %cst_17 {dimension_numbers = #tpu.dot_dimension_numbers<[1], [0], [0], [1], [0, 0, 1, 1], [], []>} : vector<256x32xf32>, vector<32x32xf32>, vector<256x32xf32> -> vector<256x32xf32>
    %41 = vector.broadcast %35 : vector<1x32xf32> to vector<256x32xf32>
    %42 = arith.addf %40, %41 : vector<256x32xf32>
    %43 = arith.mulf %0, %42 : vector<256x32xf32>
    %44 = arith.addf %43, %32 : vector<256x32xf32>
    %cst_18 = arith.constant dense<0.000000e+00> : vector<256xf32>
    %45 = vector.multi_reduction <add>, %44, %cst_18 [1] : vector<256x32xf32> to vector<256xf32>
    %46 = vector.shape_cast %45 : vector<256xf32> to vector<256x1xf32>
    %cst_19 = arith.constant 3.200000e+01 : f32
    %47 = vector.broadcast %cst_19 : f32 to vector<256x1xf32>
    %48 = arith.divf %46, %47 : vector<256x1xf32>
    %49 = vector.broadcast %48 : vector<256x1xf32> to vector<256x32xf32>
    %50 = arith.subf %44, %49 : vector<256x32xf32>
    %51 = arith.mulf %50, %50 : vector<256x32xf32>
    %cst_20 = arith.constant dense<0.000000e+00> : vector<256xf32>
    %52 = vector.multi_reduction <add>, %51, %cst_20 [1] : vector<256x32xf32> to vector<256xf32>
    %53 = vector.shape_cast %52 : vector<256xf32> to vector<256x1xf32>
    %cst_21 = arith.constant 3.200000e+01 : f32
    %54 = vector.broadcast %cst_21 : f32 to vector<256x1xf32>
    %55 = arith.divf %53, %54 : vector<256x1xf32>
    %cst_22 = arith.constant 9.99999974E-6 : f32
    %56 = vector.broadcast %cst_22 : f32 to vector<256x1xf32>
    %57 = arith.addf %55, %56 : vector<256x1xf32>
    %58 = math.rsqrt %57 : vector<256x1xf32>
    %59 = vector.broadcast %58 : vector<256x1xf32> to vector<256x32xf32>
    %60 = arith.mulf %50, %59 : vector<256x32xf32>
    %61 = vector.broadcast %36 : vector<1x32xf32> to vector<256x32xf32>
    %62 = arith.mulf %60, %61 : vector<256x32xf32>
    %63 = vector.broadcast %37 : vector<1x32xf32> to vector<256x32xf32>
    %64 = arith.addf %62, %63 : vector<256x32xf32>
    %c2 = arith.constant 2 : index
    %c0_23 = arith.constant 0 : index
    %c0_24 = arith.constant 0 : index
    %65 = vector.load %arg3[%c2, %c0_23, %c0_24] : memref<3x3x32xf32, #tpu.memory_space<vmem>>, vector<1x3x32xf32>
    %66 = vector.shape_cast %65 : vector<1x3x32xf32> to vector<3x32xf32>
    %67 = vector.extract_strided_slice %66 {offsets = [0, 0], sizes = [1, 32], strides = [1, 1]} : vector<3x32xf32> to vector<1x32xf32>
    %68 = vector.extract_strided_slice %66 {offsets = [1, 0], sizes = [1, 32], strides = [1, 1]} : vector<3x32xf32> to vector<1x32xf32>
    %69 = vector.extract_strided_slice %66 {offsets = [2, 0], sizes = [1, 32], strides = [1, 1]} : vector<3x32xf32> to vector<1x32xf32>
    %c2_25 = arith.constant 2 : index
    %c0_26 = arith.constant 0 : index
    %c0_27 = arith.constant 0 : index
    %70 = vector.load %arg2[%c2_25, %c0_26, %c0_27] : memref<3x32x32xf32, #tpu.memory_space<vmem>>, vector<1x32x32xf32>
    %71 = vector.shape_cast %70 : vector<1x32x32xf32> to vector<32x32xf32>
    %cst_28 = arith.constant dense<0.000000e+00> : vector<256x32xf32>
    %72 = tpu.matmul %64, %71, %cst_28 {dimension_numbers = #tpu.dot_dimension_numbers<[1], [0], [0], [1], [0, 0, 1, 1], [], []>} : vector<256x32xf32>, vector<32x32xf32>, vector<256x32xf32> -> vector<256x32xf32>
    %73 = vector.broadcast %67 : vector<1x32xf32> to vector<256x32xf32>
    %74 = arith.addf %72, %73 : vector<256x32xf32>
    %75 = arith.mulf %0, %74 : vector<256x32xf32>
    %76 = arith.addf %75, %64 : vector<256x32xf32>
    %cst_29 = arith.constant dense<0.000000e+00> : vector<256xf32>
    %77 = vector.multi_reduction <add>, %76, %cst_29 [1] : vector<256x32xf32> to vector<256xf32>
    %78 = vector.shape_cast %77 : vector<256xf32> to vector<256x1xf32>
    %cst_30 = arith.constant 3.200000e+01 : f32
    %79 = vector.broadcast %cst_30 : f32 to vector<256x1xf32>
    %80 = arith.divf %78, %79 : vector<256x1xf32>
    %81 = vector.broadcast %80 : vector<256x1xf32> to vector<256x32xf32>
    %82 = arith.subf %76, %81 : vector<256x32xf32>
    %83 = arith.mulf %82, %82 : vector<256x32xf32>
    %cst_31 = arith.constant dense<0.000000e+00> : vector<256xf32>
    %84 = vector.multi_reduction <add>, %83, %cst_31 [1] : vector<256x32xf32> to vector<256xf32>
    %85 = vector.shape_cast %84 : vector<256xf32> to vector<256x1xf32>
    %cst_32 = arith.constant 3.200000e+01 : f32
    %86 = vector.broadcast %cst_32 : f32 to vector<256x1xf32>
    %87 = arith.divf %85, %86 : vector<256x1xf32>
    %cst_33 = arith.constant 9.99999974E-6 : f32
    %88 = vector.broadcast %cst_33 : f32 to vector<256x1xf32>
    %89 = arith.addf %87, %88 : vector<256x1xf32>
    %90 = math.rsqrt %89 : vector<256x1xf32>
    %91 = vector.broadcast %90 : vector<256x1xf32> to vector<256x32xf32>
    %92 = arith.mulf %82, %91 : vector<256x32xf32>
    %93 = vector.broadcast %68 : vector<1x32xf32> to vector<256x32xf32>
    %94 = arith.mulf %92, %93 : vector<256x32xf32>
    %95 = vector.broadcast %69 : vector<1x32xf32> to vector<256x32xf32>
    %96 = arith.addf %94, %95 : vector<256x32xf32>
    %c0_34 = arith.constant 0 : index
    %c0_35 = arith.constant 0 : index
    %97 = vector.load %arg4[%c0_34, %c0_35] : memref<32x128xf32, #tpu.memory_space<vmem>>, vector<32x128xf32>
    %cst_36 = arith.constant dense<0.000000e+00> : vector<256x128xf32>
    %98 = tpu.matmul %96, %97, %cst_36 {dimension_numbers = #tpu.dot_dimension_numbers<[1], [0], [0], [1], [0, 0, 1, 1], [], []>} : vector<256x32xf32>, vector<32x128xf32>, vector<256x128xf32> -> vector<256x128xf32>
    %cst_37 = arith.constant 0.000000e+00 : f32
    %99 = vector.broadcast %cst_37 : f32 to vector<256x128xf32>
    %100 = arith.maximumf %98, %99 : vector<256x128xf32>
    %c0_38 = arith.constant 0 : index
    %c0_39 = arith.constant 0 : index
    %101 = vector.load %arg5[%c0_38, %c0_39] : memref<128x128xf32, #tpu.memory_space<vmem>>, vector<128x128xf32>
    %cst_40 = arith.constant dense<0.000000e+00> : vector<256x128xf32>
    %102 = tpu.matmul %100, %101, %cst_40 {dimension_numbers = #tpu.dot_dimension_numbers<[1], [0], [0], [1], [0, 0, 1, 1], [], []>} : vector<256x128xf32>, vector<128x128xf32>, vector<256x128xf32> -> vector<256x128xf32>
    %cst_41 = arith.constant 0.000000e+00 : f32
    %103 = vector.broadcast %cst_41 : f32 to vector<256x128xf32>
    %104 = arith.maximumf %102, %103 : vector<256x128xf32>
    %c0_42 = arith.constant 0 : index
    %c0_43 = arith.constant 0 : index
    %105 = vector.load %arg6[%c0_42, %c0_43] : memref<256x128xf32, #tpu.memory_space<vmem>>, vector<256x128xf32>
    tpu.vector_store %arg6[%c0_42, %c0_43], %104 {strides = array<i32>} : memref<256x128xf32, #tpu.memory_space<vmem>>, vector<256x128xf32>,
    return
  }
  func.func @transform_0(%arg0: i32) -> (i32, i32) {
    %c0_i32 = arith.constant 0 : i32
    %c0_i32_0 = arith.constant 0 : i32
    return %arg0, %c0_i32 : i32, i32
  }
  func.func @transform_1(%arg0: i32) -> (i32, i32, i32) {
    %c0_i32 = arith.constant 0 : i32
    %c0_i32_0 = arith.constant 0 : i32
    %c0_i32_1 = arith.constant 0 : i32
    %c0_i32_2 = arith.constant 0 : i32
    return %c0_i32, %c0_i32_0, %c0_i32_1 : i32, i32, i32
  }
  func.func @transform_2(%arg0: i32) -> (i32, i32, i32) {
    %c0_i32 = arith.constant 0 : i32
    %c0_i32_0 = arith.constant 0 : i32
    %c0_i32_1 = arith.constant 0 : i32
    %c0_i32_2 = arith.constant 0 : i32
    return %c0_i32, %c0_i32_0, %c0_i32_1 : i32, i32, i32
  }
  func.func @transform_3(%arg0: i32) -> (i32, i32) {
    %c0_i32 = arith.constant 0 : i32
    %c0_i32_0 = arith.constant 0 : i32
    %c0_i32_1 = arith.constant 0 : i32
    return %c0_i32, %c0_i32_0 : i32, i32
  }
  func.func @transform_4(%arg0: i32) -> (i32, i32) {
    %c0_i32 = arith.constant 0 : i32
    %c0_i32_0 = arith.constant 0 : i32
    %c0_i32_1 = arith.constant 0 : i32
    return %c0_i32, %c0_i32_0 : i32, i32
  }
  func.func @transform_5(%arg0: i32) -> (i32, i32) {
    %c0_i32 = arith.constant 0 : i32
    %c0_i32_0 = arith.constant 0 : i32
    return %arg0, %c0_i32 : i32, i32
  }
}

</mosaic_0001>

<bundles_post_ra>
// kernel: custom_model_forward.1
= control target key start
LH: loop header
LB: loop body
LE: loop exit
PB: predicated region body
PF: predicated region fallthrough
CT: control target
= control target key end

     0   :  { %vm58_vm0 = vcmask 261120   ;;  %v4064_v55 = vmov 32.0   ;;  %s6933_s1 = inlined_call_operand.vmem [shape: f32[3,32,32], index: 1, kind: input, shape index: {}]   ;;  %s6934_s0 = inlined_call_operand.vmem [shape: f32[256,32], index: 0, kind: input, shape index: {}]   ;;  %s6935_s2 = inlined_call_operand.vmem [shape: f32[3,3,32], index: 2, kind: input, shape index: {}]   ;;  %s6936_s3 = inlined_call_operand.vmem [shape: f32[32,128], index: 3, kind: input, shape index: {}]   ;;  %s6937_s4 = inlined_call_operand.vmem [shape: f32[128,128], index: 4, kind: input, shape index: {}]   ;;  %s6938_s5 = inlined_call_operand.vmem [shape: f32[256,128], index: 5, kind: output, shape index: {}]  }
   0x1   :  { %v56_v0 = vld [vmem:[%s6933_s1 + $0x18] sm:$0xff]  ;;  %v55_v1 = vld [vmem:[%s6933_s1 + $0x10] sm:$0xff]  ;;  %v54_v2 = vld [vmem:[%s6933_s1 + $0x8] sm:$0xff]  ;;  %3804 = vrcp.f32 %v4064_v55 }
   0x2   :  { %167 = vmatpush.msra.mxu0 %v56_v0  ;;  %3791 = vmatpush.msra.mxu1 %v56_v0  ;;  %v53_v3 = vld [vmem:[%s6933_s1] sm:$0xff]  ;;  %v21_v5 = vld [vmem:[%s6934_s0 + $0x8] sm:$0xff]  ;;  %v22_v6 = vld [vmem:[%s6934_s0 + $0x10] sm:$0xff] }
   0x3   :  { %3792 = vmatpush.msra.mxu2 %v56_v0  ;;  %3793 = vmatpush.msra.mxu3 %v56_v0  ;;  %v20_v4 = vld [vmem:[%s6934_s0] sm:$0xff]  ;;  %v23_v7 = vld [vmem:[%s6934_s0 + $0x18] sm:$0xff]  ;;  %v25_v9 = vld [vmem:[%s6934_s0 + $0x28] sm:$0xff] }
   0x4   :  { %168 = vmatpush.msra.mxu0 %v55_v1  ;;  %3794 = vmatpush.msra.mxu1 %v55_v1  ;;  %v24_v8 = vld [vmem:[%s6934_s0 + $0x20] sm:$0xff]  ;;  %v26_v10 = vld [vmem:[%s6934_s0 + $0x30] sm:$0xff]  ;;  %v4138_v11 = vld [vmem:[%s6934_s0 + $0x38] sm:$0xff] }
   0x5   :  { %3795 = vmatpush.msra.mxu2 %v55_v1  ;;  %3796 = vmatpush.msra.mxu3 %v55_v1  ;;  %v4145_v12 = vld [vmem:[%s6934_s0 + $0x40] sm:$0xff]  ;;  %v4152_v13 = vld [vmem:[%s6934_s0 + $0x48] sm:$0xff]  ;;  %v4164_v15 = vld [vmem:[%s6934_s0 + $0x50] sm:$0xff] }
   0x6   :  { %169 = vmatpush.msra.mxu0 %v54_v2  ;;  %3797 = vmatpush.msra.mxu1 %v54_v2  ;;  %v4159_v14 = vld [vmem:[%s6935_s2] sm:$0x7]  ;;  %v4175_v19 = vld [vmem:[%s6934_s0 + $0x58] sm:$0xff]  ;;  %v4199_v32 = vld [vmem:[%s6934_s0 + $0x68] sm:$0xff] }
   0x7   :  { %3798 = vmatpush.msra.mxu2 %v54_v2  ;;  %3799 = vmatpush.msra.mxu3 %v54_v2  ;;  %v4169_v16 = vperm.slane %v4159_v14, 0  ;;  %v4187_v26 = vld [vmem:[%s6934_s0 + $0x60] sm:$0xff]  ;;  %v3805_v56 = vpop.eup %3804  ;;  %v4230_v57 = vld [vmem:[%s6934_s0 + $0x70] sm:$0xff]  ;;  %v4237_v60 = vld [vmem:[%s6934_s0 + $0x78] sm:$0xff] }
   0x8   :  { %170 = vmatpush.msra.mxu0 %v53_v3  ;;  %3800 = vmatpush.msra.mxu1 %v53_v3  ;;  %v429_v58 = vmul.f32 32.0, %v3805_v56  ;;  %v4242_v61 = vld [vmem:[%s6934_s0 + $0x80] sm:$0xff]  ;;  %vm433_vm1 = vweird.f32 %v3805_v56  ;;  %v4251_v0 = vld [vmem:[%s6934_s0 + $0x88] sm:$0xff] }
   0x9   :  { %3653 = vmatmul.msk.f32.vlgmr.msra.gmra.mxu0 %vm58_vm0, %v20_v4  ;;  %3801 = vmatpush.msra.mxu2 %v53_v3 }
   0xa   :  { %3802 = vmatpush.msra.mxu3 %v53_v3  ;;  %3661 = vmatmul.msk.f32.vlgmr.msra.gmra.mxu1 %vm58_vm0, %v4145_v12  ;;  %v430_v59 = vsub.f32 1.0, %v429_v58 }
   0xb   :  { %3669 = vmatmul.msk.f32.vlgmr.msra.gmra.mxu2 %vm58_vm0, %v4242_v61 }
   0xc   :  { %v431_v62 = vmul.f32 %v3805_v56, %v430_v59 }
   0xe   :  { %v432_v63 = vadd.f32 %v3805_v56, %v431_v62 }
  0x10   :  { %v4255_v2 = vsel %vm433_vm1, %v3805_v56, %v432_v63 }
  0x11   :  { %3654 = vmatmul.msk.f32.gmra.mxu0 %vm58_vm0, %v21_v5 }
  0x12   :  { %3662 = vmatmul.msk.f32.gmra.mxu1 %vm58_vm0, %v4152_v13 }
  0x13   :  { %3670 = vmatmul.msk.f32.gmra.mxu2 %vm58_vm0, %v4251_v0 }
  0x19   :  { %3655 = vmatmul.msk.f32.gmra.mxu0 %vm58_vm0, %v22_v6 }
  0x1a   :  { %3663 = vmatmul.msk.f32.gmra.mxu1 %vm58_vm0, %v4164_v15 }
  0x21   :  { %3656 = vmatmul.msk.f32.gmra.mxu0 %vm58_vm0, %v23_v7 }
  0x22   :  { %3664 = vmatmul.msk.f32.gmra.mxu1 %vm58_vm0, %v4175_v19 }
  0x29   :  { %3657 = vmatmul.msk.f32.gmra.mxu0 %vm58_vm0, %v24_v8 }
  0x2a   :  { %3665 = vmatmul.msk.f32.gmra.mxu1 %vm58_vm0, %v4187_v26 }
  0x31   :  { %3658 = vmatmul.msk.f32.gmra.mxu0 %vm58_vm0, %v25_v9 }
  0x32   :  { %3666 = vmatmul.msk.f32.gmra.mxu1 %vm58_vm0, %v4199_v32 }
  0x39   :  { %3659 = vmatmul.msk.f32.gmra.mxu0 %vm58_vm0, %v26_v10 }
  0x3a   :  { %3667 = vmatmul.msk.f32.gmra.mxu1 %vm58_vm0, %v4230_v57 }
  0x41   :  { %3660 = vmatmul.msk.f32.gmra.mxu0 %vm58_vm0, %v4138_v11 }
  0x42   :  { %3668 = vmatmul.msk.f32.gmra.mxu1 %vm58_vm0, %v4237_v60 }
  0x86   :  { %v172_v17 = vpop.f32.mrf.mxu0 }
  0x87   :  { %v173_v18 = vadd.f32 %v172_v17, %v4169_v16  ;;  %v196_v1 = vpop.f32.mrf.mxu1 }
  0x89   :  { %v268_v20 = vmul.f32 %v173_v18, %v20_v4 }
  0x8b   :  { %v4179_v21 = vadd.f32 %v268_v20, %v20_v4 }
  0x8d   :  { %v332_v22 = vsel %vm58_vm0, %v4179_v21, 0.0 }
  0x8e   :  { %v175_v23 = vpop.f32.mrf.mxu0  ;;  %333 = vadd.xlane.f32.xlu0 %v332_v22  ;;  %v197_v22 = vadd.f32 %v196_v1, %v4169_v16 }
  0x8f   :  { %v176_v24 = vadd.f32 %v175_v23, %v4169_v16  ;;  %v199_v17 = vpop.f32.mrf.mxu1 }
  0x91   :  { %v269_v25 = vmul.f32 %v176_v24, %v21_v5 }
  0x93   :  { %v4191_v27 = vadd.f32 %v269_v25, %v21_v5  ;;  %v4284_v25 = vld [vmem:[%s6934_s0 + $0x98] sm:$0xff] }
  0x95   :  { %v335_v28 = vsel %vm58_vm0, %v4191_v27, 0.0 }
  0x96   :  { %v178_v29 = vpop.f32.mrf.mxu0  ;;  %336 = vadd.xlane.f32.xlu0 %v335_v28  ;;  %v276_v28 = vmul.f32 %v197_v22, %v4145_v12 }
  0x97   :  { %v179_v30 = vadd.f32 %v178_v29, %v4169_v16 }
  0x99   :  { %v270_v31 = vmul.f32 %v179_v30, %v22_v6 }
  0x9b   :  { %v4203_v33 = vadd.f32 %v270_v31, %v22_v6  ;;  %v202_v31 = vpop.f32.mrf.mxu1 }
  0x9d   :  { %v338_v34 = vsel %vm58_vm0, %v4203_v33, 0.0 }
  0x9e   :  { %v181_v35 = vpop.f32.mrf.mxu0  ;;  %339 = vadd.xlane.f32.xlu1 %v338_v34 }
  0x9f   :  { %v182_v36 = vadd.f32 %v181_v35, %v4169_v16  ;;  %v200_v35 = vadd.f32 %v199_v17, %v4169_v16 }
  0xa1   :  { %v271_v37 = vmul.f32 %v182_v36, %v23_v7  ;;  %v4297_v36 = vadd.f32 %v276_v28, %v4145_v12 }
  0xa3   :  { %v4208_v38 = vadd.f32 %v271_v37, %v23_v7  ;;  %v356_v12 = vsel %vm58_vm0, %v4297_v36, 0.0 }
  0xa5   :  { %v341_v39 = vsel %vm58_vm0, %v4208_v38, 0.0 }
  0xa6   :  { %v184_v40 = vpop.f32.mrf.mxu0  ;;  %342 = vadd.xlane.f32.xlu1 %v341_v39  ;;  %v4305_v39 = vld [vmem:[%s6934_s0 + $0xa0] sm:$0xff] }
  0xa7   :  { %v185_v41 = vadd.f32 %v184_v40, %v4169_v16  ;;  %v277_v40 = vmul.f32 %v200_v35, %v4152_v13  ;;  %v3688_v35 = vld [vmem:[%s6933_s1 + $0x30] sm:$0xff] }
  0xa9   :  { %v272_v42 = vmul.f32 %v185_v41, %v24_v8 }
  0xab   :  { %v4213_v43 = vadd.f32 %v272_v42, %v24_v8  ;;  %v4265_v8 = vld [vmem:[%s6934_s0 + $0x90] sm:$0xff] }
  0xac   :  { %3671 = vmatmul.msk.f32.gmra.mxu2 %vm58_vm0, %v4265_v8 }
  0xad   :  { %v344_v44 = vsel %vm58_vm0, %v4213_v43, 0.0 }
  0xae   :  { %v187_v45 = vpop.f32.mrf.mxu0  ;;  %345 = vadd.xlane.f32.xlu2 %v344_v44 }
  0xaf   :  { %v188_v46 = vadd.f32 %v187_v45, %v4169_v16  ;;  %v203_v45 = vadd.f32 %v202_v31, %v4169_v16 }
  0xb1   :  { %v273_v47 = vmul.f32 %v188_v46, %v25_v9  ;;  %v4318_v46 = vadd.f32 %v277_v40, %v4152_v13  ;;  %v3687_v40 = vld [vmem:[%s6933_s1 + $0x28] sm:$0xff] }
  0xb3   :  { %v4218_v48 = vadd.f32 %v273_v47, %v25_v9  ;;  %v205_v47 = vpop.f32.mrf.mxu1 }
  0xb4   :  { %3672 = vmatmul.msk.f32.gmra.mxu2 %vm58_vm0, %v4284_v25  ;;  %v206_v56 = vadd.f32 %v205_v47, %v4169_v16  ;;  %v4413_v47 = vld [vmem:[%s6934_s0 + $0xc0] sm:$0xff] }
  0xb5   :  { %v347_v49 = vsel %vm58_vm0, %v4218_v48, 0.0  ;;  %3677 = vmatmul.msk.f32.vlgmr.msra.gmra.mxu3 %vm58_vm0, %v4413_v47 }
  0xb6   :  { %v190_v50 = vpop.f32.mrf.mxu0  ;;  %348 = vadd.xlane.f32.xlu2 %v347_v49  ;;  %v279_v62 = vmul.f32 %v206_v56, %v4175_v19 }
  0xb7   :  { %v191_v51 = vadd.f32 %v190_v50, %v4169_v16  ;;  %v278_v50 = vmul.f32 %v203_v45, %v4164_v15 }
  0xb9   :  { %v274_v52 = vmul.f32 %v191_v51, %v26_v10  ;;  %v359_v51 = vsel %vm58_vm0, %v4318_v46, 0.0 }
  0xbb   :  { %v4223_v53 = vadd.f32 %v274_v52, %v26_v10  ;;  %v208_v59 = vpop.f32.mrf.mxu1 }
  0xbc   :  { %3673 = vmatmul.msk.f32.gmra.mxu2 %vm58_vm0, %v4305_v39 }
  0xbd   :  { %v350_v54 = vsel %vm58_vm0, %v4223_v53, 0.0 }
  0xbe   :  { %351 = vadd.xlane.f32.xlu1 %v350_v54  ;;  %v193_v3 = vpop.f32.mrf.mxu0 }
  0xbf   :  { %v194_v6 = vadd.f32 %v193_v3, %v4169_v16 }
  0xc1   :  { %v275_v9 = vmul.f32 %v194_v6, %v4138_v11 }
  0xc3   :  { %v4276_v23 = vadd.f32 %v275_v9, %v4138_v11 }
  0xc5   :  { %v353_v29 = vsel %vm58_vm0, %v4276_v23, 0.0 }
 0x101   :  { %v334_v4 = vpop.xlane.xlu0 %333 }
 0x102   :  { %v435_v5 = vmul.f32 %v4255_v2, %v334_v4 }
 0x104   :  { %v4260_v7 = vsub.f32 %v4179_v21, %v435_v5  ;;  %v209_v5 = vadd.f32 %v208_v59, %v4169_v16 }
 0x106   :  { %v499_v10 = vmul.f32 %v4260_v7, %v4260_v7  ;;  %v280_v9 = vmul.f32 %v209_v5, %v4187_v26 }
 0x108   :  { %v531_v18 = vsel %vm58_vm0, %v499_v10, 0.0 }
 0x109   :  { %532 = vadd.xlane.f32.xlu0 %v531_v18  ;;  %v337_v20 = vpop.xlane.xlu0 %336  ;;  %v211_v18 = vpop.f32.mrf.mxu1 }
 0x10a   :  { %v436_v21 = vmul.f32 %v4255_v2, %v337_v20  ;;  %v212_v22 = vadd.f32 %v211_v18, %v4169_v16 }
 0x10c   :  { %v4279_v24 = vsub.f32 %v4191_v27, %v436_v21 }
 0x10e   :  { %v500_v11 = vmul.f32 %v4279_v24, %v4279_v24 }
 0x110   :  { %v534_v30 = vsel %vm58_vm0, %v500_v11, 0.0 }
 0x111   :  { %v340_v27 = vpop.xlane.xlu1 %339  ;;  %354 = vadd.xlane.f32.xlu0 %v353_v29  ;;  %535 = vadd.xlane.f32.xlu2 %v534_v30  ;;  %v281_v29 = vmul.f32 %v212_v22, %v4199_v32  ;;  %v214_v45 = vpop.f32.mrf.mxu1 }
 0x112   :  { %v437_v34 = vmul.f32 %v4255_v2, %v340_v27 }
 0x113   :  { %v4372_v31 = vadd.f32 %v281_v29, %v4199_v32  ;;  %v4389_v32 = vld [vmem:[%s6934_s0 + $0xb0] sm:$0xff] }
 0x114   :  { %v4300_v37 = vsub.f32 %v4203_v33, %v437_v34  ;;  %v3689_v34 = vld [vmem:[%s6933_s1 + $0x38] sm:$0xff] }
 0x115   :  { %1225 = vmatpush.msrb.mxu1 %v3689_v34 }
 0x116   :  { %v501_v41 = vmul.f32 %v4300_v37, %v4300_v37 }
 0x117   :  { %1226 = vmatpush.msrb.mxu1 %v3688_v35 }
 0x118   :  { %v537_v42 = vsel %vm58_vm0, %v501_v41, 0.0  ;;  %v3686_v41 = vld [vmem:[%s6933_s1 + $0x20] sm:$0xff] }
 0x119   :  { %538 = vadd.xlane.f32.xlu1 %v537_v42  ;;  %v343_v33 = vpop.xlane.xlu1 %342  ;;  %357 = vadd.xlane.f32.xlu2 %v356_v12  ;;  %v4405_v12 = vld [vmem:[%s6934_s0 + $0xb8] sm:$0xff] }
 0x11a   :  { %v438_v44 = vmul.f32 %v4255_v2, %v343_v33  ;;  %1227 = vmatpush.msrb.mxu1 %v3687_v40  ;;  %v4452_v40 = vperm.slane %v4159_v14, 1 }
 0x11c   :  { %v4321_v49 = vsub.f32 %v4208_v38, %v438_v44  ;;  %v4332_v38 = vadd.f32 %v278_v50, %v4164_v15  ;;  %1228 = vmatpush.msrb.mxu1 %v3686_v41 }
 0x11e   :  { %v502_v52 = vmul.f32 %v4321_v49, %v4321_v49  ;;  %v362_v63 = vsel %vm58_vm0, %v4332_v38, 0.0 }
 0x120   :  { %v540_v54 = vsel %vm58_vm0, %v502_v52, 0.0  ;;  %v215_v52 = vadd.f32 %v214_v45, %v4169_v16 }
 0x121   :  { %v346_v55 = vpop.xlane.xlu2 %345  ;;  %360 = vadd.xlane.f32.xlu1 %v359_v51  ;;  %541 = vadd.xlane.f32.xlu0 %v540_v54 }
 0x122   :  { %v439_v13 = vmul.f32 %v4255_v2, %v346_v55 }
 0x124   :  { %v4335_v58 = vsub.f32 %v4213_v43, %v439_v13  ;;  %v4346_v43 = vadd.f32 %v279_v62, %v4175_v19 }
 0x126   :  { %v503_v1 = vmul.f32 %v4335_v58, %v4335_v58  ;;  %v365_v17 = vsel %vm58_vm0, %v4346_v43, 0.0 }
 0x128   :  { %v543_v3 = vsel %vm58_vm0, %v503_v1, 0.0 }
 0x129   :  { %v349_v4 = vpop.xlane.xlu2 %348  ;;  %363 = vadd.xlane.f32.xlu0 %v362_v63  ;;  %544 = vadd.xlane.f32.xlu2 %v543_v3  ;;  %v282_v63 = vmul.f32 %v215_v52, %v4230_v57  ;;  %v220_v3 = vpop.f32.mrf.mxu2 }
 0x12a   :  { %v440_v15 = vmul.f32 %v4255_v2, %v349_v4 }
 0x12b   :  { %v4433_v18 = vadd.f32 %v282_v63, %v4230_v57 }
 0x12c   :  { %v4349_v6 = vsub.f32 %v4218_v48, %v440_v15  ;;  %v4360_v48 = vadd.f32 %v280_v9, %v4187_v26  ;;  %v371_v26 = vsel %vm58_vm0, %v4372_v31, 0.0  ;;  %v217_v15 = vpop.f32.mrf.mxu1  ;;  %v4430_v9 = vld [vmem:[%s6934_s0 + $0xc8] sm:$0xff] }
 0x12d   :  { %3678 = vmatmul.msk.f32.gmra.mxu3 %vm58_vm0, %v4430_v9 }
 0x12e   :  { %v504_v10 = vmul.f32 %v4349_v6, %v4349_v6  ;;  %v368_v11 = vsel %vm58_vm0, %v4360_v48, 0.0 }
 0x130   :  { %v546_v20 = vsel %vm58_vm0, %v504_v10, 0.0 }
 0x131   :  { %547 = vadd.xlane.f32.xlu1 %v546_v20  ;;  %v352_v21 = vpop.xlane.xlu1 %351  ;;  %366 = vadd.xlane.f32.xlu2 %v365_v17  ;;  %v223_v45 = vpop.f32.mrf.mxu2 }
 0x132   :  { %v441_v19 = vmul.f32 %v4255_v2, %v352_v21 }
 0x134   :  { %v4363_v28 = vsub.f32 %v4223_v53, %v441_v19  ;;  %v4379_v53 = vld [vmem:[%s6934_s0 + $0xa8] sm:$0xff]  ;;  %v218_v19 = vadd.f32 %v217_v15, %v4169_v16 }
 0x135   :  { %3674 = vmatmul.msk.f32.gmra.mxu2 %vm58_vm0, %v4379_v53 }
 0x136   :  { %v505_v30 = vmul.f32 %v4363_v28, %v4363_v28  ;;  %v283_v34 = vmul.f32 %v218_v19, %v4237_v60  ;;  %v4495_v19 = vld [vmem:[%s6934_s0 + $0xd8] sm:$0xff] }
 0x138   :  { %v549_v27 = vsel %vm58_vm0, %v505_v30, 0.0 }
 0x139   :  { %369 = vadd.xlane.f32.xlu1 %v368_v11  ;;  %550 = vadd.xlane.f32.xlu0 %v549_v27 }
 0x13d   :  { %3675 = vmatmul.msk.f32.gmra.mxu2 %vm58_vm0, %v4389_v32 }
 0x141   :  { %372 = vadd.xlane.f32.xlu0 %v371_v26  ;;  %v374_v26 = vsel %vm58_vm0, %v4433_v18, 0.0 }
 0x145   :  { %3676 = vmatmul.msk.f32.gmra.mxu2 %vm58_vm0, %v4405_v12 }
 0x17c   :  { %v533_v42 = vpop.xlane.xlu0 %532 }
 0x17d   :  { %v627_v33 = vmul.f32 %v533_v42, %v4255_v2 }
 0x17f   :  { %v659_v44 = vadd.f32 1e-05, %v627_v33 }
 0x181   :  { %3806 = vrsqrt.f32 %v659_v44  ;;  %vm697_vm3 = vweird.f32 %v659_v44 }
 0x184   :  { %v536_v50 = vpop.xlane.xlu2 %535  ;;  %v355_v51 = vpop.xlane.xlu0 %354 }
 0x185   :  { %v628_v54 = vmul.f32 %v536_v50, %v4255_v2  ;;  %v442_v55 = vmul.f32 %v4255_v2, %v355_v51  ;;  %v4462_v50 = vld [vmem:[%s6934_s0 + $0xd0] sm:$0xff] }
 0x186   :  { %3679 = vmatmul.msk.f32.gmra.mxu3 %vm58_vm0, %v4462_v50 }
 0x187   :  { %v3807_v13 = vpop.eup %3806  ;;  %v660_v56 = vadd.f32 1e-05, %v628_v54  ;;  %v4421_v59 = vsub.f32 %v4276_v23, %v442_v55  ;;  %v221_v55 = vadd.f32 %v220_v3, %v4169_v16 }
 0x188   :  { %v692_v62 = vmul.f32 %v3807_v13, %v659_v44  ;;  %vm698_vm2 = vweird.f32 %v3807_v13  ;;  %v4457_v44 = vperm.slane %v4159_v14, 2 }
 0x189   :  { %3808 = vrsqrt.f32 %v660_v56  ;;  %v506_v1 = vmul.f32 %v4421_v59, %v4421_v59  ;;  %vm699_vm4 = vmor %vm697_vm3, %vm698_vm2  ;;  %vm707_vm6 = vweird.f32 %v660_v56 }
 0x18a   :  { %v693_v4 = vmul.f32 %v3807_v13, %v692_v62  ;;  %v4469_v62 = vadd.f32 %v283_v34, %v4237_v60  ;;  %v284_v60 = vmul.f32 %v221_v55, %v4242_v61 }
 0x18b   :  { %v552_v5 = vsel %vm58_vm0, %v506_v1, 0.0 }
 0x18c   :  { %v694_v10 = vmul.f32 0.5, %v693_v4  ;;  %v539_v23 = vpop.xlane.xlu1 %538  ;;  %v358_v17 = vpop.xlane.xlu2 %357  ;;  %553 = vadd.xlane.f32.xlu2 %v552_v5 }
 0x18d   :  { %v629_v20 = vmul.f32 %v539_v23, %v4255_v2  ;;  %v443_v21 = vmul.f32 %v4255_v2, %v358_v17  ;;  %v377_v23 = vsel %vm58_vm0, %v4469_v62, 0.0 }
 0x18e   :  { %v695_v22 = vsub.f32 1.5, %v694_v10  ;;  %3680 = vmatmul.msk.f32.gmra.mxu3 %vm58_vm0, %v4495_v19 }
 0x18f   :  { %v3809_v29 = vpop.eup %3808  ;;  %v4440_v11 = vadd.f32 1e-05, %v629_v20  ;;  %v4443_v30 = vsub.f32 %v4297_v36, %v443_v21 }
 0x190   :  { %v696_v27 = vmul.f32 %v3807_v13, %v695_v22  ;;  %v702_v57 = vmul.f32 %v3809_v29, %v660_v56  ;;  %vm708_vm5 = vweird.f32 %v3809_v29 }
 0x191   :  { %3810 = vrsqrt.f32 %v4440_v11  ;;  %v507_v35 = vmul.f32 %v4443_v30, %v4443_v30  ;;  %vm709_vm7 = vmor %vm707_vm6, %vm708_vm5  ;;  %vm717_vm9 = vweird.f32 %v4440_v11 }
 0x192   :  { %v700_v41 = vsel %vm699_vm4, %v3807_v13, %v696_v27  ;;  %v703_v36 = vmul.f32 %v3809_v29, %v702_v57 }
 0x193   :  { %v1011_v42 = vmul.f32 %v700_v41, %v4260_v7  ;;  %v555_v33 = vsel %vm58_vm0, %v507_v35, 0.0 }
 0x194   :  { %v704_v51 = vmul.f32 0.5, %v703_v36  ;;  %v361_v52 = vpop.xlane.xlu1 %360  ;;  %556 = vadd.xlane.f32.xlu1 %v555_v33  ;;  %375 = vadd.xlane.f32.xlu2 %v374_v26  ;;  %v542_v54 = vpop.xlane.xlu0 %541  ;;  %v4498_v26 = vadd.f32 %v284_v60, %v4242_v61 }
 0x195   :  { %v444_v7 = vmul.f32 %v4255_v2, %v361_v52  ;;  %v630_v13 = vmul.f32 %v542_v54, %v4255_v2  ;;  %v1044_v14 = vmul.f32 %v4452_v40, %v1011_v42  ;;  %v226_v36 = vpop.f32.mrf.mxu2 }
 0x196   :  { %v705_v63 = vsub.f32 1.5, %v704_v51  ;;  %v227_v60 = vadd.f32 %v226_v36, %v4169_v16 }
 0x197   :  { %v3811_v1 = vpop.eup %3810  ;;  %v4474_v4 = vsub.f32 %v4318_v46, %v444_v7  ;;  %v4476_v15 = vadd.f32 1e-05, %v630_v13  ;;  %v4479_v3 = vadd.f32 %v4457_v44, %v1044_v14 }
 0x198   :  { %v706_v5 = vmul.f32 %v3809_v29, %v705_v63  ;;  %v712_v10 = vmul.f32 %v3811_v1, %v4440_v11  ;;  %vm718_vm8 = vweird.f32 %v3811_v1 }
 0x199   :  { %3812 = vrsqrt.f32 %v4476_v15  ;;  %3690 = vmatmul.msk.f32.vlgmr.msrb.gmra.mxu1 %vm58_vm0, %v4479_v3  ;;  %v508_v46 = vmul.f32 %v4474_v4, %v4474_v4  ;;  %vm719_vm10 = vmor %vm717_vm9, %vm718_vm8  ;;  %vm727_vm12 = vweird.f32 %v4476_v15 }
 0x19a   :  { %v713_v17 = vmul.f32 %v3811_v1, %v712_v10  ;;  %v710_v20 = vsel %vm709_vm7, %v3809_v29, %v706_v5 }
 0x19b   :  { %v558_v56 = vsel %vm58_vm0, %v508_v46, 0.0  ;;  %v1012_v21 = vmul.f32 %v710_v20, %v4279_v24  ;;  %v224_v24 = vadd.f32 %v223_v45, %v4169_v16 }
 0x19c   :  { %v714_v22 = vmul.f32 0.5, %v713_v17  ;;  %559 = vadd.xlane.f32.xlu0 %v558_v56  ;;  %378 = vadd.xlane.f32.xlu1 %v377_v23  ;;  %v545_v27 = vpop.xlane.xlu2 %544  ;;  %v364_v57 = vpop.xlane.xlu0 %363 }
 0x19d   :  { %v631_v34 = vmul.f32 %v545_v27, %v4255_v2  ;;  %v445_v29 = vmul.f32 %v4255_v2, %v364_v57  ;;  %v1045_v35 = vmul.f32 %v4452_v40, %v1012_v21  ;;  %v285_v54 = vmul.f32 %v224_v24, %v4251_v0 }
 0x19e   :  { %v715_v41 = vsub.f32 1.5, %v714_v22 }
 0x19f   :  { %v3813_v42 = vpop.eup %3812  ;;  %v4506_v33 = vadd.f32 1e-05, %v631_v34  ;;  %v4509_v61 = vsub.f32 %v4332_v38, %v445_v29  ;;  %v4512_v51 = vadd.f32 %v4457_v44, %v1045_v35  ;;  %v380_v38 = vsel %vm58_vm0, %v4498_v26, 0.0 }
 0x1a0   :  { %v716_v52 = vmul.f32 %v3811_v1, %v715_v41  ;;  %v722_v45 = vmul.f32 %v3813_v42, %v4476_v15  ;;  %v4531_v20 = vadd.f32 %v285_v54, %v4251_v0  ;;  %vm728_vm11 = vweird.f32 %v3813_v42  ;;  %v229_v0 = vpop.f32.mrf.mxu2 }
 0x1a1   :  { %3814 = vrsqrt.f32 %v4506_v33  ;;  %3691 = vmatmul.msk.f32.gmra.mxu1 %vm58_vm0, %v4512_v51  ;;  %v509_v55 = vmul.f32 %v4509_v61, %v4509_v61  ;;  %v286_v34 = vmul.f32 %v227_v60, %v4265_v8  ;;  %vm729_vm13 = vmor %vm727_vm12, %vm728_vm11  ;;  %vm737_vm15 = vweird.f32 %v4506_v33 }
 0x1a2   :  { %v723_v7 = vmul.f32 %v3813_v42, %v722_v45  ;;  %v720_v13 = vsel %vm719_vm10, %v3811_v1, %v716_v52  ;;  %v383_v29 = vsel %vm58_vm0, %v4531_v20, 0.0 }
 0x1a3   :  { %v561_v11 = vsel %vm58_vm0, %v509_v55, 0.0  ;;  %v1013_v14 = vmul.f32 %v720_v13, %v4300_v37  ;;  %v4554_v54 = vadd.f32 %v286_v34, %v4265_v8 }
 0x1a4   :  { %v724_v63 = vmul.f32 0.5, %v723_v7  ;;  %v548_v5 = vpop.xlane.xlu1 %547  ;;  %381 = vadd.xlane.f32.xlu0 %v380_v38  ;;  %v367_v10 = vpop.xlane.xlu2 %366  ;;  %562 = vadd.xlane.f32.xlu2 %v561_v11 }
 0x1a5   :  { %v632_v46 = vmul.f32 %v548_v5, %v4255_v2  ;;  %v446_v23 = vmul.f32 %v4255_v2, %v367_v10  ;;  %v1046_v17 = vmul.f32 %v4452_v40, %v1013_v14  ;;  %v386_v60 = vsel %vm58_vm0, %v4554_v54, 0.0 }
 0x1a6   :  { %v725_v1 = vsub.f32 1.5, %v724_v63 }
 0x1a7   :  { %v3815_v56 = vpop.eup %3814  ;;  %v4533_v37 = vadd.f32 1e-05, %v632_v46  ;;  %v4536_v21 = vsub.f32 %v4346_v43, %v446_v23  ;;  %v4539_v22 = vadd.f32 %v4457_v44, %v1046_v17 }
 0x1a8   :  { %v726_v27 = vmul.f32 %v3813_v42, %v725_v1  ;;  %v732_v57 = vmul.f32 %v3815_v56, %v4506_v33  ;;  %vm738_vm14 = vweird.f32 %v3815_v56  ;;  %v232_v17 = vpop.f32.mrf.mxu2 }
 0x1a9   :  { %3816 = vrsqrt.f32 %v4533_v37  ;;  %3692 = vmatmul.msk.f32.gmra.mxu1 %vm58_vm0, %v4539_v22  ;;  %v510_v43 = vmul.f32 %v4536_v21, %v4536_v21  ;;  %vm739_vm1 = vmor %vm737_vm15, %vm738_vm14  ;;  %vm747_vm3 = vweird.f32 %v4533_v37 }
 0x1aa   :  { %v733_v35 = vmul.f32 %v3815_v56, %v732_v57  ;;  %v730_v24 = vsel %vm729_vm13, %v3813_v42, %v726_v27  ;;  %v230_v42 = vadd.f32 %v229_v0, %v4169_v16 }
 0x1ab   :  { %v564_v15 = vsel %vm58_vm0, %v510_v43, 0.0  ;;  %v1014_v41 = vmul.f32 %v730_v24, %v4321_v49  ;;  %v233_v43 = vadd.f32 %v232_v17, %v4169_v16 }
 0x1ac   :  { %v734_v36 = vmul.f32 0.5, %v733_v35  ;;  %v370_v52 = vpop.xlane.xlu1 %369  ;;  %565 = vadd.xlane.f32.xlu1 %v564_v15  ;;  %384 = vadd.xlane.f32.xlu2 %v383_v29  ;;  %v551_v45 = vpop.xlane.xlu0 %550  ;;  %v287_v10 = vmul.f32 %v230_v42, %v4284_v25 }
 0x1ad   :  { %v447_v38 = vmul.f32 %v4255_v2, %v370_v52  ;;  %v633_v55 = vmul.f32 %v551_v45, %v4255_v2  ;;  %v1047_v7 = vmul.f32 %v4452_v40, %v1014_v41 }
 0x1ae   :  { %v735_v13 = vsub.f32 1.5, %v734_v36  ;;  %v4581_v29 = vadd.f32 %v287_v10, %v4284_v25  ;;  %v288_v25 = vmul.f32 %v233_v43, %v4305_v39 }
 0x1af   :  { %v3817_v11 = vpop.eup %3816  ;;  %v4561_v49 = vsub.f32 %v4360_v48, %v447_v38  ;;  %v665_v14 = vadd.f32 1e-05, %v633_v55  ;;  %v4564_v63 = vadd.f32 %v4457_v44, %v1047_v7 }
 0x1b0   :  { %v736_v8 = vmul.f32 %v3815_v56, %v735_v13  ;;  %v742_v5 = vmul.f32 %v3817_v11, %v4533_v37  ;;  %vm748_vm2 = vweird.f32 %v3817_v11  ;;  %v389_v36 = vsel %vm58_vm0, %v4581_v29, 0.0 }
 0x1b1   :  { %3818 = vrsqrt.f32 %v665_v14  ;;  %3693 = vmatmul.msk.f32.gmra.mxu1 %vm58_vm0, %v4564_v63  ;;  %v511_v48 = vmul.f32 %v4561_v49, %v4561_v49  ;;  %vm749_vm4 = vmor %vm747_vm3, %vm748_vm2  ;;  %v4601_v42 = vadd.f32 %v288_v25, %v4305_v39  ;;  %vm757_vm6 = vweird.f32 %v665_v14 }
 0x1b2   :  { %v743_v46 = vmul.f32 %v3817_v11, %v742_v5  ;;  %v740_v23 = vsel %vm739_vm1, %v3815_v56, %v736_v8 }
 0x1b3   :  { %v567_v33 = vsel %vm58_vm0, %v511_v48, 0.0  ;;  %v1015_v1 = vmul.f32 %v740_v23, %v4335_v58 }
 0x1b4   :  { %v744_v27 = vmul.f32 0.5, %v743_v46  ;;  %568 = vadd.xlane.f32.xlu0 %v567_v33  ;;  %387 = vadd.xlane.f32.xlu1 %v386_v60  ;;  %v373_v57 = vpop.xlane.xlu0 %372  ;;  %v4634_v60 = vld [vmem:[%s6934_s0 + $0xf0] sm:$0xff] }
 0x1b5   :  { %v448_v34 = vmul.f32 %v4255_v2, %v373_v57  ;;  %v1048_v0 = vmul.f32 %v4452_v40, %v1015_v1  ;;  %v4642_v1 = vld [vmem:[%s6934_s0 + $0xf8] sm:$0xff] }
 0x1b6   :  { %v745_v35 = vsub.f32 1.5, %v744_v27 }
 0x1b7   :  { %v3819_v56 = vpop.eup %3818  ;;  %v4584_v24 = vsub.f32 %v4372_v31, %v448_v34  ;;  %v4587_v58 = vadd.f32 %v4457_v44, %v1048_v0 }
 0x1b8   :  { %v746_v15 = vmul.f32 %v3817_v11, %v745_v35  ;;  %v752_v41 = vmul.f32 %v3819_v56, %v665_v14  ;;  %vm758_vm5 = vweird.f32 %v3819_v56  ;;  %v4620_v14 = vld [vmem:[%s6934_s0 + $0xe0] sm:$0xff]  ;;  %v235_v17 = vpop.f32.mrf.mxu2 }
 0x1b9   :  { %3694 = vmatmul.msk.f32.gmra.mxu1 %vm58_vm0, %v4587_v58  ;;  %v512_v31 = vmul.f32 %v4584_v24, %v4584_v24  ;;  %vm759_vm7 = vmor %vm757_vm6, %vm758_vm5  ;;  %3681 = vmatmul.msk.f32.gmra.mxu3 %vm58_vm0, %v4620_v14  ;;  %v236_v43 = vadd.f32 %v235_v17, %v4169_v16 }
 0x1ba   :  { %v753_v52 = vmul.f32 %v3819_v56, %v752_v41  ;;  %v750_v45 = vsel %vm749_vm4, %v3817_v11, %v746_v15 }
 0x1bb   :  { %v570_v38 = vsel %vm58_vm0, %v512_v31, 0.0  ;;  %v1016_v55 = vmul.f32 %v750_v45, %v4349_v6  ;;  %v392_v6 = vsel %vm58_vm0, %v4601_v42, 0.0 }
 0x1bc   :  { %v754_v37 = vmul.f32 0.5, %v753_v52  ;;  %390 = vadd.xlane.f32.xlu0 %v389_v36  ;;  %571 = vadd.xlane.f32.xlu2 %v570_v38  ;;  %v289_v36 = vmul.f32 %v236_v43, %v4379_v53 }
 0x1bd   :  { %v1049_v7 = vmul.f32 %v4452_v40, %v1016_v55 }
 0x1be   :  { %v755_v13 = vsub.f32 1.5, %v754_v37 }
 0x1bf   :  { %v4604_v8 = vadd.f32 %v4457_v44, %v1049_v7 }
 0x1c0   :  { %v756_v5 = vmul.f32 %v3819_v56, %v755_v13  ;;  %v238_v41 = vpop.f32.mrf.mxu2 }
 0x1c1   :  { %3695 = vmatmul.msk.f32.gmra.mxu1 %vm58_vm0, %v4604_v8  ;;  %v239_v13 = vadd.f32 %v238_v41, %v4169_v16 }
 0x1c2   :  { %v760_v11 = vsel %vm759_vm7, %v3819_v56, %v756_v5  ;;  %v4660_v5 = vadd.f32 %v289_v36, %v4379_v53 }
 0x1c3   :  { %v1017_v10 = vmul.f32 %v760_v11, %v4363_v28  ;;  %v4627_v28 = vld [vmem:[%s6934_s0 + $0xe8] sm:$0xff]  ;;  %v290_v17 = vmul.f32 %v239_v13, %v4389_v32 }
 0x1c4   :  { %393 = vadd.xlane.f32.xlu2 %v392_v6  ;;  %3682 = vmatmul.msk.f32.gmra.mxu3 %vm58_vm0, %v4627_v28 }
 0x1c5   :  { %v1050_v39 = vmul.f32 %v4452_v40, %v1017_v10 }
 0x1c7   :  { %v4613_v48 = vadd.f32 %v4457_v44, %v1050_v39 }
 0x1c9   :  { %3696 = vmatmul.msk.f32.gmra.mxu1 %vm58_vm0, %v4613_v48 }
 0x1cc   :  { %3683 = vmatmul.msk.f32.gmra.mxu3 %vm58_vm0, %v4634_v60 }
 0x1d4   :  { %3684 = vmatmul.msk.f32.gmra.mxu3 %vm58_vm0, %v4642_v1 }
 0x1ff   :  { %v554_v46 = vpop.xlane.xlu2 %553 }
 0x200   :  { %v634_v23 = vmul.f32 %v554_v46, %v4255_v2 }
 0x202   :  { %v666_v33 = vadd.f32 1e-05, %v634_v23 }
 0x204   :  { %3820 = vrsqrt.f32 %v666_v33  ;;  %vm767_vm9 = vweird.f32 %v666_v33 }
 0x207   :  { %v557_v27 = vpop.xlane.xlu1 %556  ;;  %v376_v57 = vpop.xlane.xlu2 %375 }
 0x208   :  { %v635_v34 = vmul.f32 %v557_v27, %v4255_v2  ;;  %v449_v0 = vmul.f32 %v4255_v2, %v376_v57  ;;  %v395_v27 = vsel %vm58_vm0, %v4660_v5, 0.0  ;;  %v241_v57 = vpop.f32.mrf.mxu2 }
 0x20a   :  { %v3821_v35 = vpop.eup %3820  ;;  %v667_v56 = vadd.f32 1e-05, %v635_v34  ;;  %v4650_v15 = vsub.f32 %v4433_v18, %v449_v0 }
 0x20b   :  { %v762_v25 = vmul.f32 %v3821_v35, %v666_v33  ;;  %vm768_vm8 = vweird.f32 %v3821_v35  ;;  %v244_v33 = vpop.f32.mrf.mxu3 }
 0x20c   :  { %3822 = vrsqrt.f32 %v667_v56  ;;  %v513_v31 = vmul.f32 %v4650_v15, %v4650_v15  ;;  %vm769_vm10 = vmor %vm767_vm9, %vm768_vm8  ;;  %vm777_vm12 = vweird.f32 %v667_v56 }
 0x20d   :  { %v763_v52 = vmul.f32 %v3821_v35, %v762_v25 }
 0x20e   :  { %v573_v45 = vsel %vm58_vm0, %v513_v31, 0.0  ;;  %v242_v31 = vadd.f32 %v241_v57, %v4169_v16 }
 0x20f   :  { %v764_v38 = vmul.f32 0.5, %v763_v52  ;;  %v379_v55 = vpop.xlane.xlu1 %378  ;;  %574 = vadd.xlane.f32.xlu1 %v573_v45  ;;  %v560_v37 = vpop.xlane.xlu0 %559 }
 0x210   :  { %v450_v7 = vmul.f32 %v4255_v2, %v379_v55  ;;  %v636_v18 = vmul.f32 %v560_v37, %v4255_v2 }
 0x211   :  { %v765_v6 = vsub.f32 1.5, %v764_v38 }
 0x212   :  { %v3823_v11 = vpop.eup %3822  ;;  %v4663_v10 = vsub.f32 %v4469_v62, %v450_v7  ;;  %v4665_v39 = vadd.f32 1e-05, %v636_v18 }
 0x213   :  { %v766_v46 = vmul.f32 %v3821_v35, %v765_v6  ;;  %v772_v23 = vmul.f32 %v3823_v11, %v667_v56  ;;  %vm778_vm11 = vweird.f32 %v3823_v11 }
 0x214   :  { %3824 = vrsqrt.f32 %v4665_v39  ;;  %v514_v53 = vmul.f32 %v4663_v10, %v4663_v10  ;;  %vm779_vm13 = vmor %vm777_vm12, %vm778_vm11  ;;  %vm787_vm15 = vweird.f32 %v4665_v39 }
 0x215   :  { %v773_v34 = vmul.f32 %v3823_v11, %v772_v23  ;;  %v770_v62 = vsel %vm769_vm10, %v3821_v35, %v766_v46  ;;  %v4680_v35 = vadd.f32 %v290_v17, %v4389_v32  ;;  %v291_v46 = vmul.f32 %v242_v31, %v4405_v12 }
 0x216   :  { %v576_v0 = vsel %vm58_vm0, %v514_v53, 0.0  ;;  %v1018_v43 = vmul.f32 %v770_v62, %v4421_v59 }
 0x217   :  { %v774_v41 = vmul.f32 0.5, %v773_v34  ;;  %577 = vadd.xlane.f32.xlu0 %v576_v0  ;;  %396 = vadd.xlane.f32.xlu1 %v395_v27  ;;  %v563_v25 = vpop.xlane.xlu2 %562  ;;  %v382_v36 = vpop.xlane.xlu0 %381  ;;  %v398_v32 = vsel %vm58_vm0, %v4680_v35, 0.0  ;;  %v4702_v62 = vadd.f32 %v291_v46, %v4405_v12 }
 0x218   :  { %v637_v52 = vmul.f32 %v563_v25, %v4255_v2  ;;  %v451_v45 = vmul.f32 %v4255_v2, %v382_v36  ;;  %v1051_v38 = vmul.f32 %v4452_v40, %v1018_v43  ;;  %v247_v36 = vpop.f32.mrf.mxu3 }
 0x219   :  { %v775_v55 = vsub.f32 1.5, %v774_v41 }
 0x21a   :  { %v3825_v59 = vpop.eup %3824  ;;  %v4682_v37 = vadd.f32 1e-05, %v637_v52  ;;  %v4685_v7 = vsub.f32 %v4498_v26, %v451_v45  ;;  %v4688_v18 = vadd.f32 %v4457_v44, %v1051_v38 }
 0x21b   :  { %v776_v13 = vmul.f32 %v3823_v11, %v775_v55  ;;  %v782_v6 = vmul.f32 %v3825_v59, %v4665_v39  ;;  %vm788_vm14 = vweird.f32 %v3825_v59  ;;  %v401_v55 = vsel %vm58_vm0, %v4702_v62, 0.0 }
 0x21c   :  { %3826 = vrsqrt.f32 %v4682_v37  ;;  %3697 = vmatmul.msk.f32.gmra.mxu1 %vm58_vm0, %v4688_v18  ;;  %v515_v26 = vmul.f32 %v4685_v7, %v4685_v7  ;;  %vm789_vm1 = vmor %vm787_vm15, %vm788_vm14  ;;  %vm797_vm3 = vweird.f32 %v4682_v37 }
 0x21d   :  { %v783_v23 = vmul.f32 %v3825_v59, %v782_v6  ;;  %v780_v17 = vsel %vm779_vm13, %v3823_v11, %v776_v13  ;;  %v245_v11 = vadd.f32 %v244_v33, %v4169_v16 }
 0x21e   :  { %v579_v56 = vsel %vm58_vm0, %v515_v26, 0.0  ;;  %v1019_v53 = vmul.f32 %v780_v17, %v4443_v30  ;;  %v248_v17 = vadd.f32 %v247_v36, %v4169_v16 }
 0x21f   :  { %v784_v27 = vmul.f32 0.5, %v783_v23  ;;  %399 = vadd.xlane.f32.xlu0 %v398_v32  ;;  %v566_v57 = vpop.xlane.xlu1 %565  ;;  %v385_v34 = vpop.xlane.xlu2 %384  ;;  %580 = vadd.xlane.f32.xlu2 %v579_v56  ;;  %v292_v33 = vmul.f32 %v245_v11, %v4413_v47 }
 0x220   :  { %v638_v0 = vmul.f32 %v566_v57, %v4255_v2  ;;  %v452_v43 = vmul.f32 %v4255_v2, %v385_v34  ;;  %v1052_v41 = vmul.f32 %v4452_v40, %v1019_v53  ;;  %v250_v36 = vpop.f32.mrf.mxu3 }
 0x221   :  { %v785_v25 = vsub.f32 1.5, %v784_v27  ;;  %v4733_v57 = vadd.f32 %v292_v33, %v4413_v47 }
 0x222   :  { %v3827_v30 = vpop.eup %3826  ;;  %v4708_v31 = vadd.f32 1e-05, %v638_v0  ;;  %v4711_v52 = vsub.f32 %v4531_v20, %v452_v43  ;;  %v4714_v12 = vadd.f32 %v4457_v44, %v1052_v41 }
 0x223   :  { %v786_v45 = vmul.f32 %v3825_v59, %v785_v25  ;;  %v792_v38 = vmul.f32 %v3827_v30, %v4682_v37  ;;  %vm798_vm2 = vweird.f32 %v3827_v30  ;;  %v293_v25 = vmul.f32 %v248_v17, %v4430_v9 }
 0x224   :  { %3828 = vrsqrt.f32 %v4708_v31  ;;  %3698 = vmatmul.msk.f32.gmra.mxu1 %vm58_vm0, %v4714_v12  ;;  %v516_v20 = vmul.f32 %v4711_v52, %v4711_v52  ;;  %vm799_vm4 = vmor %vm797_vm3, %vm798_vm2  ;;  %vm807_vm6 = vweird.f32 %v4708_v31 }
 0x225   :  { %v793_v13 = vmul.f32 %v3827_v30, %v792_v38  ;;  %v790_v6 = vsel %vm789_vm1, %v3825_v59, %v786_v45 }
 0x226   :  { %v582_v39 = vsel %vm58_vm0, %v516_v20, 0.0  ;;  %v1020_v46 = vmul.f32 %v790_v6, %v4474_v4  ;;  %v4753_v6 = vadd.f32 %v293_v25, %v4430_v9 }
 0x227   :  { %v794_v32 = vmul.f32 0.5, %v793_v13  ;;  %v388_v26 = vpop.xlane.xlu1 %387  ;;  %583 = vadd.xlane.f32.xlu1 %v582_v39  ;;  %402 = vadd.xlane.f32.xlu2 %v401_v55  ;;  %v569_v23 = vpop.xlane.xlu0 %568 }
 0x228   :  { %v453_v56 = vmul.f32 %v4255_v2, %v388_v26  ;;  %v639_v53 = vmul.f32 %v569_v23, %v4255_v2  ;;  %v1053_v27 = vmul.f32 %v4452_v40, %v1020_v46  ;;  %v253_v25 = vpop.f32.mrf.mxu3 }
 0x229   :  { %v795_v59 = vsub.f32 1.5, %v794_v32 }
 0x22a   :  { %v3829_v34 = vpop.eup %3828  ;;  %v4736_v4 = vsub.f32 %v4554_v54, %v453_v56  ;;  %v671_v0 = vadd.f32 1e-05, %v639_v53  ;;  %v4739_v43 = vadd.f32 %v4457_v44, %v1053_v27  ;;  %v404_v54 = vsel %vm58_vm0, %v4733_v57, 0.0 }
 0x22b   :  { %v796_v41 = vmul.f32 %v3827_v30, %v795_v59  ;;  %v802_v11 = vmul.f32 %v3829_v34, %v4708_v31  ;;  %vm808_vm5 = vweird.f32 %v3829_v34  ;;  %v407_v59 = vsel %vm58_vm0, %v4753_v6, 0.0 }
 0x22c   :  { %3830 = vrsqrt.f32 %v671_v0  ;;  %3699 = vmatmul.msk.f32.gmra.mxu1 %vm58_vm0, %v4739_v43  ;;  %v517_v47 = vmul.f32 %v4736_v4, %v4736_v4  ;;  %vm809_vm7 = vmor %vm807_vm6, %vm808_vm5  ;;  %vm817_vm9 = vweird.f32 %v671_v0 }
 0x22d   :  { %v803_v45 = vmul.f32 %v3829_v34, %v802_v11  ;;  %v800_v38 = vsel %vm799_vm4, %v3827_v30, %v796_v41  ;;  %v251_v30 = vadd.f32 %v250_v36, %v4169_v16 }
 0x22e   :  { %v585_v37 = vsel %vm58_vm0, %v517_v47, 0.0  ;;  %v1021_v33 = vmul.f32 %v800_v38, %v4509_v61 }
 0x22f   :  { %v804_v20 = vmul.f32 0.5, %v803_v45  ;;  %586 = vadd.xlane.f32.xlu0 %v585_v37  ;;  %405 = vadd.xlane.f32.xlu1 %v404_v54  ;;  %v572_v55 = vpop.xlane.xlu2 %571  ;;  %v391_v13 = vpop.xlane.xlu0 %390  ;;  %v294_v27 = vmul.f32 %v251_v30, %v4462_v50  ;;  %v254_v37 = vadd.f32 %v253_v25, %v4169_v16 }
 0x230   :  { %v640_v39 = vmul.f32 %v572_v55, %v4255_v2  ;;  %v454_v46 = vmul.f32 %v4255_v2, %v391_v13  ;;  %v1054_v32 = vmul.f32 %v4452_v40, %v1021_v33 }
 0x231   :  { %v805_v26 = vsub.f32 1.5, %v804_v20  ;;  %v4779_v33 = vadd.f32 %v294_v27, %v4462_v50 }
 0x232   :  { %v3831_v23 = vpop.eup %3830  ;;  %v672_v61 = vadd.f32 1e-05, %v640_v39  ;;  %v4760_v17 = vsub.f32 %v4581_v29, %v454_v46  ;;  %v4763_v56 = vadd.f32 %v4457_v44, %v1054_v32  ;;  %v295_v46 = vmul.f32 %v254_v37, %v4495_v19 }
 0x233   :  { %v806_v9 = vmul.f32 %v3829_v34, %v805_v26  ;;  %v812_v53 = vmul.f32 %v3831_v23, %v671_v0  ;;  %vm818_vm8 = vweird.f32 %v3831_v23  ;;  %v410_v32 = vsel %vm58_vm0, %v4779_v33, 0.0 }
 0x234   :  { %3832 = vrsqrt.f32 %v672_v61  ;;  %3700 = vmatmul.msk.f32.gmra.mxu1 %vm58_vm0, %v4763_v56  ;;  %v518_v29 = vmul.f32 %v4760_v17, %v4760_v17  ;;  %vm819_vm10 = vmor %vm817_vm9, %vm818_vm8  ;;  %v4798_v27 = vadd.f32 %v295_v46, %v4495_v19  ;;  %vm827_vm12 = vweird.f32 %v672_v61 }
 0x235   :  { %v813_v41 = vmul.f32 %v3831_v23, %v812_v53  ;;  %v810_v11 = vsel %vm809_vm7, %v3829_v34, %v806_v9 }
 0x236   :  { %v588_v36 = vsel %vm58_vm0, %v518_v29, 0.0  ;;  %v1022_v31 = vmul.f32 %v810_v11, %v4536_v21 }
 0x237   :  { %v814_v47 = vmul.f32 0.5, %v813_v41  ;;  %408 = vadd.xlane.f32.xlu0 %v407_v59  ;;  %v394_v54 = vpop.xlane.xlu2 %393  ;;  %589 = vadd.xlane.f32.xlu2 %v588_v36 }
 0x238   :  { %v455_v45 = vmul.f32 %v4255_v2, %v394_v54  ;;  %v1055_v38 = vmul.f32 %v4452_v40, %v1022_v31 }
 0x239   :  { %v815_v20 = vsub.f32 1.5, %v814_v47 }
 0x23a   :  { %v3833_v34 = vpop.eup %3832  ;;  %v4782_v55 = vsub.f32 %v4601_v42, %v455_v45  ;;  %v4785_v21 = vadd.f32 %v4457_v44, %v1055_v38 }
 0x23b   :  { %v816_v13 = vmul.f32 %v3831_v23, %v815_v20  ;;  %v822_v39 = vmul.f32 %v3833_v34, %v672_v61  ;;  %vm828_vm11 = vweird.f32 %v3833_v34 }
 0x23c   :  { %3701 = vmatmul.msk.f32.gmra.mxu1 %vm58_vm0, %v4785_v21  ;;  %v519_v50 = vmul.f32 %v4782_v55, %v4782_v55  ;;  %vm829_vm13 = vmor %vm827_vm12, %vm828_vm11  ;;  %v256_v36 = vpop.f32.mrf.mxu3 }
 0x23d   :  { %v823_v42 = vmul.f32 %v3833_v34, %v822_v39  ;;  %v820_v30 = vsel %vm819_vm10, %v3831_v23, %v816_v13  ;;  %v257_v37 = vadd.f32 %v256_v36, %v4169_v16 }
 0x23e   :  { %v591_v26 = vsel %vm58_vm0, %v519_v50, 0.0  ;;  %v1023_v9 = vmul.f32 %v820_v30, %v4561_v49  ;;  %v413_v49 = vsel %vm58_vm0, %v4798_v27, 0.0 }
 0x23f   :  { %v824_v0 = vmul.f32 0.5, %v823_v42  ;;  %592 = vadd.xlane.f32.xlu1 %v591_v26  ;;  %411 = vadd.xlane.f32.xlu2 %v410_v32  ;;  %v296_v50 = vmul.f32 %v257_v37, %v4620_v14 }
 0x240   :  { %v1056_v53 = vmul.f32 %v4452_v40, %v1023_v9 }
 0x241   :  { %v825_v59 = vsub.f32 1.5, %v824_v0 }
 0x242   :  { %v4801_v29 = vadd.f32 %v4457_v44, %v1056_v53 }
 0x243   :  { %v826_v41 = vmul.f32 %v3833_v34, %v825_v59 }
 0x244   :  { %3702 = vmatmul.msk.f32.gmra.mxu1 %vm58_vm0, %v4801_v29 }
 0x245   :  { %v830_v23 = vsel %vm829_vm13, %v3833_v34, %v826_v41  ;;  %v4829_v41 = vadd.f32 %v296_v50, %v4620_v14 }
 0x246   :  { %v1024_v11 = vmul.f32 %v830_v23, %v4584_v24 }
 0x247   :  { %414 = vadd.xlane.f32.xlu1 %v413_v49  ;;  %v259_v20 = vpop.f32.mrf.mxu3  ;;  %v416_v14 = vsel %vm58_vm0, %v4829_v41, 0.0 }
 0x248   :  { %v1057_v19 = vmul.f32 %v4452_v40, %v1024_v11  ;;  %v260_v59 = vadd.f32 %v259_v20, %v4169_v16 }
 0x24a   :  { %v4810_v25 = vadd.f32 %v4457_v44, %v1057_v19 }
 0x24c   :  { %3703 = vmatmul.msk.f32.gmra.mxu1 %vm58_vm0, %v4810_v25 }
 0x282   :  { %v575_v61 = vpop.xlane.xlu1 %574 }
 0x283   :  { %v641_v31 = vmul.f32 %v575_v61, %v4255_v2 }
 0x285   :  { %v673_v47 = vadd.f32 1e-05, %v641_v31  ;;  %v262_v31 = vpop.f32.mrf.mxu3 }
 0x286   :  { %v263_v50 = vadd.f32 %v262_v31, %v4169_v16 }
 0x287   :  { %3834 = vrsqrt.f32 %v673_v47  ;;  %vm837_vm15 = vweird.f32 %v673_v47 }
 0x28a   :  { %v397_v54 = vpop.xlane.xlu1 %396  ;;  %v578_v45 = vpop.xlane.xlu0 %577 }
 0x28b   :  { %v456_v38 = vmul.f32 %v4255_v2, %v397_v54  ;;  %v642_v24 = vmul.f32 %v578_v45, %v4255_v2  ;;  %v297_v54 = vmul.f32 %v260_v59, %v4627_v28 }
 0x28d   :  { %v3835_v34 = vpop.eup %3834  ;;  %v4819_v13 = vsub.f32 %v4660_v5, %v456_v38  ;;  %v674_v39 = vadd.f32 1e-05, %v642_v24 }
 0x28e   :  { %v832_v46 = vmul.f32 %v3835_v34, %v673_v47  ;;  %vm838_vm14 = vweird.f32 %v3835_v34 }
 0x28f   :  { %3836 = vrsqrt.f32 %v674_v39  ;;  %v520_v32 = vmul.f32 %v4819_v13, %v4819_v13  ;;  %vm839_vm1 = vmor %vm837_vm15, %vm838_vm14  ;;  %vm847_vm3 = vweird.f32 %v674_v39 }
 0x290   :  { %v833_v42 = vmul.f32 %v3835_v34, %v832_v46 }
 0x291   :  { %v594_v30 = vsel %vm58_vm0, %v520_v32, 0.0 }
 0x292   :  { %v834_v26 = vmul.f32 0.5, %v833_v42  ;;  %595 = vadd.xlane.f32.xlu0 %v594_v30  ;;  %v581_v9 = vpop.xlane.xlu2 %580  ;;  %v400_v0 = vpop.xlane.xlu0 %399 }
 0x293   :  { %v643_v53 = vmul.f32 %v581_v9, %v4255_v2  ;;  %v457_v5 = vmul.f32 %v4255_v2, %v400_v0  ;;  %v3685_v0 = vld [vmem:[%s6935_s2 + $0x4] sm:$0x7] }
 0x294   :  { %v835_v49 = vsub.f32 1.5, %v834_v26  ;;  %v4849_v26 = vadd.f32 %v297_v54, %v4627_v28  ;;  %v4871_v31 = vperm.slane %v3685_v0, 0 }
 0x295   :  { %v3837_v23 = vpop.eup %3836  ;;  %v4831_v11 = vadd.f32 1e-05, %v643_v53  ;;  %v4834_v19 = vsub.f32 %v4680_v35, %v457_v5 }
 0x296   :  { %v836_v61 = vmul.f32 %v3835_v34, %v835_v49  ;;  %v842_v36 = vmul.f32 %v3837_v23, %v674_v39  ;;  %vm848_vm2 = vweird.f32 %v3837_v23 }
 0x297   :  { %3838 = vrsqrt.f32 %v4831_v11  ;;  %v521_v45 = vmul.f32 %v4834_v19, %v4834_v19  ;;  %vm849_vm4 = vmor %vm847_vm3, %vm848_vm2  ;;  %vm857_vm6 = vweird.f32 %v4831_v11 }
 0x298   :  { %v843_v38 = vmul.f32 %v3837_v23, %v842_v36  ;;  %v840_v24 = vsel %vm839_vm1, %v3835_v34, %v836_v61  ;;  %v1230_v34 = vpop.f32.mrf.mxu1  ;;  %v298_v61 = vmul.f32 %v263_v50, %v4634_v60 }
 0x299   :  { %v597_v35 = vsel %vm58_vm0, %v521_v45, 0.0  ;;  %v1025_v37 = vmul.f32 %v840_v24, %v4650_v15 }
 0x29a   :  { %v844_v47 = vmul.f32 0.5, %v843_v38  ;;  %417 = vadd.xlane.f32.xlu0 %v416_v14  ;;  %v584_v20 = vpop.xlane.xlu1 %583  ;;  %v403_v46 = vpop.xlane.xlu2 %402  ;;  %598 = vadd.xlane.f32.xlu2 %v597_v35 }
 0x29b   :  { %v644_v32 = vmul.f32 %v584_v20, %v4255_v2  ;;  %v458_v42 = vmul.f32 %v4255_v2, %v403_v46  ;;  %v1058_v30 = vmul.f32 %v4452_v40, %v1025_v37  ;;  %v265_v14 = vpop.f32.mrf.mxu3 }
 0x29c   :  { %v845_v9 = vsub.f32 1.5, %v844_v47  ;;  %v4876_v47 = vadd.f32 %v298_v61, %v4634_v60 }
 0x29d   :  { %v3839_v15 = vpop.eup %3838  ;;  %v4854_v53 = vadd.f32 1e-05, %v644_v32  ;;  %v4857_v5 = vsub.f32 %v4702_v62, %v458_v42  ;;  %v4860_v59 = vadd.f32 %v4457_v44, %v1058_v30  ;;  %v419_v62 = vsel %vm58_vm0, %v4849_v26, 0.0 }
 0x29e   :  { %v846_v49 = vmul.f32 %v3837_v23, %v845_v9  ;;  %v852_v28 = vmul.f32 %v3839_v15, %v4831_v11  ;;  %v1231_v32 = vadd.f32 %v1230_v34, %v4871_v31  ;;  %vm858_vm5 = vweird.f32 %v3839_v15  ;;  %v3998_v11 = vld [vmem:[%s6934_s0] sm:$0xff] }
 0x29f   :  { %3840 = vrsqrt.f32 %v4854_v53  ;;  %3704 = vmatmul.msk.f32.gmra.mxu1 %vm58_vm0, %v4860_v59  ;;  %v522_v36 = vmul.f32 %v4857_v5, %v4857_v5  ;;  %vm859_vm7 = vmor %vm857_vm6, %vm858_vm5  ;;  %v422_v34 = vsel %vm58_vm0, %v4876_v47, 0.0  ;;  %vm867_vm9 = vweird.f32 %v4854_v53 }
 0x2a0   :  { %v853_v54 = vmul.f32 %v3839_v15, %v852_v28  ;;  %v850_v39 = vsel %vm849_vm4, %v3837_v23, %v846_v49  ;;  %v266_v23 = vadd.f32 %v265_v14, %v4169_v16  ;;  %v1233_v0 = vpop.f32.mrf.mxu1  ;;  %v1326_v61 = vmul.f32 %v3998_v11, %v1231_v32 }
 0x2a1   :  { %v600_v45 = vsel %vm58_vm0, %v522_v36, 0.0  ;;  %v1026_v38 = vmul.f32 %v850_v39, %v4663_v10 }
 0x2a2   :  { %v854_v24 = vmul.f32 0.5, %v853_v54  ;;  %v406_v35 = vpop.xlane.xlu1 %405  ;;  %601 = vadd.xlane.f32.xlu1 %v600_v45  ;;  %420 = vadd.xlane.f32.xlu2 %v419_v62  ;;  %v587_v37 = vpop.xlane.xlu0 %586  ;;  %v299_v16 = vmul.f32 %v266_v23, %v4642_v1 }
 0x2a3   :  { %v459_v20 = vmul.f32 %v4255_v2, %v406_v35  ;;  %v645_v46 = vmul.f32 %v587_v37, %v4255_v2  ;;  %v1059_v50 = vmul.f32 %v4452_v40, %v1026_v38 }
 0x2a4   :  { %v855_v42 = vsub.f32 1.5, %v854_v24 }
 0x2a5   :  { %v3841_v10 = vpop.eup %3840  ;;  %v4884_v30 = vsub.f32 %v4733_v57, %v459_v20  ;;  %v4886_v9 = vadd.f32 1e-05, %v645_v46  ;;  %v4889_v60 = vadd.f32 %v4457_v44, %v1059_v50  ;;  %v4910_v20 = vadd.f32 %v299_v16, %v4642_v1 }
 0x2a6   :  { %v856_v49 = vmul.f32 %v3839_v15, %v855_v42  ;;  %v862_v28 = vmul.f32 %v3841_v10, %v4854_v53  ;;  %vm868_vm8 = vweird.f32 %v3841_v10  ;;  %v1234_v50 = vadd.f32 %v1233_v0, %v4871_v31  ;;  %v3999_v53 = vld [vmem:[%s6934_s0 + $0x8] sm:$0xff] }
 0x2a7   :  { %3842 = vrsqrt.f32 %v4886_v9  ;;  %3705 = vmatmul.msk.f32.gmra.mxu1 %vm58_vm0, %v4889_v60  ;;  %v523_v57 = vmul.f32 %v4884_v30, %v4884_v30  ;;  %vm869_vm10 = vmor %vm867_vm9, %vm868_vm8  ;;  %vm877_vm12 = vweird.f32 %v4886_v9 }
 0x2a8   :  { %v860_v36 = vsel %vm859_vm7, %v3839_v15, %v856_v49  ;;  %v863_v62 = vmul.f32 %v3841_v10, %v862_v28  ;;  %v1236_v0 = vpop.f32.mrf.mxu1 }
 0x2a9   :  { %v1027_v54 = vmul.f32 %v860_v36, %v4685_v7  ;;  %v603_v39 = vsel %vm58_vm0, %v523_v57, 0.0  ;;  %v4913_v7 = vadd.f32 %v1326_v61, %v4479_v3  ;;  %v425_v3 = vsel %vm58_vm0, %v4910_v20, 0.0 }
 0x2aa   :  { %v864_v14 = vmul.f32 0.5, %v863_v62  ;;  %604 = vadd.xlane.f32.xlu0 %v603_v39  ;;  %423 = vadd.xlane.f32.xlu1 %v422_v34  ;;  %v590_v45 = vpop.xlane.xlu2 %589  ;;  %v409_v38 = vpop.xlane.xlu0 %408  ;;  %v1327_v57 = vmul.f32 %v3999_v53, %v1234_v50 }
 0x2ab   :  { %v646_v24 = vmul.f32 %v590_v45, %v4255_v2  ;;  %v460_v35 = vmul.f32 %v4255_v2, %v409_v38  ;;  %v1060_v37 = vmul.f32 %v4452_v40, %v1027_v54  ;;  %v1390_v11 = vsel %vm58_vm0, %v4913_v7, 0.0 }
 0x2ac   :  { %v865_v15 = vsub.f32 1.5, %v864_v14 }
 0x2ad   :  { %v3843_v46 = vpop.eup %3842  ;;  %v4916_v23 = vadd.f32 1e-05, %v646_v24  ;;  %v4919_v32 = vsub.f32 %v4753_v6, %v460_v35  ;;  %v4922_v42 = vadd.f32 %v4457_v44, %v1060_v37  ;;  %v4950_v37 = vadd.f32 %v1327_v57, %v4512_v51 }
 0x2ae   :  { %v866_v49 = vmul.f32 %v3841_v10, %v865_v15  ;;  %v872_v1 = vmul.f32 %v3843_v46, %v4886_v9  ;;  %vm878_vm11 = vweird.f32 %v3843_v46  ;;  %v1237_v15 = vadd.f32 %v1236_v0, %v4871_v31  ;;  %v4000_v9 = vld [vmem:[%s6934_s0 + $0x10] sm:$0xff] }
 0x2af   :  { %3844 = vrsqrt.f32 %v4916_v23  ;;  %3706 = vmatmul.msk.f32.gmra.mxu1 %vm58_vm0, %v4922_v42  ;;  %v524_v6 = vmul.f32 %v4919_v32, %v4919_v32  ;;  %vm879_vm13 = vmor %vm877_vm12, %vm878_vm11  ;;  %vm887_vm15 = vweird.f32 %v4916_v23 }
 0x2b0   :  { %v870_v28 = vsel %vm869_vm10, %v3841_v10, %v866_v49  ;;  %v873_v16 = vmul.f32 %v3843_v46, %v872_v1 }
 0x2b1   :  { %v1028_v34 = vmul.f32 %v870_v28, %v4711_v52  ;;  %v606_v61 = vsel %vm58_vm0, %v524_v6, 0.0  ;;  %v1393_v6 = vsel %vm58_vm0, %v4950_v37, 0.0  ;;  %v1328_v28 = vmul.f32 %v4000_v9, %v1237_v15  ;;  %v4001_v15 = vld [vmem:[%s6934_s0 + $0x18] sm:$0xff] }
 0x2b2   :  { %v874_v36 = vmul.f32 0.5, %v873_v16  ;;  %426 = vadd.xlane.f32.xlu0 %v425_v3  ;;  %v593_v62 = vpop.xlane.xlu1 %592  ;;  %1391 = vadd.xlane.f32.xlu1 %v1390_v11  ;;  %v412_v54 = vpop.xlane.xlu2 %411 }
 0x2b3   :  { %v647_v10 = vmul.f32 %v593_v62, %v4255_v2  ;;  %v461_v39 = vmul.f32 %v4255_v2, %v412_v54  ;;  %607 = vadd.xlane.f32.xlu2 %v606_v61  ;;  %v1061_v14 = vmul.f32 %v4452_v40, %v1028_v34  ;;  %v1239_v16 = vpop.f32.mrf.mxu1 }
 0x2b4   :  { %v875_v45 = vsub.f32 1.5, %v874_v36  ;;  %v1240_v61 = vadd.f32 %v1239_v16, %v4871_v31 }
 0x2b5   :  { %v3845_v52 = vpop.eup %3844  ;;  %v679_v38 = vadd.f32 1e-05, %v647_v10  ;;  %v4944_v24 = vsub.f32 %v4779_v33, %v461_v39  ;;  %v4947_v35 = vadd.f32 %v4457_v44, %v1061_v14  ;;  %v4977_v39 = vadd.f32 %v1328_v28, %v4539_v22 }
 0x2b6   :  { %v876_v50 = vmul.f32 %v3843_v46, %v875_v45  ;;  %v882_v49 = vmul.f32 %v3845_v52, %v4916_v23  ;;  %vm888_vm14 = vweird.f32 %v3845_v52 }
 0x2b7   :  { %3846 = vrsqrt.f32 %v679_v38  ;;  %3707 = vmatmul.msk.f32.gmra.mxu1 %vm58_vm0, %v4947_v35  ;;  %v525_v33 = vmul.f32 %v4944_v24, %v4944_v24  ;;  %vm889_vm1 = vmor %vm887_vm15, %vm888_vm14  ;;  %vm897_vm3 = vweird.f32 %v679_v38 }
 0x2b8   :  { %v880_v1 = vsel %vm879_vm13, %v3843_v46, %v876_v50  ;;  %v883_v3 = vmul.f32 %v3845_v52, %v882_v49  ;;  %v1329_v50 = vmul.f32 %v4001_v15, %v1240_v61 }
 0x2b9   :  { %v1029_v51 = vmul.f32 %v880_v1, %v4736_v4  ;;  %v609_v0 = vsel %vm58_vm0, %v525_v33, 0.0  ;;  %v1396_v33 = vsel %vm58_vm0, %v4977_v39, 0.0 }
 0x2ba   :  { %v884_v53 = vmul.f32 0.5, %v883_v3  ;;  %1394 = vadd.xlane.f32.xlu0 %v1393_v6  ;;  %v415_v57 = vpop.xlane.xlu1 %414 }
 0x2bb   :  { %v462_v34 = vmul.f32 %v4255_v2, %v415_v57  ;;  %610 = vadd.xlane.f32.xlu2 %v609_v0  ;;  %v1062_v46 = vmul.f32 %v4452_v40, %v1029_v51  ;;  %v4995_v51 = vadd.f32 %v1329_v50, %v4564_v63  ;;  %v1242_v63 = vpop.f32.mrf.mxu1  ;;  %v4002_v50 = vld [vmem:[%s6934_s0 + $0x20] sm:$0xff] }
 0x2bc   :  { %v885_v4 = vsub.f32 1.5, %v884_v53 }
 0x2bd   :  { %v3847_v11 = vpop.eup %3846  ;;  %v4970_v36 = vsub.f32 %v4798_v27, %v462_v34  ;;  %v4973_v62 = vadd.f32 %v4457_v44, %v1062_v46  ;;  %v1399_v9 = vsel %vm58_vm0, %v4995_v51, 0.0 }
 0x2be   :  { %v886_v54 = vmul.f32 %v3845_v52, %v885_v4  ;;  %v892_v10 = vmul.f32 %v3847_v11, %v679_v38  ;;  %vm898_vm2 = vweird.f32 %v3847_v11 }
 0x2bf   :  { %3708 = vmatmul.msk.f32.gmra.mxu1 %vm58_vm0, %v4973_v62  ;;  %v526_v14 = vmul.f32 %v4970_v36, %v4970_v36  ;;  %vm899_vm4 = vmor %vm897_vm3, %vm898_vm2 }
 0x2c0   :  { %v890_v45 = vsel %vm889_vm1, %v3845_v52, %v886_v54  ;;  %v893_v27 = vmul.f32 %v3847_v11, %v892_v10  ;;  %v1243_v54 = vadd.f32 %v1242_v63, %v4871_v31 }
 0x2c1   :  { %v1030_v23 = vmul.f32 %v890_v45, %v4760_v17  ;;  %v612_v49 = vsel %vm58_vm0, %v526_v14, 0.0 }
 0x2c2   :  { %v894_v22 = vmul.f32 0.5, %v893_v27  ;;  %613 = vadd.xlane.f32.xlu1 %v612_v49 }
 0x2c3   :  { %1397 = vadd.xlane.f32.xlu2 %v1396_v33  ;;  %v1063_v1 = vmul.f32 %v4452_v40, %v1030_v23  ;;  %v1245_v34 = vpop.f32.mrf.mxu1  ;;  %v1330_v23 = vmul.f32 %v4002_v50, %v1243_v54 }
 0x2c4   :  { %v895_v3 = vsub.f32 1.5, %v894_v22 }
 0x2c5   :  { %v4992_v52 = vadd.f32 %v4457_v44, %v1063_v1 }
 0x2c6   :  { %v896_v6 = vmul.f32 %v3847_v11, %v895_v3 }
 0x2c7   :  { %3709 = vmatmul.msk.f32.gmra.mxu1 %vm58_vm0, %v4992_v52 }
 0x2c8   :  { %v900_v17 = vsel %vm899_vm4, %v3847_v11, %v896_v6 }
 0x2c9   :  { %v1031_v0 = vmul.f32 %v900_v17, %v4782_v55 }
 0x2ca   :  { %1400 = vadd.xlane.f32.xlu1 %v1399_v9  ;;  %v1246_v9 = vadd.f32 %v1245_v34, %v4871_v31  ;;  %v4003_v34 = vld [vmem:[%s6934_s0 + $0x28] sm:$0xff] }
 0x2cb   :  { %v1064_v28 = vmul.f32 %v4452_v40, %v1031_v0  ;;  %v1248_v6 = vpop.f32.mrf.mxu1 }
 0x2cd   :  { %v5004_v16 = vadd.f32 %v4457_v44, %v1064_v28 }
 0x2cf   :  { %3710 = vmatmul.msk.f32.gmra.mxu1 %vm58_vm0, %v5004_v16 }
 0x305   :  { %v596_v38 = vpop.xlane.xlu0 %595 }
 0x306   :  { %v648_v53 = vmul.f32 %v596_v38, %v4255_v2  ;;  %v5030_v38 = vadd.f32 %v1330_v23, %v4587_v58 }
 0x308   :  { %v680_v57 = vadd.f32 1e-05, %v648_v53 }
 0x30a   :  { %3848 = vrsqrt.f32 %v680_v57  ;;  %vm907_vm6 = vweird.f32 %v680_v57 }
 0x30d   :  { %v599_v55 = vpop.xlane.xlu2 %598  ;;  %v418_v46 = vpop.xlane.xlu0 %417 }
 0x30e   :  { %v649_v4 = vmul.f32 %v599_v55, %v4255_v2  ;;  %v463_v11 = vmul.f32 %v4255_v2, %v418_v46 }
 0x310   :  { %v3849_v61 = vpop.eup %3848  ;;  %v681_v10 = vadd.f32 1e-05, %v649_v4  ;;  %v5013_v14 = vsub.f32 %v4829_v41, %v463_v11 }
 0x311   :  { %v902_v45 = vmul.f32 %v3849_v61, %v680_v57  ;;  %vm908_vm5 = vweird.f32 %v3849_v61  ;;  %v1402_v57 = vsel %vm58_vm0, %v5030_v38, 0.0 }
 0x312   :  { %3850 = vrsqrt.f32 %v681_v10  ;;  %v527_v27 = vmul.f32 %v5013_v14, %v5013_v14  ;;  %vm909_vm7 = vmor %vm907_vm6, %vm908_vm5  ;;  %vm917_vm9 = vweird.f32 %v681_v10 }
 0x313   :  { %v903_v15 = vmul.f32 %v3849_v61, %v902_v45 }
 0x314   :  { %v615_v49 = vsel %vm58_vm0, %v527_v27, 0.0 }
 0x315   :  { %v904_v22 = vmul.f32 0.5, %v903_v15  ;;  %v602_v33 = vpop.xlane.xlu1 %601  ;;  %v421_v1 = vpop.xlane.xlu2 %420  ;;  %616 = vadd.xlane.f32.xlu0 %v615_v49  ;;  %v1249_v49 = vadd.f32 %v1248_v6, %v4871_v31  ;;  %v4004_v6 = vld [vmem:[%s6934_s0 + $0x30] sm:$0xff] }
 0x316   :  { %v650_v41 = vmul.f32 %v602_v33, %v4255_v2  ;;  %v464_v3 = vmul.f32 %v4255_v2, %v421_v1 }
 0x317   :  { %v905_v17 = vsub.f32 1.5, %v904_v22  ;;  %v1251_v22 = vpop.f32.mrf.mxu1 }
 0x318   :  { %v3851_v0 = vpop.eup %3850  ;;  %v5024_v28 = vadd.f32 1e-05, %v650_v41  ;;  %v5027_v63 = vsub.f32 %v4849_v26, %v464_v3  ;;  %v1331_v26 = vmul.f32 %v4003_v34, %v1246_v9 }
 0x319   :  { %v906_v53 = vmul.f32 %v3849_v61, %v905_v17  ;;  %v912_v55 = vmul.f32 %v3851_v0, %v681_v10  ;;  %vm918_vm8 = vweird.f32 %v3851_v0 }
 0x31a   :  { %3852 = vrsqrt.f32 %v5024_v28  ;;  %v528_v46 = vmul.f32 %v5027_v63, %v5027_v63  ;;  %v5055_v17 = vadd.f32 %v1331_v26, %v4604_v8  ;;  %vm919_vm10 = vmor %vm917_vm9, %vm918_vm8  ;;  %vm927_vm12 = vweird.f32 %v5024_v28 }
 0x31b   :  { %v910_v4 = vsel %vm909_vm7, %v3849_v61, %v906_v53  ;;  %v913_v11 = vmul.f32 %v3851_v0, %v912_v55  ;;  %v1332_v55 = vmul.f32 %v4004_v6, %v1249_v49 }
 0x31c   :  { %v1032_v54 = vmul.f32 %v910_v4, %v4819_v13  ;;  %v618_v58 = vsel %vm58_vm0, %v528_v46, 0.0 }
 0x31d   :  { %v914_v45 = vmul.f32 0.5, %v913_v11  ;;  %v424_v27 = vpop.xlane.xlu1 %423  ;;  %619 = vadd.xlane.f32.xlu2 %v618_v58  ;;  %1403 = vadd.xlane.f32.xlu0 %v1402_v57  ;;  %v605_v15 = vpop.xlane.xlu0 %604  ;;  %v1405_v11 = vsel %vm58_vm0, %v5055_v17, 0.0 }
 0x31e   :  { %v465_v61 = vmul.f32 %v4255_v2, %v424_v27  ;;  %v651_v50 = vmul.f32 %v605_v15, %v4255_v2  ;;  %v1065_v23 = vmul.f32 %v4452_v40, %v1032_v54  ;;  %v5075_v15 = vadd.f32 %v1332_v55, %v4613_v48  ;;  %v4005_v55 = vld [vmem:[%s6934_s0 + $0x38] sm:$0xff] }
 0x31f   :  { %v915_v13 = vsub.f32 1.5, %v914_v45 }
 0x320   :  { %v3853_v33 = vpop.eup %3852  ;;  %v5047_v1 = vsub.f32 %v4876_v47, %v465_v61  ;;  %v5049_v41 = vadd.f32 1e-05, %v651_v50  ;;  %v5052_v3 = vadd.f32 %v4457_v44, %v1065_v23  ;;  %v1252_v50 = vadd.f32 %v1251_v22, %v4871_v31 }
 0x321   :  { %v916_v9 = vmul.f32 %v3851_v0, %v915_v13  ;;  %v922_v53 = vmul.f32 %v3853_v33, %v5024_v28  ;;  %vm928_vm11 = vweird.f32 %v3853_v33  ;;  %v1408_v28 = vsel %vm58_vm0, %v5075_v15, 0.0 }
 0x322   :  { %3854 = vrsqrt.f32 %v5049_v41  ;;  %3711 = vmatmul.msk.f32.gmra.mxu1 %vm58_vm0, %v5052_v3  ;;  %v529_v47 = vmul.f32 %v5047_v1, %v5047_v1  ;;  %vm929_vm13 = vmor %vm927_vm12, %vm928_vm11  ;;  %vm937_vm15 = vweird.f32 %v5049_v41 }
 0x323   :  { %v920_v8 = vsel %vm919_vm10, %v3851_v0, %v916_v9  ;;  %v923_v46 = vmul.f32 %v3853_v33, %v922_v53  ;;  %v1254_v9 = vpop.f32.mrf.mxu1 }
 0x324   :  { %v1033_v10 = vmul.f32 %v920_v8, %v4834_v19  ;;  %v621_v4 = vsel %vm58_vm0, %v529_v47, 0.0  ;;  %v1333_v8 = vmul.f32 %v4005_v55, %v1252_v50 }
 0x325   :  { %v924_v34 = vmul.f32 0.5, %v923_v46  ;;  %622 = vadd.xlane.f32.xlu1 %v621_v4  ;;  %v1392_v26 = vpop.xlane.xlu1 %1391  ;;  %1406 = vadd.xlane.f32.xlu2 %v1405_v11  ;;  %v427_v54 = vpop.xlane.xlu0 %426 }
 0x326   :  { %v1486_v58 = vmul.f32 %v1392_v26, %v4255_v2  ;;  %v608_v57 = vpop.xlane.xlu2 %607  ;;  %v466_v45 = vmul.f32 %v4255_v2, %v427_v54  ;;  %v1066_v0 = vmul.f32 %v4452_v40, %v1033_v10 }
 0x327   :  { %v925_v27 = vsub.f32 1.5, %v924_v34  ;;  %v652_v19 = vmul.f32 %v608_v57, %v4255_v2 }
 0x328   :  { %v3855_v61 = vpop.eup %3854  ;;  %v5079_v23 = vsub.f32 %v4913_v7, %v1486_v58  ;;  %v5082_v49 = vsub.f32 %v4910_v20, %v466_v45  ;;  %v5085_v13 = vadd.f32 %v4457_v44, %v1066_v0  ;;  %v5116_v0 = vadd.f32 %v1333_v8, %v4688_v18 }
 0x329   :  { %v926_v53 = vmul.f32 %v3853_v33, %v925_v27  ;;  %v932_v47 = vmul.f32 %v3855_v61, %v5049_v41  ;;  %v5089_v48 = vadd.f32 1e-05, %v652_v19  ;;  %vm938_vm14 = vweird.f32 %v3855_v61 }
 0x32a   :  { %3712 = vmatmul.msk.f32.gmra.mxu1 %vm58_vm0, %v5085_v13  ;;  %v1550_v7 = vmul.f32 %v5079_v23, %v5079_v23  ;;  %v530_v20 = vmul.f32 %v5082_v49, %v5082_v49  ;;  %v1255_v19 = vadd.f32 %v1254_v9, %v4871_v31  ;;  %vm939_vm1 = vmor %vm937_vm15, %vm938_vm14  ;;  %v1411_v9 = vsel %vm58_vm0, %v5116_v0, 0.0 }
 0x32b   :  { %v930_v22 = vsel %vm929_vm13, %v3853_v33, %v926_v53  ;;  %v933_v6 = vmul.f32 %v3855_v61, %v932_v47  ;;  %3856 = vrsqrt.f32 %v5089_v48  ;;  %vm947_vm3 = vweird.f32 %v5089_v48 }
 0x32c   :  { %v1034_v46 = vmul.f32 %v930_v22, %v4857_v5  ;;  %v1582_v10 = vsel %vm58_vm0, %v1550_v7, 0.0  ;;  %v624_v4 = vsel %vm58_vm0, %v530_v20, 0.0  ;;  %v1257_v7 = vpop.f32.mrf.mxu1 }
 0x32d   :  { %v934_v11 = vmul.f32 0.5, %v933_v6  ;;  %1583 = vadd.xlane.f32.xlu1 %v1582_v10  ;;  %1409 = vadd.xlane.f32.xlu2 %v1408_v28  ;;  %v1395_v33 = vpop.xlane.xlu0 %1394  ;;  %v4006_v6 = vld [vmem:[%s6934_s0 + $0x40] sm:$0xff] }
 0x32e   :  { %v611_v34 = vpop.xlane.xlu2 %610  ;;  %625 = vadd.xlane.f32.xlu0 %v624_v4  ;;  %v1487_v26 = vmul.f32 %v1395_v33, %v4255_v2  ;;  %v1067_v54 = vmul.f32 %v4452_v40, %v1034_v46  ;;  %v1334_v28 = vmul.f32 %v4006_v6, %v1255_v19 }
 0x32f   :  { %v935_v58 = vsub.f32 1.5, %v934_v11  ;;  %v653_v57 = vmul.f32 %v611_v34, %v4255_v2 }
 0x330   :  { %v5110_v5 = vsub.f32 %v4950_v37, %v1487_v26  ;;  %v5113_v45 = vadd.f32 %v4457_v44, %v1067_v54  ;;  %v1258_v26 = vadd.f32 %v1257_v7, %v4871_v31 }
 0x331   :  { %v3857_v27 = vpop.eup %3856  ;;  %v936_v50 = vmul.f32 %v3855_v61, %v935_v58  ;;  %v685_v53 = vadd.f32 1e-05, %v653_v57  ;;  %v5143_v58 = vadd.f32 %v1334_v28, %v4714_v12 }
 0x332   :  { %v942_v47 = vmul.f32 %v3857_v27, %v5089_v48  ;;  %3713 = vmatmul.msk.f32.gmra.mxu1 %vm58_vm0, %v5113_v45  ;;  %v1551_v37 = vmul.f32 %v5110_v5, %v5110_v5  ;;  %vm948_vm2 = vweird.f32 %v3857_v27 }
 0x333   :  { %v940_v20 = vsel %vm939_vm1, %v3855_v61, %v936_v50  ;;  %3858 = vrsqrt.f32 %v685_v53  ;;  %vm949_vm4 = vmor %vm947_vm3, %vm948_vm2  ;;  %vm957_vm6 = vweird.f32 %v685_v53 }
 0x334   :  { %v1035_v18 = vmul.f32 %v940_v20, %v4884_v30  ;;  %v943_v22 = vmul.f32 %v3857_v27, %v942_v47  ;;  %v1585_v41 = vsel %vm58_vm0, %v1551_v37, 0.0  ;;  %v1260_v7 = vpop.f32.mrf.mxu1 }
 0x335   :  { %1412 = vadd.xlane.f32.xlu1 %v1411_v9  ;;  %v614_v55 = vpop.xlane.xlu1 %613  ;;  %v1261_v28 = vadd.f32 %v1260_v7, %v4871_v31 }
 0x336   :  { %v944_v8 = vmul.f32 0.5, %v943_v22  ;;  %v654_v46 = vmul.f32 %v614_v55, %v4255_v2  ;;  %v1398_v61 = vpop.xlane.xlu2 %1397  ;;  %1586 = vadd.xlane.f32.xlu0 %v1585_v41  ;;  %v1068_v30 = vmul.f32 %v4452_v40, %v1035_v18  ;;  %v1414_v22 = vsel %vm58_vm0, %v5143_v58, 0.0 }
 0x337   :  { %v1488_v10 = vmul.f32 %v1398_v61, %v4255_v2 }
 0x338   :  { %v945_v4 = vsub.f32 1.5, %v944_v8  ;;  %v686_v11 = vadd.f32 1e-05, %v654_v46  ;;  %v5136_v33 = vadd.f32 %v4457_v44, %v1068_v30 }
 0x339   :  { %v3859_v34 = vpop.eup %3858  ;;  %v5140_v54 = vsub.f32 %v4977_v39, %v1488_v10  ;;  %v4007_v39 = vld [vmem:[%s6934_s0 + $0x48] sm:$0xff] }
 0x33a   :  { %v946_v57 = vmul.f32 %v3857_v27, %v945_v4  ;;  %v952_v19 = vmul.f32 %v3859_v34, %v685_v53  ;;  %3860 = vrsqrt.f32 %v686_v11  ;;  %3714 = vmatmul.msk.f32.gmra.mxu1 %vm58_vm0, %v5136_v33  ;;  %v1335_v12 = vmul.f32 %v4007_v39, %v1258_v26 }
 0x33b   :  { %v1552_v50 = vmul.f32 %v5140_v54, %v5140_v54  ;;  %vm958_vm5 = vweird.f32 %v3859_v34  ;;  %vm967_vm9 = vweird.f32 %v686_v11 }
 0x33c   :  { %v950_v47 = vsel %vm949_vm4, %v3857_v27, %v946_v57  ;;  %v953_v37 = vmul.f32 %v3859_v34, %v952_v19  ;;  %v5167_v61 = vadd.f32 %v1335_v12, %v4739_v43  ;;  %vm959_vm7 = vmor %vm957_vm6, %vm958_vm5 }
 0x33d   :  { %v1036_v20 = vmul.f32 %v950_v47, %v4919_v32  ;;  %v1401_v48 = vpop.xlane.xlu1 %1400  ;;  %v1588_v18 = vsel %vm58_vm0, %v1552_v50, 0.0 }
 0x33e   :  { %v954_v9 = vmul.f32 0.5, %v953_v37  ;;  %v1489_v41 = vmul.f32 %v1401_v48, %v4255_v2  ;;  %1589 = vadd.xlane.f32.xlu2 %v1588_v18  ;;  %1415 = vadd.xlane.f32.xlu0 %v1414_v22  ;;  %v1417_v53 = vsel %vm58_vm0, %v5167_v61, 0.0 }
 0x33f   :  { %v1069_v27 = vmul.f32 %v4452_v40, %v1036_v20 }
 0x340   :  { %v3861_v6 = vpop.eup %3860  ;;  %v955_v55 = vsub.f32 1.5, %v954_v9  ;;  %v5161_v32 = vsub.f32 %v4995_v51, %v1489_v41  ;;  %v4008_v51 = vld [vmem:[%s6934_s0 + $0x50] sm:$0xff] }
 0x341   :  { %v962_v8 = vmul.f32 %v3861_v6, %v686_v11  ;;  %v5164_v46 = vadd.f32 %v4457_v44, %v1069_v27  ;;  %v1336_v26 = vmul.f32 %v4008_v51, %v1261_v28  ;;  %vm968_vm8 = vweird.f32 %v3861_v6  ;;  %v1263_v11 = vpop.f32.mrf.mxu1 }
 0x342   :  { %v956_v30 = vmul.f32 %v3859_v34, %v955_v55  ;;  %v1553_v10 = vmul.f32 %v5161_v32, %v5161_v32  ;;  %vm969_vm10 = vmor %vm967_vm9, %vm968_vm8 }
 0x343   :  { %v963_v4 = vmul.f32 %v3861_v6, %v962_v8  ;;  %3715 = vmatmul.msk.f32.gmra.mxu1 %vm58_vm0, %v5164_v46  ;;  %v5182_v39 = vadd.f32 %v1336_v26, %v4763_v56  ;;  %v1264_v8 = vadd.f32 %v1263_v11, %v4871_v31  ;;  %v3724_v11 = vld [vmem:[%s6933_s1 + $0x48] sm:$0xff] }
 0x344   :  { %v960_v57 = vsel %vm959_vm7, %v3859_v34, %v956_v30  ;;  %v1591_v19 = vsel %vm58_vm0, %v1553_v10, 0.0 }
 0x345   :  { %v1037_v43 = vmul.f32 %v960_v57, %v4944_v24  ;;  %v964_v50 = vmul.f32 0.5, %v963_v4  ;;  %1592 = vadd.xlane.f32.xlu1 %v1591_v19  ;;  %v1420_v20 = vsel %vm58_vm0, %v5182_v39, 0.0  ;;  %v3726_v57 = vld [vmem:[%s6933_s1 + $0x58] sm:$0xff] }
 0x346   :  { %1418 = vadd.xlane.f32.xlu2 %v1417_v53  ;;  %v4009_v19 = vld [vmem:[%s6934_s0 + $0x58] sm:$0xff]  ;;  %2276 = vmatpush.msrb.mxu2 %v3726_v57 }
 0x347   :  { %v965_v47 = vsub.f32 1.5, %v964_v50  ;;  %v1070_v37 = vmul.f32 %v4452_v40, %v1037_v43  ;;  %v1337_v43 = vmul.f32 %v4009_v19, %v1264_v8 }
 0x349   :  { %v966_v12 = vmul.f32 %v3861_v6, %v965_v47  ;;  %v5185_v34 = vadd.f32 %v4457_v44, %v1070_v37  ;;  %v1266_v41 = vpop.f32.mrf.mxu1  ;;  %v3725_v37 = vld [vmem:[%s6933_s1 + $0x50] sm:$0xff] }
 0x34a   :  { %2277 = vmatpush.msrb.mxu2 %v3725_v37 }
 0x34b   :  { %v970_v24 = vsel %vm969_vm10, %v3861_v6, %v966_v12  ;;  %3716 = vmatmul.msk.f32.gmra.mxu1 %vm58_vm0, %v5185_v34 }
 0x34c   :  { %v1038_v7 = vmul.f32 %v970_v24, %v4970_v36  ;;  %2278 = vmatpush.msrb.mxu2 %v3724_v11 }
 0x34d   :  { %1421 = vadd.xlane.f32.xlu1 %v1420_v20 }
 0x34e   :  { %v1071_v48 = vmul.f32 %v4452_v40, %v1038_v7  ;;  %v1267_v7 = vadd.f32 %v1266_v41, %v4871_v31 }
 0x350   :  { %v5194_v56 = vadd.f32 %v4457_v44, %v1071_v48 }
 0x351   :  { %v1269_v20 = vpop.f32.mrf.mxu1 }
 0x353   :  { %3717 = vmatmul.msk.f32.gmra.mxu1 %vm58_vm0, %v5194_v56 }
 0x359   :  { %v1272_v37 = vpop.f32.mrf.mxu1 }
 0x388   :  { %v617_v18 = vpop.xlane.xlu0 %616 }
 0x389   :  { %v655_v22 = vmul.f32 %v617_v18, %v4255_v2 }
 0x38b   :  { %v687_v9 = vadd.f32 1e-05, %v655_v22 }
 0x38d   :  { %3862 = vrsqrt.f32 %v687_v9  ;;  %vm977_vm12 = vweird.f32 %v687_v9 }
 0x390   :  { %v620_v36 = vpop.xlane.xlu2 %619  ;;  %v1404_v27 = vpop.xlane.xlu0 %1403 }
 0x391   :  { %v656_v6 = vmul.f32 %v620_v36, %v4255_v2  ;;  %v1490_v28 = vmul.f32 %v1404_v27, %v4255_v2  ;;  %v5232_v27 = vadd.f32 %v1337_v43, %v4785_v21  ;;  %v4010_v21 = vld [vmem:[%s6934_s0 + $0x60] sm:$0xff] }
 0x393   :  { %v3863_v55 = vpop.eup %3862  ;;  %v5202_v30 = vadd.f32 1e-05, %v656_v6  ;;  %v5205_v10 = vsub.f32 %v5030_v38, %v1490_v28  ;;  %v3723_v28 = vld [vmem:[%s6933_s1 + $0x40] sm:$0xff]  ;;  %v1423_v57 = vsel %vm58_vm0, %v5232_v27, 0.0 }
 0x394   :  { %v972_v4 = vmul.f32 %v3863_v55, %v687_v9  ;;  %vm978_vm11 = vweird.f32 %v3863_v55  ;;  %2279 = vmatpush.msrb.mxu2 %v3723_v28 }
 0x395   :  { %3864 = vrsqrt.f32 %v5202_v30  ;;  %v1554_v51 = vmul.f32 %v5205_v10, %v5205_v10  ;;  %vm979_vm13 = vmor %vm977_vm12, %vm978_vm11  ;;  %vm987_vm15 = vweird.f32 %v5202_v30 }
 0x396   :  { %v973_v26 = vmul.f32 %v3863_v55, %v972_v4 }
 0x397   :  { %v1594_v50 = vsel %vm58_vm0, %v1554_v51, 0.0 }
 0x398   :  { %v974_v38 = vmul.f32 0.5, %v973_v26  ;;  %v623_v53 = vpop.xlane.xlu1 %622  ;;  %v1407_v47 = vpop.xlane.xlu2 %1406  ;;  %1595 = vadd.xlane.f32.xlu0 %v1594_v50 }
 0x399   :  { %v657_v12 = vmul.f32 %v623_v53, %v4255_v2  ;;  %v1491_v24 = vmul.f32 %v1407_v47, %v4255_v2 }
 0x39a   :  { %v975_v48 = vsub.f32 1.5, %v974_v38 }
 0x39b   :  { %v3865_v18 = vpop.eup %3864  ;;  %v5226_v22 = vadd.f32 1e-05, %v657_v12  ;;  %v5229_v36 = vsub.f32 %v5055_v17, %v1491_v24  ;;  %v1338_v17 = vmul.f32 %v4010_v21, %v1267_v7 }
 0x39c   :  { %v976_v6 = vmul.f32 %v3863_v55, %v975_v48  ;;  %v982_v41 = vmul.f32 %v3865_v18, %v5202_v30  ;;  %vm988_vm14 = vweird.f32 %v3865_v18  ;;  %v1270_v48 = vadd.f32 %v1269_v20, %v4871_v31  ;;  %v4011_v30 = vld [vmem:[%s6934_s0 + $0x68] sm:$0xff] }
 0x39d   :  { %3866 = vrsqrt.f32 %v5226_v22  ;;  %v1555_v8 = vmul.f32 %v5229_v36, %v5229_v36  ;;  %v5253_v24 = vadd.f32 %v1338_v17, %v4801_v29  ;;  %vm989_vm1 = vmor %vm987_vm15, %vm988_vm14  ;;  %vm997_vm3 = vweird.f32 %v5226_v22 }
 0x39e   :  { %v980_v4 = vsel %vm979_vm13, %v3863_v55, %v976_v6  ;;  %v983_v9 = vmul.f32 %v3865_v18, %v982_v41  ;;  %v1339_v17 = vmul.f32 %v4011_v30, %v1270_v48 }
 0x39f   :  { %v1039_v51 = vmul.f32 %v980_v4, %v5013_v14  ;;  %v1597_v26 = vsel %vm58_vm0, %v1555_v8, 0.0 }
 0x3a0   :  { %v984_v19 = vmul.f32 0.5, %v983_v9  ;;  %v1584_v43 = vpop.xlane.xlu1 %1583  ;;  %1598 = vadd.xlane.f32.xlu2 %v1597_v26  ;;  %v1410_v50 = vpop.xlane.xlu2 %1409  ;;  %1424 = vadd.xlane.f32.xlu0 %v1423_v57  ;;  %v1426_v9 = vsel %vm58_vm0, %v5253_v24, 0.0 }
 0x3a1   :  { %v1678_v38 = vmul.f32 %v1584_v43, %v4255_v2  ;;  %v1492_v53 = vmul.f32 %v1410_v50, %v4255_v2  ;;  %v626_v47 = vpop.xlane.xlu0 %625  ;;  %v1072_v55 = vmul.f32 %v4452_v40, %v1039_v51 }
 0x3a2   :  { %v985_v12 = vsub.f32 1.5, %v984_v19  ;;  %v658_v14 = vmul.f32 %v626_v47, %v4255_v2 }
 0x3a3   :  { %v3867_v7 = vpop.eup %3866  ;;  %v5256_v11 = vadd.f32 1e-05, %v1678_v38  ;;  %v5259_v6 = vsub.f32 %v5075_v15, %v1492_v53  ;;  %v5262_v41 = vadd.f32 %v4457_v44, %v1072_v55 }
 0x3a4   :  { %v986_v28 = vmul.f32 %v3865_v18, %v985_v12  ;;  %v992_v8 = vmul.f32 %v3867_v7, %v5226_v22  ;;  %v5266_v21 = vadd.f32 1e-05, %v658_v14  ;;  %vm998_vm2 = vweird.f32 %v3867_v7  ;;  %v1275_v14 = vpop.f32.mrf.mxu1 }
 0x3a5   :  { %3868 = vrsqrt.f32 %v5256_v11  ;;  %3718 = vmatmul.msk.f32.gmra.mxu1 %vm58_vm0, %v5262_v41  ;;  %v1556_v29 = vmul.f32 %v5259_v6, %v5259_v6  ;;  %v5292_v12 = vadd.f32 %v1339_v17, %v4810_v25  ;;  %vm999_vm4 = vmor %vm997_vm3, %vm998_vm2  ;;  %vm1748_vm7 = vweird.f32 %v5256_v11 }
 0x3a6   :  { %v990_v15 = vsel %vm989_vm1, %v3865_v18, %v986_v28  ;;  %v993_v20 = vmul.f32 %v3867_v7, %v992_v8  ;;  %3870 = vrsqrt.f32 %v5266_v21  ;;  %v1273_v18 = vadd.f32 %v1272_v37, %v4871_v31 }
 0x3a7   :  { %v1040_v4 = vmul.f32 %v990_v15, %v5027_v63  ;;  %v1600_v51 = vsel %vm58_vm0, %v1556_v29, 0.0  ;;  %vm1007_vm9 = vweird.f32 %v5266_v21 }
 0x3a8   :  { %v994_v26 = vmul.f32 0.5, %v993_v20  ;;  %v1413_v57 = vpop.xlane.xlu1 %1412  ;;  %1427 = vadd.xlane.f32.xlu2 %v1426_v9  ;;  %1601 = vadd.xlane.f32.xlu1 %v1600_v51 }
 0x3a9   :  { %v1493_v19 = vmul.f32 %v1413_v57, %v4255_v2  ;;  %v1587_v43 = vpop.xlane.xlu0 %1586  ;;  %v1073_v50 = vmul.f32 %v4452_v40, %v1040_v4  ;;  %v1429_v4 = vsel %vm58_vm0, %v5292_v12, 0.0 }
 0x3aa   :  { %v995_v38 = vsub.f32 1.5, %v994_v26  ;;  %v1679_v63 = vmul.f32 %v1587_v43, %v4255_v2 }
 0x3ab   :  { %v3869_v53 = vpop.eup %3868  ;;  %v5286_v47 = vsub.f32 %v5116_v0, %v1493_v19  ;;  %v5289_v55 = vadd.f32 %v4457_v44, %v1073_v50  ;;  %v4012_v0 = vld [vmem:[%s6934_s0 + $0x70] sm:$0xff] }
 0x3ac   :  { %v3871_v37 = vpop.eup %3870  ;;  %v996_v48 = vmul.f32 %v3867_v7, %v995_v38  ;;  %v1743_v28 = vmul.f32 %v3869_v53, %v5256_v11  ;;  %v5296_v8 = vadd.f32 1e-05, %v1679_v63  ;;  %v1340_v29 = vmul.f32 %v4012_v0, %v1273_v18  ;;  %v1278_v11 = vpop.f32.mrf.mxu1 }
 0x3ad   :  { %v1002_v15 = vmul.f32 %v3871_v37, %v5266_v21  ;;  %3719 = vmatmul.msk.f32.gmra.mxu1 %vm58_vm0, %v5289_v55  ;;  %v1557_v25 = vmul.f32 %v5286_v47, %v5286_v47  ;;  %vm1749_vm5 = vweird.f32 %v3869_v53  ;;  %v1276_v38 = vadd.f32 %v1275_v14, %v4871_v31 }
 0x3ae   :  { %v1000_v20 = vsel %vm999_vm4, %v3867_v7, %v996_v48  ;;  %v1744_v22 = vmul.f32 %v3869_v53, %v1743_v28  ;;  %3872 = vrsqrt.f32 %v5296_v8  ;;  %v5313_v7 = vadd.f32 %v1340_v29, %v4860_v59  ;;  %vm1750_vm8 = vmor %vm1748_vm7, %vm1749_vm5 }
 0x3af   :  { %v1041_v30 = vmul.f32 %v1000_v20, %v5047_v1  ;;  %v1003_v17 = vmul.f32 %v3871_v37, %v1002_v15  ;;  %v1603_v9 = vsel %vm58_vm0, %v1557_v25, 0.0  ;;  %vm1008_vm6 = vweird.f32 %v3871_v37  ;;  %v4013_v25 = vld [vmem:[%s6935_s2 + $0x4] sm:$0x7] }
 0x3b0   :  { %v1745_v51 = vmul.f32 0.5, %v1744_v22  ;;  %1430 = vadd.xlane.f32.xlu1 %v1429_v4  ;;  %1604 = vadd.xlane.f32.xlu0 %v1603_v9  ;;  %v5334_v20 = vperm.slane %v4013_v25, 1  ;;  %vm1009_vm10 = vmor %vm1007_vm9, %vm1008_vm6  ;;  %v5343_v9 = vperm.slane %v4013_v25, 2  ;;  %vm1758_vm12 = vweird.f32 %v5296_v8 }
 0x3b1   :  { %v1004_v26 = vmul.f32 0.5, %v1003_v17  ;;  %v1590_v57 = vpop.xlane.xlu2 %1589  ;;  %v1416_v18 = vpop.xlane.xlu0 %1415  ;;  %v1074_v19 = vmul.f32 %v4452_v40, %v1041_v30 }
 0x3b2   :  { %v1746_v43 = vsub.f32 1.5, %v1745_v51  ;;  %v1680_v1 = vmul.f32 %v1590_v57, %v4255_v2  ;;  %v1494_v50 = vmul.f32 %v1416_v18, %v4255_v2 }
 0x3b3   :  { %v1005_v63 = vsub.f32 1.5, %v1004_v26  ;;  %v5319_v48 = vadd.f32 %v4457_v44, %v1074_v19 }
 0x3b4   :  { %v3873_v28 = vpop.eup %3872  ;;  %v1747_v0 = vmul.f32 %v3869_v53, %v1746_v43  ;;  %v5322_v15 = vadd.f32 1e-05, %v1680_v1  ;;  %v5325_v59 = vsub.f32 %v5143_v58, %v1494_v50  ;;  %v1432_v58 = vsel %vm58_vm0, %v5313_v7, 0.0 }
 0x3b5   :  { %v1006_v29 = vmul.f32 %v3871_v37, %v1005_v63  ;;  %v1753_v14 = vmul.f32 %v3873_v28, %v5296_v8  ;;  %3720 = vmatmul.msk.f32.gmra.mxu1 %vm58_vm0, %v5319_v48  ;;  %vm1759_vm11 = vweird.f32 %v3873_v28 }
 0x3b6   :  { %v1751_v22 = vsel %vm1750_vm8, %v3869_v53, %v1747_v0  ;;  %3874 = vrsqrt.f32 %v5322_v15  ;;  %v1558_v21 = vmul.f32 %v5325_v59, %v5325_v59  ;;  %v4014_v53 = vld [vmem:[%s6934_s0 + $0x78] sm:$0xff]  ;;  %vm1760_vm13 = vmor %vm1758_vm12, %vm1759_vm11  ;;  %vm1768_vm15 = vweird.f32 %v5322_v15 }
 0x3b7   :  { %v2062_v30 = vmul.f32 %v1751_v22, %v5079_v23  ;;  %v1010_v17 = vsel %vm1009_vm10, %v3871_v37, %v1006_v29  ;;  %v1754_v4 = vmul.f32 %v3873_v28, %v1753_v14  ;;  %v1341_v51 = vmul.f32 %v4014_v53, %v1276_v38 }
 0x3b8   :  { %v1042_v26 = vmul.f32 %v1010_v17, %v5082_v49  ;;  %v1593_v57 = vpop.xlane.xlu1 %1592  ;;  %1433 = vadd.xlane.f32.xlu0 %v1432_v58  ;;  %v1606_v18 = vsel %vm58_vm0, %v1558_v21, 0.0  ;;  %v1279_v29 = vadd.f32 %v1278_v11, %v4871_v31  ;;  %v1281_v21 = vpop.f32.mrf.mxu1 }
 0x3b9   :  { %v1755_v19 = vmul.f32 0.5, %v1754_v4  ;;  %v1681_v43 = vmul.f32 %v1593_v57, %v4255_v2  ;;  %v1419_v1 = vpop.xlane.xlu2 %1418  ;;  %1607 = vadd.xlane.f32.xlu2 %v1606_v18  ;;  %v2095_v23 = vmul.f32 %v5334_v20, %v2062_v30  ;;  %v5365_v22 = vadd.f32 %v1341_v51, %v4889_v60  ;;  %v4015_v60 = vld [vmem:[%s6934_s0 + $0x80] sm:$0xff] }
 0x3ba   :  { %v1495_v37 = vmul.f32 %v1419_v1, %v4255_v2  ;;  %v1075_v50 = vmul.f32 %v4452_v40, %v1042_v26  ;;  %v1342_v8 = vmul.f32 %v4015_v60, %v1279_v29  ;;  %v1282_v18 = vadd.f32 %v1281_v21, %v4871_v31 }
 0x3bb   :  { %v1756_v63 = vsub.f32 1.5, %v1755_v19  ;;  %v1713_v38 = vadd.f32 1e-05, %v1681_v43  ;;  %v5355_v49 = vadd.f32 %v5343_v9, %v2095_v23  ;;  %v1435_v4 = vsel %vm58_vm0, %v5365_v22, 0.0 }
 0x3bc   :  { %v3875_v0 = vpop.eup %3874  ;;  %v5359_v14 = vsub.f32 %v5167_v61, %v1495_v37  ;;  %v5362_v25 = vadd.f32 %v4457_v44, %v1075_v50 }
 0x3bd   :  { %v1757_v58 = vmul.f32 %v3873_v28, %v1756_v63  ;;  %v1763_v40 = vmul.f32 %v3875_v0, %v5322_v15  ;;  %3876 = vrsqrt.f32 %v1713_v38  ;;  %3727 = vmatmul.msk.f32.vlgmr.msrb.gmra.mxu2 %vm58_vm0, %v5355_v49  ;;  %vm1769_vm14 = vweird.f32 %v3875_v0 }
 0x3be   :  { %3721 = vmatmul.msk.f32.gmra.mxu1 %vm58_vm0, %v5362_v25  ;;  %v1559_v44 = vmul.f32 %v5359_v14, %v5359_v14  ;;  %vm1770_vm1 = vmor %vm1768_vm15, %vm1769_vm14  ;;  %vm1778_vm3 = vweird.f32 %v1713_v38 }
 0x3bf   :  { %v1761_v61 = vsel %vm1760_vm13, %v3873_v28, %v1757_v58  ;;  %v1764_v11 = vmul.f32 %v3875_v0, %v1763_v40 }
 0x3c0   :  { %v1422_v30 = vpop.xlane.xlu1 %1421  ;;  %v1609_v17 = vsel %vm58_vm0, %v1559_v44, 0.0  ;;  %v2063_v53 = vmul.f32 %v1761_v61, %v5110_v5  ;;  %v5392_v5 = vadd.f32 %v1342_v8, %v4922_v42 }
 0x3c1   :  { %v1765_v51 = vmul.f32 0.5, %v1764_v11  ;;  %v1496_v26 = vmul.f32 %v1422_v30, %v4255_v2  ;;  %1610 = vadd.xlane.f32.xlu1 %v1609_v17  ;;  %1436 = vadd.xlane.f32.xlu2 %v1435_v4 }
 0x3c2   :  { %v2096_v28 = vmul.f32 %v5334_v20, %v2063_v53  ;;  %v1438_v15 = vsel %vm58_vm0, %v5392_v5, 0.0 }
 0x3c3   :  { %v3877_v57 = vpop.eup %3876  ;;  %v1766_v19 = vsub.f32 1.5, %v1765_v51  ;;  %v5386_v43 = vsub.f32 %v5182_v39, %v1496_v26  ;;  %v4016_v39 = vld [vmem:[%s6934_s0 + $0x88] sm:$0xff] }
 0x3c4   :  { %v1773_v1 = vmul.f32 %v3877_v57, %v1713_v38  ;;  %v5389_v23 = vadd.f32 %v5343_v9, %v2096_v28  ;;  %v1343_v29 = vmul.f32 %v4016_v39, %v1282_v18  ;;  %vm1779_vm2 = vweird.f32 %v3877_v57  ;;  %v1284_v38 = vpop.f32.mrf.mxu1 }
 0x3c5   :  { %v1767_v37 = vmul.f32 %v3875_v0, %v1766_v19  ;;  %v1560_v50 = vmul.f32 %v5386_v43, %v5386_v43  ;;  %vm1780_vm4 = vmor %vm1778_vm3, %vm1779_vm2 }
 0x3c6   :  { %v1774_v63 = vmul.f32 %v3877_v57, %v1773_v1  ;;  %3728 = vmatmul.msk.f32.gmra.mxu2 %vm58_vm0, %v5389_v23  ;;  %v5408_v60 = vadd.f32 %v1343_v29, %v4947_v35  ;;  %v1285_v1 = vadd.f32 %v1284_v38, %v4871_v31 }
 0x3c7   :  { %v1771_v58 = vsel %vm1770_vm1, %v3875_v0, %v1767_v37  ;;  %v1612_v42 = vsel %vm58_vm0, %v1560_v50, 0.0 }
 0x3c8   :  { %v1775_v40 = vmul.f32 0.5, %v1774_v63  ;;  %1613 = vadd.xlane.f32.xlu0 %v1612_v42  ;;  %v2064_v44 = vmul.f32 %v1771_v58, %v5140_v54  ;;  %v1441_v54 = vsel %vm58_vm0, %v5408_v60, 0.0  ;;  %v4017_v58 = vld [vmem:[%s6934_s0 + $0x90] sm:$0xff] }
 0x3c9   :  { %1439 = vadd.xlane.f32.xlu1 %v1438_v15  ;;  %v1344_v42 = vmul.f32 %v4017_v58, %v1285_v1 }
 0x3ca   :  { %v1776_v61 = vsub.f32 1.5, %v1775_v40  ;;  %v2097_v11 = vmul.f32 %v5334_v20, %v2064_v44 }
 0x3cc   :  { %v1777_v8 = vmul.f32 %v3877_v57, %v1776_v61  ;;  %v5411_v0 = vadd.f32 %v5343_v9, %v2097_v11  ;;  %v1287_v26 = vpop.f32.mrf.mxu1 }
 0x3ce   :  { %v1781_v21 = vsel %vm1780_vm4, %v3877_v57, %v1777_v8  ;;  %3729 = vmatmul.msk.f32.gmra.mxu2 %vm58_vm0, %v5411_v0  ;;  %v1288_v8 = vadd.f32 %v1287_v26, %v4871_v31 }
 0x3cf   :  { %v2065_v30 = vmul.f32 %v1781_v21, %v5161_v32 }
 0x3d0   :  { %1442 = vadd.xlane.f32.xlu0 %v1441_v54 }
 0x3d1   :  { %v2098_v17 = vmul.f32 %v5334_v20, %v2065_v30 }
 0x3d3   :  { %v5420_v35 = vadd.f32 %v5343_v9, %v2098_v17 }
 0x3d4   :  { %v1290_v21 = vpop.f32.mrf.mxu1 }
 0x3d6   :  { %3730 = vmatmul.msk.f32.gmra.mxu2 %vm58_vm0, %v5420_v35 }
 0x40b   :  { %v1596_v4 = vpop.xlane.xlu0 %1595 }
 0x40c   :  { %v1682_v53 = vmul.f32 %v1596_v4, %v4255_v2  ;;  %v5446_v4 = vadd.f32 %v1344_v42, %v4973_v62 }
 0x40e   :  { %v1714_v51 = vadd.f32 1e-05, %v1682_v53  ;;  %v1444_v62 = vsel %vm58_vm0, %v5446_v4, 0.0 }
 0x410   :  { %3878 = vrsqrt.f32 %v1714_v51  ;;  %vm1788_vm6 = vweird.f32 %v1714_v51 }
 0x413   :  { %v1599_v28 = vpop.xlane.xlu2 %1598  ;;  %v1425_v57 = vpop.xlane.xlu0 %1424 }
 0x414   :  { %v1683_v32 = vmul.f32 %v1599_v28, %v4255_v2  ;;  %v1497_v18 = vmul.f32 %v1425_v57, %v4255_v2  ;;  %v4018_v57 = vld [vmem:[%s6934_s0 + $0x98] sm:$0xff] }
 0x416   :  { %v3879_v19 = vpop.eup %3878  ;;  %v1715_v37 = vadd.f32 1e-05, %v1683_v32  ;;  %v5429_v50 = vsub.f32 %v5232_v27, %v1497_v18  ;;  %v1345_v32 = vmul.f32 %v4018_v57, %v1288_v8 }
 0x417   :  { %v1783_v63 = vmul.f32 %v3879_v19, %v1714_v51  ;;  %vm1789_vm5 = vweird.f32 %v3879_v19 }
 0x418   :  { %3880 = vrsqrt.f32 %v1715_v37  ;;  %v1561_v39 = vmul.f32 %v5429_v50, %v5429_v50  ;;  %vm1790_vm7 = vmor %vm1788_vm6, %vm1789_vm5  ;;  %vm1798_vm9 = vweird.f32 %v1715_v37 }
 0x419   :  { %v1784_v29 = vmul.f32 %v3879_v19, %v1783_v63 }
 0x41a   :  { %v1615_v40 = vsel %vm58_vm0, %v1561_v39, 0.0 }
 0x41b   :  { %v1785_v15 = vmul.f32 0.5, %v1784_v29  ;;  %v1602_v44 = vpop.xlane.xlu1 %1601  ;;  %v1428_v61 = vpop.xlane.xlu2 %1427  ;;  %1616 = vadd.xlane.f32.xlu2 %v1615_v40 }
 0x41c   :  { %v1684_v27 = vmul.f32 %v1602_v44, %v4255_v2  ;;  %v1498_v11 = vmul.f32 %v1428_v61, %v4255_v2  ;;  %v5462_v44 = vadd.f32 %v1345_v32, %v4992_v52 }
 0x41d   :  { %v1786_v54 = vsub.f32 1.5, %v1785_v15 }
 0x41e   :  { %v3881_v30 = vpop.eup %3880  ;;  %v5440_v17 = vadd.f32 1e-05, %v1684_v27  ;;  %v5443_v38 = vsub.f32 %v5253_v24, %v1498_v11 }
 0x41f   :  { %v1787_v53 = vmul.f32 %v3879_v19, %v1786_v54  ;;  %v1793_v28 = vmul.f32 %v3881_v30, %v1715_v37  ;;  %vm1799_vm8 = vweird.f32 %v3881_v30  ;;  %v1447_v37 = vsel %vm58_vm0, %v5462_v44, 0.0 }
 0x420   :  { %3882 = vrsqrt.f32 %v5440_v17  ;;  %v1562_v26 = vmul.f32 %v5443_v38, %v5443_v38  ;;  %vm1800_vm10 = vmor %vm1798_vm9, %vm1799_vm8  ;;  %vm1808_vm12 = vweird.f32 %v5440_v17 }
 0x421   :  { %v1791_v18 = vsel %vm1790_vm7, %v3879_v19, %v1787_v53  ;;  %v1794_v24 = vmul.f32 %v3881_v30, %v1793_v28  ;;  %v1293_v19 = vpop.f32.mrf.mxu1  ;;  %v4019_v28 = vld [vmem:[%s6934_s0 + $0xa0] sm:$0xff] }
 0x422   :  { %v1618_v1 = vsel %vm58_vm0, %v1562_v26, 0.0  ;;  %v2066_v51 = vmul.f32 %v1791_v18, %v5205_v10  ;;  %v1291_v10 = vadd.f32 %v1290_v21, %v4871_v31 }
 0x423   :  { %v1795_v63 = vmul.f32 0.5, %v1794_v24  ;;  %v1431_v39 = vpop.xlane.xlu1 %1430  ;;  %1619 = vadd.xlane.f32.xlu1 %v1618_v1  ;;  %1445 = vadd.xlane.f32.xlu2 %v1444_v62  ;;  %v1605_v29 = vpop.xlane.xlu0 %1604 }
 0x424   :  { %v1499_v58 = vmul.f32 %v1431_v39, %v4255_v2  ;;  %v1685_v42 = vmul.f32 %v1605_v29, %v4255_v2  ;;  %v2099_v40 = vmul.f32 %v5334_v20, %v2066_v51  ;;  %v1346_v26 = vmul.f32 %v4019_v28, %v1291_v10 }
 0x425   :  { %v1796_v15 = vsub.f32 1.5, %v1795_v63  ;;  %v1294_v29 = vadd.f32 %v1293_v19, %v4871_v31 }
 0x426   :  { %v3883_v61 = vpop.eup %3882  ;;  %v5466_v27 = vsub.f32 %v5292_v12, %v1499_v58  ;;  %v5468_v11 = vadd.f32 1e-05, %v1685_v42  ;;  %v5471_v8 = vadd.f32 %v5343_v9, %v2099_v40  ;;  %v5497_v42 = vadd.f32 %v1346_v26, %v5004_v16  ;;  %v4020_v16 = vld [vmem:[%s6934_s0 + $0xa8] sm:$0xff] }
 0x427   :  { %v1797_v54 = vmul.f32 %v3881_v30, %v1796_v15  ;;  %v1803_v53 = vmul.f32 %v3883_v61, %v5440_v17  ;;  %vm1809_vm11 = vweird.f32 %v3883_v61  ;;  %v1347_v17 = vmul.f32 %v4020_v16, %v1294_v29 }
 0x428   :  { %3884 = vrsqrt.f32 %v5468_v11  ;;  %3731 = vmatmul.msk.f32.gmra.mxu2 %vm58_vm0, %v5471_v8  ;;  %v1563_v52 = vmul.f32 %v5466_v27, %v5466_v27  ;;  %vm1810_vm13 = vmor %vm1808_vm12, %vm1809_vm11  ;;  %vm1818_vm15 = vweird.f32 %v5468_v11 }
 0x429   :  { %v1801_v12 = vsel %vm1800_vm10, %v3881_v30, %v1797_v54  ;;  %v1804_v21 = vmul.f32 %v3883_v61, %v1803_v53  ;;  %v1296_v40 = vpop.f32.mrf.mxu1 }
 0x42a   :  { %v1621_v57 = vsel %vm58_vm0, %v1563_v52, 0.0  ;;  %v2067_v32 = vmul.f32 %v1801_v12, %v5229_v36  ;;  %v1450_v52 = vsel %vm58_vm0, %v5497_v42, 0.0 }
 0x42b   :  { %v1805_v18 = vmul.f32 0.5, %v1804_v21  ;;  %1448 = vadd.xlane.f32.xlu1 %v1447_v37  ;;  %1622 = vadd.xlane.f32.xlu0 %v1621_v57  ;;  %v1434_v24 = vpop.xlane.xlu0 %1433 }
 0x42c   :  { %v1608_v1 = vpop.xlane.xlu2 %1607  ;;  %v1500_v30 = vmul.f32 %v1434_v24, %v4255_v2  ;;  %v2100_v62 = vmul.f32 %v5334_v20, %v2067_v32  ;;  %v1297_v24 = vadd.f32 %v1296_v40, %v4871_v31 }
 0x42d   :  { %v1806_v51 = vsub.f32 1.5, %v1805_v18  ;;  %v1686_v63 = vmul.f32 %v1608_v1, %v4255_v2 }
 0x42e   :  { %v3885_v39 = vpop.eup %3884  ;;  %v5491_v58 = vsub.f32 %v5313_v7, %v1500_v30  ;;  %v5494_v36 = vadd.f32 %v5343_v9, %v2100_v62 }
 0x42f   :  { %v1807_v15 = vmul.f32 %v3883_v61, %v1806_v51  ;;  %v1813_v10 = vmul.f32 %v3885_v39, %v5468_v11  ;;  %v5501_v54 = vadd.f32 1e-05, %v1686_v63  ;;  %vm1819_vm14 = vweird.f32 %v3885_v39 }
 0x430   :  { %3732 = vmatmul.msk.f32.gmra.mxu2 %vm58_vm0, %v5494_v36  ;;  %v1564_v7 = vmul.f32 %v5491_v58, %v5491_v58  ;;  %vm1820_vm1 = vmor %vm1818_vm15, %vm1819_vm14 }
 0x431   :  { %v1811_v19 = vsel %vm1810_vm13, %v3883_v61, %v1807_v15  ;;  %v1814_v53 = vmul.f32 %v3885_v39, %v1813_v10  ;;  %3886 = vrsqrt.f32 %v5501_v54  ;;  %v1299_v40 = vpop.f32.mrf.mxu1  ;;  %vm1828_vm3 = vweird.f32 %v5501_v54 }
 0x432   :  { %v1624_v12 = vsel %vm58_vm0, %v1564_v7, 0.0  ;;  %v2068_v21 = vmul.f32 %v1811_v19, %v5259_v6  ;;  %v5523_v6 = vadd.f32 %v1347_v17, %v5052_v3  ;;  %v4021_v7 = vld [vmem:[%s6934_s0 + $0xb0] sm:$0xff] }
 0x433   :  { %v1815_v28 = vmul.f32 0.5, %v1814_v53  ;;  %1451 = vadd.xlane.f32.xlu0 %v1450_v52  ;;  %1625 = vadd.xlane.f32.xlu2 %v1624_v12  ;;  %v1348_v19 = vmul.f32 %v4021_v7, %v1297_v24 }
 0x434   :  { %v1611_v26 = vpop.xlane.xlu1 %1610  ;;  %v1437_v61 = vpop.xlane.xlu2 %1436  ;;  %v2101_v37 = vmul.f32 %v5334_v20, %v2068_v21  ;;  %v1453_v11 = vsel %vm58_vm0, %v5523_v6, 0.0 }
 0x435   :  { %v1816_v57 = vsub.f32 1.5, %v1815_v28  ;;  %v1687_v32 = vmul.f32 %v1611_v26, %v4255_v2  ;;  %v1501_v18 = vmul.f32 %v1437_v61, %v4255_v2 }
 0x436   :  { %v5520_v1 = vadd.f32 %v5343_v9, %v2101_v37  ;;  %v1300_v37 = vadd.f32 %v1299_v40, %v4871_v31 }
 0x437   :  { %v3887_v30 = vpop.eup %3886  ;;  %v1817_v62 = vmul.f32 %v3885_v39, %v1816_v57  ;;  %v5526_v51 = vadd.f32 1e-05, %v1687_v32  ;;  %v5529_v63 = vsub.f32 %v5365_v22, %v1501_v18  ;;  %v5555_v32 = vadd.f32 %v1348_v19, %v5085_v13  ;;  %v4022_v13 = vld [vmem:[%s6934_s0 + $0xb8] sm:$0xff] }
 0x438   :  { %v1823_v29 = vmul.f32 %v3887_v30, %v5501_v54  ;;  %3733 = vmatmul.msk.f32.gmra.mxu2 %vm58_vm0, %v5520_v1  ;;  %vm1829_vm2 = vweird.f32 %v3887_v30 }
 0x439   :  { %v1821_v15 = vsel %vm1820_vm1, %v3885_v39, %v1817_v62  ;;  %3888 = vrsqrt.f32 %v5526_v51  ;;  %v1565_v3 = vmul.f32 %v5529_v63, %v5529_v63  ;;  %vm1830_vm4 = vmor %vm1828_vm3, %vm1829_vm2  ;;  %vm1838_vm6 = vweird.f32 %v5526_v51 }
 0x43a   :  { %v1824_v10 = vmul.f32 %v3887_v30, %v1823_v29  ;;  %v2069_v22 = vmul.f32 %v1821_v15, %v5286_v47  ;;  %v1302_v15 = vpop.f32.mrf.mxu1 }
 0x43b   :  { %v1627_v53 = vsel %vm58_vm0, %v1565_v3, 0.0  ;;  %1454 = vadd.xlane.f32.xlu2 %v1453_v11  ;;  %v1614_v39 = vpop.xlane.xlu0 %1613  ;;  %v1456_v3 = vsel %vm58_vm0, %v5555_v32, 0.0 }
 0x43c   :  { %v1825_v16 = vmul.f32 0.5, %v1824_v10  ;;  %v1440_v17 = vpop.xlane.xlu1 %1439  ;;  %1628 = vadd.xlane.f32.xlu1 %v1627_v53  ;;  %v1688_v52 = vmul.f32 %v1614_v39, %v4255_v2  ;;  %v2102_v12 = vmul.f32 %v5334_v20, %v2069_v22  ;;  %v1303_v53 = vadd.f32 %v1302_v15, %v4871_v31 }
 0x43d   :  { %v1502_v21 = vmul.f32 %v1440_v17, %v4255_v2 }
 0x43e   :  { %v1826_v28 = vsub.f32 1.5, %v1825_v16  ;;  %v1720_v47 = vadd.f32 1e-05, %v1688_v52  ;;  %v5548_v26 = vadd.f32 %v5343_v9, %v2102_v12 }
 0x43f   :  { %v3889_v61 = vpop.eup %3888  ;;  %v5552_v57 = vsub.f32 %v5392_v5, %v1502_v21  ;;  %v1349_v5 = vmul.f32 %v4022_v13, %v1300_v37 }
 0x440   :  { %v1827_v18 = vmul.f32 %v3887_v30, %v1826_v28  ;;  %v1833_v24 = vmul.f32 %v3889_v61, %v5526_v51  ;;  %3890 = vrsqrt.f32 %v1720_v47  ;;  %3734 = vmatmul.msk.f32.gmra.mxu2 %vm58_vm0, %v5548_v26  ;;  %vm1839_vm5 = vweird.f32 %v3889_v61 }
 0x441   :  { %v1566_v62 = vmul.f32 %v5552_v57, %v5552_v57  ;;  %vm1840_vm7 = vmor %vm1838_vm6, %vm1839_vm5  ;;  %vm1848_vm9 = vweird.f32 %v1720_v47 }
 0x442   :  { %v1831_v29 = vsel %vm1830_vm4, %v3887_v30, %v1827_v18  ;;  %v1834_v40 = vmul.f32 %v3889_v61, %v1833_v24 }
 0x443   :  { %v1630_v54 = vsel %vm58_vm0, %v1566_v62, 0.0  ;;  %v1443_v10 = vpop.xlane.xlu0 %1442  ;;  %v2070_v11 = vmul.f32 %v1831_v29, %v5325_v59  ;;  %v5580_v59 = vadd.f32 %v1349_v5, %v5113_v45 }
 0x444   :  { %v1835_v22 = vmul.f32 0.5, %v1834_v40  ;;  %1631 = vadd.xlane.f32.xlu0 %v1630_v54  ;;  %1457 = vadd.xlane.f32.xlu1 %v1456_v3  ;;  %v1503_v30 = vmul.f32 %v1443_v10, %v4255_v2 }
 0x445   :  { %v2103_v7 = vmul.f32 %v5334_v20, %v2070_v11  ;;  %v1459_v51 = vsel %vm58_vm0, %v5580_v59, 0.0 }
 0x446   :  { %v3891_v19 = vpop.eup %3890  ;;  %v1836_v39 = vsub.f32 1.5, %v1835_v22  ;;  %v5574_v16 = vsub.f32 %v5408_v60, %v1503_v30  ;;  %v4023_v60 = vld [vmem:[%s6934_s0 + $0xc0] sm:$0xff] }
 0x447   :  { %v1843_v17 = vmul.f32 %v3891_v19, %v1720_v47  ;;  %v5577_v52 = vadd.f32 %v5343_v9, %v2103_v7  ;;  %v1350_v37 = vmul.f32 %v4023_v60, %v1303_v53  ;;  %vm1849_vm8 = vweird.f32 %v3891_v19  ;;  %v1305_v47 = vpop.f32.mrf.mxu1 }
 0x448   :  { %v1837_v12 = vmul.f32 %v3889_v61, %v1836_v39  ;;  %v1567_v21 = vmul.f32 %v5574_v16, %v5574_v16  ;;  %vm1850_vm10 = vmor %vm1848_vm9, %vm1849_vm8 }
 0x449   :  { %v1844_v28 = vmul.f32 %v3891_v19, %v1843_v17  ;;  %3735 = vmatmul.msk.f32.gmra.mxu2 %vm58_vm0, %v5577_v52  ;;  %v5596_v13 = vadd.f32 %v1350_v37, %v5136_v33  ;;  %v1306_v17 = vadd.f32 %v1305_v47, %v4871_v31 }
 0x44a   :  { %v1841_v18 = vsel %vm1840_vm7, %v3889_v61, %v1837_v12  ;;  %v1633_v45 = vsel %vm58_vm0, %v1567_v21, 0.0 }
 0x44b   :  { %v1845_v24 = vmul.f32 0.5, %v1844_v28  ;;  %1634 = vadd.xlane.f32.xlu2 %v1633_v45  ;;  %v2071_v62 = vmul.f32 %v1841_v18, %v5359_v14  ;;  %v1462_v14 = vsel %vm58_vm0, %v5596_v13, 0.0  ;;  %v4024_v18 = vld [vmem:[%s6934_s0 + $0xc8] sm:$0xff] }
 0x44c   :  { %1460 = vadd.xlane.f32.xlu0 %v1459_v51  ;;  %v1351_v45 = vmul.f32 %v4024_v18, %v1306_v17 }
 0x44d   :  { %v1846_v29 = vsub.f32 1.5, %v1845_v24  ;;  %v2104_v40 = vmul.f32 %v5334_v20, %v2071_v62 }
 0x44f   :  { %v1847_v5 = vmul.f32 %v3891_v19, %v1846_v29  ;;  %v5599_v61 = vadd.f32 %v5343_v9, %v2104_v40  ;;  %v1308_v30 = vpop.f32.mrf.mxu1 }
 0x451   :  { %v1851_v15 = vsel %vm1850_vm10, %v3891_v19, %v1847_v5  ;;  %3736 = vmatmul.msk.f32.gmra.mxu2 %vm58_vm0, %v5599_v61  ;;  %v1309_v5 = vadd.f32 %v1308_v30, %v4871_v31 }
 0x452   :  { %v2072_v54 = vmul.f32 %v1851_v15, %v5386_v43 }
 0x453   :  { %1463 = vadd.xlane.f32.xlu2 %v1462_v14 }
 0x454   :  { %v2105_v3 = vmul.f32 %v5334_v20, %v2072_v54 }
 0x456   :  { %v5608_v33 = vadd.f32 %v5343_v9, %v2105_v3 }
 0x457   :  { %v1311_v15 = vpop.f32.mrf.mxu1 }
 0x459   :  { %3737 = vmatmul.msk.f32.gmra.mxu2 %vm58_vm0, %v5608_v33 }
 0x48e   :  { %v1617_v10 = vpop.xlane.xlu2 %1616 }
 0x48f   :  { %v1689_v11 = vmul.f32 %v1617_v10, %v4255_v2  ;;  %v5634_v10 = vadd.f32 %v1351_v45, %v5164_v46 }
 0x491   :  { %v1721_v22 = vadd.f32 1e-05, %v1689_v11  ;;  %v1465_v46 = vsel %vm58_vm0, %v5634_v10, 0.0 }
 0x493   :  { %3892 = vrsqrt.f32 %v1721_v22  ;;  %vm1858_vm12 = vweird.f32 %v1721_v22 }
 0x496   :  { %v1620_v7 = vpop.xlane.xlu1 %1619  ;;  %v1446_v19 = vpop.xlane.xlu2 %1445 }
 0x497   :  { %v1690_v43 = vmul.f32 %v1620_v7, %v4255_v2  ;;  %v1504_v53 = vmul.f32 %v1446_v19, %v4255_v2  ;;  %v4025_v19 = vld [vmem:[%s6934_s0 + $0xd0] sm:$0xff] }
 0x499   :  { %v3893_v39 = vpop.eup %3892  ;;  %v1722_v12 = vadd.f32 1e-05, %v1690_v43  ;;  %v5617_v21 = vsub.f32 %v5446_v4, %v1504_v53 }
 0x49a   :  { %v1853_v28 = vmul.f32 %v3893_v39, %v1721_v22  ;;  %vm1859_vm11 = vweird.f32 %v3893_v39 }
 0x49b   :  { %3894 = vrsqrt.f32 %v1722_v12  ;;  %v1568_v60 = vmul.f32 %v5617_v21, %v5617_v21  ;;  %vm1860_vm13 = vmor %vm1858_vm12, %vm1859_vm11  ;;  %vm1868_vm15 = vweird.f32 %v1722_v12 }
 0x49c   :  { %v1854_v37 = vmul.f32 %v3893_v39, %v1853_v28 }
 0x49d   :  { %v1636_v24 = vsel %vm58_vm0, %v1568_v60, 0.0 }
 0x49e   :  { %v1855_v51 = vmul.f32 0.5, %v1854_v37  ;;  %v1449_v62 = vpop.xlane.xlu1 %1448  ;;  %1637 = vadd.xlane.f32.xlu1 %v1636_v24  ;;  %v1623_v29 = vpop.xlane.xlu0 %1622 }
 0x49f   :  { %v1505_v4 = vmul.f32 %v1449_v62, %v4255_v2  ;;  %v1691_v40 = vmul.f32 %v1623_v29, %v4255_v2 }
 0x4a0   :  { %v1856_v14 = vsub.f32 1.5, %v1855_v51 }
 0x4a1   :  { %v3895_v54 = vpop.eup %3894  ;;  %v5629_v3 = vsub.f32 %v5462_v44, %v1505_v4  ;;  %v5631_v47 = vadd.f32 1e-05, %v1691_v40  ;;  %v1352_v44 = vmul.f32 %v4025_v19, %v1309_v5 }
 0x4a2   :  { %v1857_v11 = vmul.f32 %v3893_v39, %v1856_v14  ;;  %v1863_v7 = vmul.f32 %v3895_v54, %v1722_v12  ;;  %vm1869_vm14 = vweird.f32 %v3895_v54 }
 0x4a3   :  { %3896 = vrsqrt.f32 %v5631_v47  ;;  %v1569_v30 = vmul.f32 %v5629_v3, %v5629_v3  ;;  %v5650_v62 = vadd.f32 %v1352_v44, %v5185_v34  ;;  %vm1870_vm1 = vmor %vm1868_vm15, %vm1869_vm14  ;;  %vm1878_vm3 = vweird.f32 %v5631_v47 }
 0x4a4   :  { %v1861_v43 = vsel %vm1860_vm13, %v3893_v39, %v1857_v11  ;;  %v1864_v53 = vmul.f32 %v3895_v54, %v1863_v7  ;;  %v1314_v39 = vpop.f32.mrf.mxu1 }
 0x4a5   :  { %v1639_v17 = vsel %vm58_vm0, %v1569_v30, 0.0  ;;  %v2073_v22 = vmul.f32 %v1861_v43, %v5429_v50  ;;  %v1312_v50 = vadd.f32 %v1311_v15, %v4871_v31  ;;  %v1468_v12 = vsel %vm58_vm0, %v5650_v62, 0.0 }
 0x4a6   :  { %v1865_v28 = vmul.f32 0.5, %v1864_v53  ;;  %1640 = vadd.xlane.f32.xlu0 %v1639_v17  ;;  %1466 = vadd.xlane.f32.xlu1 %v1465_v46  ;;  %v1626_v60 = vpop.xlane.xlu2 %1625  ;;  %v1452_v37 = vpop.xlane.xlu0 %1451 }
 0x4a7   :  { %v1692_v18 = vmul.f32 %v1626_v60, %v4255_v2  ;;  %v1506_v45 = vmul.f32 %v1452_v37, %v4255_v2  ;;  %v2106_v24 = vmul.f32 %v5334_v20, %v2073_v22  ;;  %v1315_v37 = vadd.f32 %v1314_v39, %v4871_v31 }
 0x4a8   :  { %v1866_v51 = vsub.f32 1.5, %v1865_v28 }
 0x4a9   :  { %v3897_v29 = vpop.eup %3896  ;;  %v5653_v4 = vadd.f32 1e-05, %v1692_v18  ;;  %v5656_v40 = vsub.f32 %v5497_v42, %v1506_v45  ;;  %v5659_v5 = vadd.f32 %v5343_v9, %v2106_v24  ;;  %v4026_v42 = vld [vmem:[%s6934_s0 + $0xd8] sm:$0xff] }
 0x4aa   :  { %v1867_v14 = vmul.f32 %v3895_v54, %v1866_v51  ;;  %v1873_v11 = vmul.f32 %v3897_v29, %v5631_v47  ;;  %v1353_v30 = vmul.f32 %v4026_v42, %v1312_v50  ;;  %vm1879_vm2 = vweird.f32 %v3897_v29 }
 0x4ab   :  { %3898 = vrsqrt.f32 %v5653_v4  ;;  %3738 = vmatmul.msk.f32.gmra.mxu2 %vm58_vm0, %v5659_v5  ;;  %v1570_v34 = vmul.f32 %v5656_v40, %v5656_v40  ;;  %vm1880_vm4 = vmor %vm1878_vm3, %vm1879_vm2  ;;  %vm1888_vm6 = vweird.f32 %v5653_v4 }
 0x4ac   :  { %v1871_v15 = vsel %vm1870_vm1, %v3895_v54, %v1867_v14  ;;  %v1874_v7 = vmul.f32 %v3897_v29, %v1873_v11  ;;  %v5685_v45 = vadd.f32 %v1353_v30, %v5194_v56  ;;  %v1317_v24 = vpop.f32.mrf.mxu1  ;;  %v4027_v56 = vld [vmem:[%s6934_s0 + $0xe0] sm:$0xff] }
 0x4ad   :  { %v1642_v19 = vsel %vm58_vm0, %v1570_v34, 0.0  ;;  %v2074_v44 = vmul.f32 %v1871_v15, %v5443_v38  ;;  %v1354_v47 = vmul.f32 %v4027_v56, %v1315_v37 }
 0x4ae   :  { %v1875_v43 = vmul.f32 0.5, %v1874_v7  ;;  %1469 = vadd.xlane.f32.xlu0 %v1468_v12  ;;  %v1455_v53 = vpop.xlane.xlu2 %1454  ;;  %1643 = vadd.xlane.f32.xlu2 %v1642_v19  ;;  %v1471_v15 = vsel %vm58_vm0, %v5685_v45, 0.0 }
 0x4af   :  { %v1629_v17 = vpop.xlane.xlu1 %1628  ;;  %v1507_v54 = vmul.f32 %v1455_v53, %v4255_v2  ;;  %v2107_v46 = vmul.f32 %v5334_v20, %v2074_v44  ;;  %v1318_v53 = vadd.f32 %v1317_v24, %v4871_v31 }
 0x4b0   :  { %v1876_v22 = vsub.f32 1.5, %v1875_v43  ;;  %v1693_v28 = vmul.f32 %v1629_v17, %v4255_v2 }
 0x4b1   :  { %v3899_v60 = vpop.eup %3898  ;;  %v5679_v18 = vsub.f32 %v5523_v6, %v1507_v54  ;;  %v5682_v38 = vadd.f32 %v5343_v9, %v2107_v46 }
 0x4b2   :  { %v1877_v51 = vmul.f32 %v3897_v29, %v1876_v22  ;;  %v1883_v50 = vmul.f32 %v3899_v60, %v5653_v4  ;;  %v5689_v14 = vadd.f32 1e-05, %v1693_v28  ;;  %vm1889_vm5 = vweird.f32 %v3899_v60 }
 0x4b3   :  { %3739 = vmatmul.msk.f32.gmra.mxu2 %vm58_vm0, %v5682_v38  ;;  %v1571_v6 = vmul.f32 %v5679_v18, %v5679_v18  ;;  %vm1890_vm7 = vmor %vm1888_vm6, %vm1889_vm5 }
 0x4b4   :  { %v1881_v39 = vsel %vm1880_vm4, %v3897_v29, %v1877_v51  ;;  %v1884_v11 = vmul.f32 %v3899_v60, %v1883_v50  ;;  %3900 = vrsqrt.f32 %v5689_v14  ;;  %v1320_v24 = vpop.f32.mrf.mxu1  ;;  %vm1898_vm9 = vweird.f32 %v5689_v14 }
 0x4b5   :  { %v1645_v34 = vsel %vm58_vm0, %v1571_v6, 0.0  ;;  %v2075_v7 = vmul.f32 %v1881_v39, %v5466_v27  ;;  %v5711_v27 = vadd.f32 %v1354_v47, %v5262_v41  ;;  %v4028_v6 = vld [vmem:[%s6934_s0 + $0xe8] sm:$0xff] }
 0x4b6   :  { %v1885_v42 = vmul.f32 0.5, %v1884_v11  ;;  %1646 = vadd.xlane.f32.xlu1 %v1645_v34  ;;  %1472 = vadd.xlane.f32.xlu2 %v1471_v15  ;;  %v1355_v39 = vmul.f32 %v4028_v6, %v1318_v53 }
 0x4b7   :  { %v1458_v30 = vpop.xlane.xlu1 %1457  ;;  %v1632_v29 = vpop.xlane.xlu0 %1631  ;;  %v2108_v12 = vmul.f32 %v5334_v20, %v2075_v7 }
 0x4b8   :  { %v1886_v19 = vsub.f32 1.5, %v1885_v42  ;;  %v1508_v44 = vmul.f32 %v1458_v30, %v4255_v2  ;;  %v1694_v43 = vmul.f32 %v1632_v29, %v4255_v2 }
 0x4b9   :  { %v5708_v17 = vadd.f32 %v5343_v9, %v2108_v12  ;;  %v1321_v12 = vadd.f32 %v1320_v24, %v4871_v31 }
 0x4ba   :  { %v3901_v54 = vpop.eup %3900  ;;  %v1887_v46 = vmul.f32 %v3899_v60, %v1886_v19  ;;  %v5715_v22 = vsub.f32 %v5555_v32, %v1508_v44  ;;  %v5717_v28 = vadd.f32 1e-05, %v1694_v43  ;;  %v1474_v32 = vsel %vm58_vm0, %v5711_v27, 0.0  ;;  %v3722_v43 = vld [vmem:[%s6935_s2 + $0x8] sm:$0x7] }
 0x4bb   :  { %v1893_v37 = vmul.f32 %v3901_v54, %v5689_v14  ;;  %3740 = vmatmul.msk.f32.gmra.mxu2 %vm58_vm0, %v5708_v17  ;;  %vm1899_vm8 = vweird.f32 %v3901_v54  ;;  %v5745_v44 = vadd.f32 %v1355_v39, %v5289_v55 }
 0x4bc   :  { %v1891_v51 = vsel %vm1890_vm7, %v3899_v60, %v1887_v46  ;;  %3902 = vrsqrt.f32 %v5717_v28  ;;  %v1572_v50 = vmul.f32 %v5715_v22, %v5715_v22  ;;  %vm1900_vm10 = vmor %vm1898_vm9, %vm1899_vm8  ;;  %v1323_v14 = vpop.f32.mrf.mxu1  ;;  %vm1908_vm12 = vweird.f32 %v5717_v28 }
 0x4bd   :  { %v1894_v41 = vmul.f32 %v3901_v54, %v1893_v37  ;;  %v2076_v4 = vmul.f32 %v1891_v51, %v5491_v58  ;;  %v2281_v37 = vpop.f32.mrf.mxu2  ;;  %v4029_v51 = vld [vmem:[%s6934_s0 + $0xf0] sm:$0xff] }
 0x4be   :  { %1475 = vadd.xlane.f32.xlu1 %v1474_v32  ;;  %v1635_v11 = vpop.xlane.xlu2 %1634  ;;  %v1648_v60 = vsel %vm58_vm0, %v1572_v50, 0.0  ;;  %v5760_v50 = vperm.slane %v3722_v43, 0 }
 0x4bf   :  { %v1895_v56 = vmul.f32 0.5, %v1894_v41  ;;  %v1695_v47 = vmul.f32 %v1635_v11, %v4255_v2  ;;  %v1461_v34 = vpop.xlane.xlu0 %1460  ;;  %v2109_v15 = vmul.f32 %v5334_v20, %v2076_v4  ;;  %1649 = vadd.xlane.f32.xlu0 %v1648_v60  ;;  %v1356_v41 = vmul.f32 %v4029_v51, %v1321_v12 }
 0x4c0   :  { %v1509_v7 = vmul.f32 %v1461_v34, %v4255_v2  ;;  %v1477_v11 = vsel %vm58_vm0, %v5745_v44, 0.0 }
 0x4c1   :  { %v1896_v42 = vsub.f32 1.5, %v1895_v56  ;;  %v5735_v58 = vadd.f32 1e-05, %v1695_v47  ;;  %v5738_v30 = vadd.f32 %v5343_v9, %v2109_v15  ;;  %v1324_v47 = vadd.f32 %v1323_v14, %v4871_v31 }
 0x4c2   :  { %v3903_v29 = vpop.eup %3902  ;;  %v5742_v19 = vsub.f32 %v5580_v59, %v1509_v7  ;;  %v5778_v12 = vadd.f32 %v1356_v41, %v5319_v48 }
 0x4c3   :  { %v1897_v53 = vmul.f32 %v3901_v54, %v1896_v42  ;;  %v1903_v46 = vmul.f32 %v3903_v29, %v5717_v28  ;;  %3904 = vrsqrt.f32 %v5735_v58  ;;  %3741 = vmatmul.msk.f32.gmra.mxu2 %vm58_vm0, %v5738_v30  ;;  %vm1909_vm11 = vweird.f32 %v3903_v29  ;;  %v4031_v28 = vld [vmem:[%s6934_s0] sm:$0xff] }
 0x4c4   :  { %v1573_v55 = vmul.f32 %v5742_v19, %v5742_v19  ;;  %vm1910_vm13 = vmor %vm1908_vm12, %vm1909_vm11  ;;  %v1480_v41 = vsel %vm58_vm0, %v5778_v12, 0.0  ;;  %vm1918_vm15 = vweird.f32 %v5735_v58 }
 0x4c5   :  { %v1901_v59 = vsel %vm1900_vm10, %v3901_v54, %v1897_v53  ;;  %v1904_v24 = vmul.f32 %v3903_v29, %v1903_v46 }
 0x4c6   :  { %v1464_v32 = vpop.xlane.xlu2 %1463  ;;  %v1651_v4 = vsel %vm58_vm0, %v1573_v55, 0.0  ;;  %v2077_v6 = vmul.f32 %v1901_v59, %v5529_v63  ;;  %v2282_v63 = vadd.f32 %v2281_v37, %v5760_v50  ;;  %v2284_v59 = vpop.f32.mrf.mxu2 }
 0x4c7   :  { %v1905_v39 = vmul.f32 0.5, %v1904_v24  ;;  %v1510_v54 = vmul.f32 %v1464_v32, %v4255_v2  ;;  %1652 = vadd.xlane.f32.xlu2 %v1651_v4  ;;  %1478 = vadd.xlane.f32.xlu0 %v1477_v11  ;;  %v2285_v32 = vadd.f32 %v2284_v59, %v5760_v50 }
 0x4c8   :  { %v2110_v56 = vmul.f32 %v5334_v20, %v2077_v6  ;;  %v2377_v55 = vmul.f32 %v4031_v28, %v2282_v63 }
 0x4c9   :  { %v3905_v60 = vpop.eup %3904  ;;  %v1906_v34 = vsub.f32 1.5, %v1905_v39  ;;  %v5770_v15 = vsub.f32 %v5596_v13, %v1510_v54  ;;  %v4030_v13 = vld [vmem:[%s6934_s0 + $0xf8] sm:$0xff]  ;;  %v4032_v54 = vld [vmem:[%s6934_s0 + $0x8] sm:$0xff] }
 0x4ca   :  { %v1913_v7 = vmul.f32 %v3905_v60, %v5735_v58  ;;  %v5775_v42 = vadd.f32 %v5343_v9, %v2110_v56  ;;  %v1357_v46 = vmul.f32 %v4030_v13, %v1324_v47  ;;  %vm1919_vm14 = vweird.f32 %v3905_v60 }
 0x4cb   :  { %v1907_v43 = vmul.f32 %v3903_v29, %v1906_v34  ;;  %v1574_v31 = vmul.f32 %v5770_v15, %v5770_v15  ;;  %v5805_v39 = vadd.f32 %v2377_v55, %v5355_v49  ;;  %vm1920_vm1 = vmor %vm1918_vm15, %vm1919_vm14 }
 0x4cc   :  { %v1914_v53 = vmul.f32 %v3905_v60, %v1913_v7  ;;  %3742 = vmatmul.msk.f32.gmra.mxu2 %vm58_vm0, %v5775_v42  ;;  %v5798_v4 = vadd.f32 %v1357_v46, %v5362_v25  ;;  %v2378_v25 = vmul.f32 %v4032_v54, %v2285_v32 }
 0x4cd   :  { %v1911_v37 = vsel %vm1910_vm13, %v3903_v29, %v1907_v43  ;;  %v1654_v48 = vsel %vm58_vm0, %v1574_v31, 0.0  ;;  %v2441_v49 = vsel %vm58_vm0, %v5805_v39, 0.0 }
 0x4ce   :  { %v2078_v24 = vmul.f32 %v1911_v37, %v5552_v57  ;;  %v1915_v51 = vmul.f32 0.5, %v1914_v53  ;;  %1655 = vadd.xlane.f32.xlu1 %v1654_v48  ;;  %v1483_v58 = vsel %vm58_vm0, %v5798_v4, 0.0  ;;  %v5822_v34 = vadd.f32 %v2378_v25, %v5389_v23  ;;  %v2287_v31 = vpop.f32.mrf.mxu2 }
 0x4cf   :  { %1481 = vadd.xlane.f32.xlu2 %v1480_v41  ;;  %v2288_v25 = vadd.f32 %v2287_v31, %v5760_v50  ;;  %v4033_v31 = vld [vmem:[%s6934_s0 + $0x10] sm:$0xff] }
 0x4d0   :  { %v1916_v14 = vsub.f32 1.5, %v1915_v51  ;;  %v2111_v29 = vmul.f32 %v5334_v20, %v2078_v24 }
 0x4d2   :  { %v1917_v6 = vmul.f32 %v3905_v60, %v1916_v14  ;;  %v5802_v57 = vadd.f32 %v5343_v9, %v2111_v29 }
 0x4d4   :  { %v1921_v11 = vsel %vm1920_vm1, %v3905_v60, %v1917_v6  ;;  %3743 = vmatmul.msk.f32.gmra.mxu2 %vm58_vm0, %v5802_v57 }
 0x4d5   :  { %v2079_v56 = vmul.f32 %v1921_v11, %v5574_v16  ;;  %v2444_v16 = vsel %vm58_vm0, %v5822_v34, 0.0 }
 0x4d6   :  { %1484 = vadd.xlane.f32.xlu1 %v1483_v58  ;;  %v2290_v51 = vpop.f32.mrf.mxu2 }
 0x4d7   :  { %2442 = vadd.xlane.f32.xlu2 %v2441_v49  ;;  %v2112_v60 = vmul.f32 %v5334_v20, %v2079_v56 }
 0x4d9   :  { %v5819_v47 = vadd.f32 %v5343_v9, %v2112_v60 }
 0x4dc   :  { %3744 = vmatmul.msk.f32.gmra.mxu2 %vm58_vm0, %v5819_v47 }
 0x4de   :  { %2445 = vadd.xlane.f32.xlu1 %v2444_v16 }
 0x511   :  { %v1638_v63 = vpop.xlane.xlu1 %1637 }
 0x512   :  { %v1696_v7 = vmul.f32 %v1638_v63, %v4255_v2 }
 0x514   :  { %v1728_v43 = vadd.f32 1e-05, %v1696_v7 }
 0x516   :  { %3906 = vrsqrt.f32 %v1728_v43  ;;  %vm1928_vm3 = vweird.f32 %v1728_v43 }
 0x519   :  { %v1467_v53 = vpop.xlane.xlu1 %1466  ;;  %v1641_v13 = vpop.xlane.xlu0 %1640 }
 0x51a   :  { %v1511_v46 = vmul.f32 %v1467_v53, %v4255_v2  ;;  %v1697_v23 = vmul.f32 %v1641_v13, %v4255_v2  ;;  %v2379_v53 = vmul.f32 %v4033_v31, %v2288_v25  ;;  %v2293_v13 = vpop.f32.mrf.mxu2 }
 0x51c   :  { %v3907_v37 = vpop.eup %3906  ;;  %v5832_v48 = vsub.f32 %v5634_v10, %v1511_v46  ;;  %v1729_v28 = vadd.f32 1e-05, %v1697_v23 }
 0x51d   :  { %v1923_v55 = vmul.f32 %v3907_v37, %v1728_v43  ;;  %vm1929_vm2 = vweird.f32 %v3907_v37 }
 0x51e   :  { %3908 = vrsqrt.f32 %v1729_v28  ;;  %v1575_v59 = vmul.f32 %v5832_v48, %v5832_v48  ;;  %vm1930_vm4 = vmor %vm1928_vm3, %vm1929_vm2  ;;  %vm1938_vm6 = vweird.f32 %v1729_v28 }
 0x51f   :  { %v1924_v24 = vmul.f32 %v3907_v37, %v1923_v55 }
 0x520   :  { %v1657_v41 = vsel %vm58_vm0, %v1575_v59, 0.0 }
 0x521   :  { %v1925_v14 = vmul.f32 0.5, %v1924_v24  ;;  %1658 = vadd.xlane.f32.xlu0 %v1657_v41  ;;  %v1644_v29 = vpop.xlane.xlu2 %1643  ;;  %v1470_v32 = vpop.xlane.xlu0 %1469  ;;  %v2291_v41 = vadd.f32 %v2290_v51, %v5760_v50  ;;  %v4034_v51 = vld [vmem:[%s6934_s0 + $0x18] sm:$0xff] }
 0x522   :  { %v1698_v6 = vmul.f32 %v1644_v29, %v4255_v2  ;;  %v1512_v11 = vmul.f32 %v1470_v32, %v4255_v2 }
 0x523   :  { %v1926_v10 = vsub.f32 1.5, %v1925_v14 }
 0x524   :  { %v3909_v54 = vpop.eup %3908  ;;  %v5840_v56 = vadd.f32 1e-05, %v1698_v6  ;;  %v5843_v58 = vsub.f32 %v5650_v62, %v1512_v11  ;;  %v5866_v11 = vadd.f32 %v2379_v53, %v5411_v0 }
 0x525   :  { %v1927_v49 = vmul.f32 %v3907_v37, %v1926_v10  ;;  %v1933_v60 = vmul.f32 %v3909_v54, %v1729_v28  ;;  %vm1939_vm5 = vweird.f32 %v3909_v54 }
 0x526   :  { %3910 = vrsqrt.f32 %v5840_v56  ;;  %v1576_v16 = vmul.f32 %v5843_v58, %v5843_v58  ;;  %vm1940_vm7 = vmor %vm1938_vm6, %vm1939_vm5  ;;  %vm1948_vm9 = vweird.f32 %v5840_v56 }
 0x527   :  { %v1931_v63 = vsel %vm1930_vm4, %v3907_v37, %v1927_v49  ;;  %v1934_v7 = vmul.f32 %v3909_v54, %v1933_v60  ;;  %v2380_v49 = vmul.f32 %v4034_v51, %v2291_v41 }
 0x528   :  { %v2080_v62 = vmul.f32 %v1931_v63, %v5617_v21  ;;  %v1660_v46 = vsel %vm58_vm0, %v1576_v16, 0.0  ;;  %v2447_v63 = vsel %vm58_vm0, %v5866_v11, 0.0 }
 0x529   :  { %v1935_v43 = vmul.f32 0.5, %v1934_v7  ;;  %v1647_v23 = vpop.xlane.xlu1 %1646  ;;  %v1473_v55 = vpop.xlane.xlu2 %1472  ;;  %1661 = vadd.xlane.f32.xlu0 %v1660_v46 }
 0x52a   :  { %v1699_v59 = vmul.f32 %v1647_v23, %v4255_v2  ;;  %v1513_v24 = vmul.f32 %v1473_v55, %v4255_v2  ;;  %v2113_v37 = vmul.f32 %v5334_v20, %v2080_v62  ;;  %v2296_v46 = vpop.f32.mrf.mxu2  ;;  %v5884_v23 = vadd.f32 %v2380_v49, %v5420_v35 }
 0x52b   :  { %v1936_v14 = vsub.f32 1.5, %v1935_v43  ;;  %v2294_v55 = vadd.f32 %v2293_v13, %v5760_v50 }
 0x52c   :  { %v3911_v29 = vpop.eup %3910  ;;  %v5857_v32 = vadd.f32 1e-05, %v1699_v59  ;;  %v5860_v21 = vsub.f32 %v5685_v45, %v1513_v24  ;;  %v5863_v6 = vadd.f32 %v5343_v9, %v2113_v37 }
 0x52d   :  { %v1937_v10 = vmul.f32 %v3909_v54, %v1936_v14  ;;  %v1943_v25 = vmul.f32 %v3911_v29, %v5840_v56  ;;  %vm1949_vm8 = vweird.f32 %v3911_v29  ;;  %v4035_v56 = vld [vmem:[%s6934_s0 + $0x20] sm:$0xff] }
 0x52e   :  { %3912 = vrsqrt.f32 %v5857_v32  ;;  %3745 = vmatmul.msk.f32.gmra.mxu2 %vm58_vm0, %v5863_v6  ;;  %v1577_v45 = vmul.f32 %v5860_v21, %v5860_v21  ;;  %vm1950_vm10 = vmor %vm1948_vm9, %vm1949_vm8  ;;  %vm1958_vm12 = vweird.f32 %v5857_v32 }
 0x52f   :  { %v1941_v0 = vsel %vm1940_vm7, %v3909_v54, %v1937_v10  ;;  %v1944_v60 = vmul.f32 %v3911_v29, %v1943_v25  ;;  %v2450_v25 = vsel %vm58_vm0, %v5884_v23, 0.0 }
 0x530   :  { %v2081_v28 = vmul.f32 %v1941_v0, %v5629_v3  ;;  %v1663_v16 = vsel %vm58_vm0, %v1577_v45, 0.0  ;;  %v2381_v45 = vmul.f32 %v4035_v56, %v2294_v55  ;;  %v2297_v55 = vadd.f32 %v2296_v46, %v5760_v50 }
 0x531   :  { %v1945_v7 = vmul.f32 0.5, %v1944_v60  ;;  %v1476_v31 = vpop.xlane.xlu1 %1475  ;;  %1664 = vadd.xlane.f32.xlu2 %v1663_v16  ;;  %2448 = vadd.xlane.f32.xlu0 %v2447_v63 }
 0x532   :  { %v1514_v53 = vmul.f32 %v1476_v31, %v4255_v2  ;;  %v2114_v62 = vmul.f32 %v5334_v20, %v2081_v28  ;;  %v1650_v54 = vpop.xlane.xlu0 %1649 }
 0x533   :  { %v1946_v43 = vsub.f32 1.5, %v1945_v7  ;;  %v1700_v24 = vmul.f32 %v1650_v54, %v4255_v2 }
 0x534   :  { %v3913_v3 = vpop.eup %3912  ;;  %v5888_v59 = vsub.f32 %v5711_v27, %v1514_v53  ;;  %v5892_v37 = vadd.f32 %v5343_v9, %v2114_v62  ;;  %v2299_v53 = vpop.f32.mrf.mxu2 }
 0x535   :  { %v1947_v41 = vmul.f32 %v3911_v29, %v1946_v43  ;;  %v1953_v14 = vmul.f32 %v3913_v3, %v5857_v32  ;;  %v5896_v10 = vadd.f32 1e-05, %v1700_v24  ;;  %vm1959_vm11 = vweird.f32 %v3913_v3 }
 0x536   :  { %3746 = vmatmul.msk.f32.gmra.mxu2 %vm58_vm0, %v5892_v37  ;;  %v1578_v35 = vmul.f32 %v5888_v59, %v5888_v59  ;;  %vm1960_vm13 = vmor %vm1958_vm12, %vm1959_vm11 }
 0x537   :  { %v1951_v27 = vsel %vm1950_vm10, %v3911_v29, %v1947_v41  ;;  %v1954_v13 = vmul.f32 %v3913_v3, %v1953_v14  ;;  %3914 = vrsqrt.f32 %v5896_v10  ;;  %vm1968_vm15 = vweird.f32 %v5896_v10 }
 0x538   :  { %v2082_v51 = vmul.f32 %v1951_v27, %v5656_v40  ;;  %v1666_v49 = vsel %vm58_vm0, %v1578_v35, 0.0  ;;  %v5917_v40 = vadd.f32 %v2381_v45, %v5471_v8  ;;  %v4036_v27 = vld [vmem:[%s6934_s0 + $0x28] sm:$0xff] }
 0x539   :  { %v1955_v0 = vmul.f32 0.5, %v1954_v13  ;;  %1667 = vadd.xlane.f32.xlu1 %v1666_v49  ;;  %2451 = vadd.xlane.f32.xlu2 %v2450_v25 }
 0x53a   :  { %v1653_v60 = vpop.xlane.xlu2 %1652  ;;  %v2115_v29 = vmul.f32 %v5334_v20, %v2082_v51  ;;  %v1479_v63 = vpop.xlane.xlu0 %1478  ;;  %v2453_v32 = vsel %vm58_vm0, %v5917_v40, 0.0 }
 0x53b   :  { %v1956_v28 = vsub.f32 1.5, %v1955_v0  ;;  %v1701_v16 = vmul.f32 %v1653_v60, %v4255_v2  ;;  %v1515_v7 = vmul.f32 %v1479_v63, %v4255_v2 }
 0x53c   :  { %v5914_v31 = vadd.f32 %v5343_v9, %v2115_v29  ;;  %v2300_v29 = vadd.f32 %v2299_v53, %v5760_v50 }
 0x53d   :  { %v1957_v62 = vmul.f32 %v3913_v3, %v1956_v28  ;;  %v5920_v43 = vadd.f32 1e-05, %v1701_v16  ;;  %v3915_v54 = vpop.eup %3914  ;;  %v5924_v24 = vsub.f32 %v5745_v44, %v1515_v7 }
 0x53e   :  { %3747 = vmatmul.msk.f32.gmra.mxu2 %vm58_vm0, %v5914_v31  ;;  %v1963_v8 = vmul.f32 %v3915_v54, %v5896_v10  ;;  %vm1969_vm14 = vweird.f32 %v3915_v54 }
 0x53f   :  { %v1961_v41 = vsel %vm1960_vm13, %v3913_v3, %v1957_v62  ;;  %3916 = vrsqrt.f32 %v5920_v43  ;;  %v1579_v46 = vmul.f32 %v5924_v24, %v5924_v24  ;;  %v2382_v3 = vmul.f32 %v4036_v27, %v2297_v55  ;;  %v2302_v62 = vpop.f32.mrf.mxu2  ;;  %vm1970_vm1 = vmor %vm1968_vm15, %vm1969_vm14 }
 0x540   :  { %v2083_v14 = vmul.f32 %v1961_v41, %v5679_v18  ;;  %v1964_v35 = vmul.f32 %v3915_v54, %v1963_v8  ;;  %v4037_v41 = vld [vmem:[%s6934_s0 + $0x30] sm:$0xff]  ;;  %vm1978_vm3 = vweird.f32 %v5920_v43 }
 0x541   :  { %2454 = vadd.xlane.f32.xlu1 %v2453_v32  ;;  %v1656_v44 = vpop.xlane.xlu1 %1655  ;;  %v1669_v56 = vsel %vm58_vm0, %v1579_v46, 0.0  ;;  %v5956_v7 = vadd.f32 %v2382_v3, %v5494_v36  ;;  %v2383_v8 = vmul.f32 %v4037_v41, %v2300_v29 }
 0x542   :  { %v1702_v13 = vmul.f32 %v1656_v44, %v4255_v2  ;;  %v1482_v25 = vpop.xlane.xlu2 %1481  ;;  %v2116_v18 = vmul.f32 %v5334_v20, %v2083_v14  ;;  %v1965_v45 = vmul.f32 0.5, %v1964_v35  ;;  %1670 = vadd.xlane.f32.xlu0 %v1669_v56 }
 0x543   :  { %v1516_v51 = vmul.f32 %v1482_v25, %v4255_v2  ;;  %v2456_v27 = vsel %vm58_vm0, %v5956_v7, 0.0 }
 0x544   :  { %v5942_v49 = vadd.f32 1e-05, %v1702_v13  ;;  %v5945_v0 = vadd.f32 %v5343_v9, %v2116_v18  ;;  %v1966_v28 = vsub.f32 1.5, %v1965_v45 }
 0x545   :  { %v3917_v60 = vpop.eup %3916  ;;  %v5949_v16 = vsub.f32 %v5778_v12, %v1516_v51  ;;  %v5980_v51 = vadd.f32 %v2383_v8, %v5520_v1 }
 0x546   :  { %v1973_v63 = vmul.f32 %v3917_v60, %v5920_v43  ;;  %3918 = vrsqrt.f32 %v5942_v49  ;;  %3748 = vmatmul.msk.f32.gmra.mxu2 %vm58_vm0, %v5945_v0  ;;  %v1967_v55 = vmul.f32 %v3915_v54, %v1966_v28  ;;  %vm1979_vm2 = vweird.f32 %v3917_v60 }
 0x547   :  { %v1580_v53 = vmul.f32 %v5949_v16, %v5949_v16  ;;  %vm1980_vm4 = vmor %vm1978_vm3, %vm1979_vm2  ;;  %vm1988_vm6 = vweird.f32 %v5942_v49 }
 0x548   :  { %v1974_v12 = vmul.f32 %v3917_v60, %v1973_v63  ;;  %v1971_v14 = vsel %vm1970_vm1, %v3915_v54, %v1967_v55 }
 0x549   :  { %v1485_v32 = vpop.xlane.xlu1 %1484  ;;  %v1672_v46 = vsel %vm58_vm0, %v1580_v53, 0.0  ;;  %v2084_v36 = vmul.f32 %v1971_v14, %v5715_v22  ;;  %v2303_v22 = vadd.f32 %v2302_v62, %v5760_v50  ;;  %v2305_v53 = vpop.f32.mrf.mxu2 }
 0x54a   :  { %v1975_v35 = vmul.f32 0.5, %v1974_v12  ;;  %v1517_v44 = vmul.f32 %v1485_v32, %v4255_v2  ;;  %1673 = vadd.xlane.f32.xlu2 %v1672_v46  ;;  %v2443_v10 = vpop.xlane.xlu2 %2442  ;;  %2457 = vadd.xlane.f32.xlu0 %v2456_v27  ;;  %v2459_v32 = vsel %vm58_vm0, %v5980_v51, 0.0 }
 0x54b   :  { %v2537_v3 = vmul.f32 %v2443_v10, %v4255_v2  ;;  %v2117_v56 = vmul.f32 %v5334_v20, %v2084_v36 }
 0x54c   :  { %v3919_v13 = vpop.eup %3918  ;;  %v1976_v25 = vsub.f32 1.5, %v1975_v35  ;;  %v5971_v54 = vsub.f32 %v5798_v4, %v1517_v44  ;;  %v2306_v35 = vadd.f32 %v2305_v53, %v5760_v50 }
 0x54d   :  { %v1983_v18 = vmul.f32 %v3919_v13, %v5942_v49  ;;  %v5977_v45 = vsub.f32 %v5805_v39, %v2537_v3  ;;  %v5984_v28 = vadd.f32 %v5343_v9, %v2117_v56  ;;  %v4038_v39 = vld [vmem:[%s6934_s0 + $0x38] sm:$0xff]  ;;  %vm1989_vm5 = vweird.f32 %v3919_v13  ;;  %v4039_v56 = vld [vmem:[%s6934_s0 + $0x40] sm:$0xff] }
 0x54e   :  { %v1977_v29 = vmul.f32 %v3917_v60, %v1976_v25  ;;  %v1581_v4 = vmul.f32 %v5971_v54, %v5971_v54  ;;  %v2384_v43 = vmul.f32 %v4038_v39, %v2303_v22  ;;  %vm1990_vm7 = vmor %vm1988_vm6, %vm1989_vm5 }
 0x54f   :  { %v1984_v63 = vmul.f32 %v3919_v13, %v1983_v18  ;;  %v2601_v62 = vmul.f32 %v5977_v45, %v5977_v45  ;;  %3749 = vmatmul.msk.f32.gmra.mxu2 %vm58_vm0, %v5984_v28 }
 0x550   :  { %v1981_v55 = vsel %vm1980_vm4, %v3917_v60, %v1977_v29  ;;  %v1675_v1 = vsel %vm58_vm0, %v1581_v4, 0.0  ;;  %v6011_v27 = vadd.f32 %v2384_v43, %v5548_v26 }
 0x551   :  { %v2085_v12 = vmul.f32 %v1981_v55, %v5742_v19  ;;  %v1985_v41 = vmul.f32 0.5, %v1984_v63  ;;  %1676 = vadd.xlane.f32.xlu1 %v1675_v1  ;;  %v2446_v8 = vpop.xlane.xlu1 %2445  ;;  %v2633_v14 = vsel %vm58_vm0, %v2601_v62, 0.0  ;;  %v2308_v55 = vpop.f32.mrf.mxu2 }
 0x552   :  { %v2538_v60 = vmul.f32 %v2446_v8, %v4255_v2  ;;  %2634 = vadd.xlane.f32.xlu2 %v2633_v14  ;;  %2460 = vadd.xlane.f32.xlu0 %v2459_v32  ;;  %v2462_v26 = vsel %vm58_vm0, %v6011_v27, 0.0 }
 0x553   :  { %v1986_v46 = vsub.f32 1.5, %v1985_v41  ;;  %v2118_v36 = vmul.f32 %v5334_v20, %v2085_v12 }
 0x554   :  { %v6004_v19 = vsub.f32 %v5822_v34, %v2538_v60  ;;  %v2385_v34 = vmul.f32 %v4039_v56, %v2306_v35 }
 0x555   :  { %v1987_v44 = vmul.f32 %v3919_v13, %v1986_v46  ;;  %v6008_v10 = vadd.f32 %v5343_v9, %v2118_v36 }
 0x556   :  { %v2602_v3 = vmul.f32 %v6004_v19, %v6004_v19  ;;  %v6029_v29 = vadd.f32 %v2385_v34, %v5577_v52 }
 0x557   :  { %v1991_v25 = vsel %vm1990_vm7, %v3919_v13, %v1987_v44  ;;  %3750 = vmatmul.msk.f32.gmra.mxu2 %vm58_vm0, %v6008_v10  ;;  %v2309_v44 = vadd.f32 %v2308_v55, %v5760_v50 }
 0x558   :  { %v2086_v22 = vmul.f32 %v1991_v25, %v5770_v15  ;;  %v2636_v49 = vsel %vm58_vm0, %v2602_v3, 0.0  ;;  %v2465_v15 = vsel %vm58_vm0, %v6029_v29, 0.0 }
 0x559   :  { %2637 = vadd.xlane.f32.xlu1 %v2636_v49  ;;  %v2311_v41 = vpop.f32.mrf.mxu2 }
 0x55a   :  { %2463 = vadd.xlane.f32.xlu2 %v2462_v26  ;;  %v2119_v18 = vmul.f32 %v5334_v20, %v2086_v22 }
 0x55c   :  { %v6026_v13 = vadd.f32 %v5343_v9, %v2119_v18  ;;  %v4040_v18 = vld [vmem:[%s6934_s0 + $0x48] sm:$0xff] }
 0x55f   :  { %3751 = vmatmul.msk.f32.gmra.mxu2 %vm58_vm0, %v6026_v13 }
 0x561   :  { %2466 = vadd.xlane.f32.xlu1 %v2465_v15  ;;  %v2386_v15 = vmul.f32 %v4040_v18, %v2309_v44 }
 0x594   :  { %v1659_v4 = vpop.xlane.xlu0 %1658 }
 0x595   :  { %v1703_v63 = vmul.f32 %v1659_v4, %v4255_v2  ;;  %v2314_v4 = vpop.f32.mrf.mxu2 }
 0x597   :  { %v1735_v62 = vadd.f32 1e-05, %v1703_v63 }
 0x599   :  { %3920 = vrsqrt.f32 %v1735_v62  ;;  %vm1998_vm9 = vweird.f32 %v1735_v62 }
 0x59c   :  { %v1662_v1 = vpop.xlane.xlu0 %1661 }
 0x59d   :  { %v1704_v39 = vmul.f32 %v1662_v1, %v4255_v2 }
 0x59f   :  { %v3921_v43 = vpop.eup %3920  ;;  %v1736_v53 = vadd.f32 1e-05, %v1704_v39 }
 0x5a0   :  { %v1993_v52 = vmul.f32 %v3921_v43, %v1735_v62  ;;  %vm1999_vm8 = vweird.f32 %v3921_v43 }
 0x5a1   :  { %3922 = vrsqrt.f32 %v1736_v53  ;;  %vm2000_vm10 = vmor %vm1998_vm9, %vm1999_vm8  ;;  %vm2008_vm12 = vweird.f32 %v1736_v53 }
 0x5a2   :  { %v1994_v12 = vmul.f32 %v3921_v43, %v1993_v52 }
 0x5a4   :  { %v1995_v8 = vmul.f32 0.5, %v1994_v12  ;;  %v1665_v14 = vpop.xlane.xlu2 %1664  ;;  %v2449_v60 = vpop.xlane.xlu0 %2448  ;;  %v2312_v12 = vadd.f32 %v2311_v41, %v5760_v50  ;;  %v4041_v41 = vld [vmem:[%s6934_s0 + $0x50] sm:$0xff] }
 0x5a5   :  { %v1705_v32 = vmul.f32 %v1665_v14, %v4255_v2  ;;  %v2539_v46 = vmul.f32 %v2449_v60, %v4255_v2 }
 0x5a6   :  { %v1996_v36 = vsub.f32 1.5, %v1995_v8 }
 0x5a7   :  { %v3923_v35 = vpop.eup %3922  ;;  %v6040_v3 = vadd.f32 1e-05, %v1705_v32  ;;  %v6043_v25 = vsub.f32 %v5866_v11, %v2539_v46  ;;  %v6066_v46 = vadd.f32 %v2386_v15, %v5599_v61 }
 0x5a8   :  { %v1997_v56 = vmul.f32 %v3921_v43, %v1996_v36  ;;  %v2003_v34 = vmul.f32 %v3923_v35, %v1736_v53  ;;  %vm2009_vm11 = vweird.f32 %v3923_v35 }
 0x5a9   :  { %3924 = vrsqrt.f32 %v6040_v3  ;;  %v2603_v22 = vmul.f32 %v6043_v25, %v6043_v25  ;;  %vm2010_vm13 = vmor %vm2008_vm12, %vm2009_vm11  ;;  %vm2018_vm15 = vweird.f32 %v6040_v3 }
 0x5aa   :  { %v2001_v49 = vsel %vm2000_vm10, %v3921_v43, %v1997_v56  ;;  %v2004_v26 = vmul.f32 %v3923_v35, %v2003_v34  ;;  %v2387_v56 = vmul.f32 %v4041_v41, %v2312_v12 }
 0x5ab   :  { %v2087_v11 = vmul.f32 %v2001_v49, %v5832_v48  ;;  %v2639_v63 = vsel %vm58_vm0, %v2603_v22, 0.0  ;;  %v2468_v49 = vsel %vm58_vm0, %v6066_v46, 0.0 }
 0x5ac   :  { %v2005_v62 = vmul.f32 0.5, %v2004_v26  ;;  %v1668_v55 = vpop.xlane.xlu1 %1667  ;;  %v2452_v1 = vpop.xlane.xlu2 %2451  ;;  %2640 = vadd.xlane.f32.xlu0 %v2639_v63 }
 0x5ad   :  { %v1706_v39 = vmul.f32 %v1668_v55, %v4255_v2  ;;  %v2540_v52 = vmul.f32 %v2452_v1, %v4255_v2  ;;  %v2120_v43 = vmul.f32 %v5334_v20, %v2087_v11  ;;  %v2317_v63 = vpop.f32.mrf.mxu2  ;;  %v6084_v55 = vadd.f32 %v2387_v56, %v5608_v33 }
 0x5ae   :  { %v2006_v8 = vsub.f32 1.5, %v2005_v62  ;;  %v2315_v1 = vadd.f32 %v2314_v4, %v5760_v50 }
 0x5af   :  { %v3925_v14 = vpop.eup %3924  ;;  %v6057_v60 = vadd.f32 1e-05, %v1706_v39  ;;  %v6060_v48 = vsub.f32 %v5884_v23, %v2540_v52  ;;  %v6063_v32 = vadd.f32 %v5343_v9, %v2120_v43 }
 0x5b0   :  { %v2007_v36 = vmul.f32 %v3923_v35, %v2006_v8  ;;  %v2013_v44 = vmul.f32 %v3925_v14, %v6040_v3  ;;  %vm2019_vm14 = vweird.f32 %v3925_v14  ;;  %v4042_v3 = vld [vmem:[%s6934_s0 + $0x58] sm:$0xff] }
 0x5b1   :  { %3926 = vrsqrt.f32 %v6057_v60  ;;  %3752 = vmatmul.msk.f32.gmra.mxu2 %vm58_vm0, %v6063_v32  ;;  %v2604_v23 = vmul.f32 %v6060_v48, %v6060_v48  ;;  %vm2020_vm1 = vmor %vm2018_vm15, %vm2019_vm14  ;;  %vm2028_vm3 = vweird.f32 %v6057_v60 }
 0x5b2   :  { %v2011_v61 = vsel %vm2010_vm13, %v3923_v35, %v2007_v36  ;;  %v2014_v34 = vmul.f32 %v3925_v14, %v2013_v44  ;;  %v2471_v44 = vsel %vm58_vm0, %v6084_v55, 0.0 }
 0x5b3   :  { %v2088_v53 = vmul.f32 %v2011_v61, %v5843_v58  ;;  %v2642_v22 = vsel %vm58_vm0, %v2604_v23, 0.0  ;;  %v2388_v23 = vmul.f32 %v4042_v3, %v2315_v1  ;;  %v4043_v3 = vld [vmem:[%s6934_s0 + $0x60] sm:$0xff] }
 0x5b4   :  { %v2015_v26 = vmul.f32 0.5, %v2014_v34  ;;  %v2455_v18 = vpop.xlane.xlu1 %2454  ;;  %2643 = vadd.xlane.f32.xlu2 %v2642_v22  ;;  %2469 = vadd.xlane.f32.xlu0 %v2468_v49 }
 0x5b5   :  { %v2541_v15 = vmul.f32 %v2455_v18, %v4255_v2  ;;  %v2121_v11 = vmul.f32 %v5334_v20, %v2088_v53  ;;  %v1671_v35 = vpop.xlane.xlu0 %1670 }
 0x5b6   :  { %v2016_v62 = vsub.f32 1.5, %v2015_v26  ;;  %v1707_v52 = vmul.f32 %v1671_v35, %v4255_v2  ;;  %v3213_v26 = vld [vmem:[%s6936_s3 + $0x10] sm:$0xff] }
 0x5b7   :  { %v3927_v58 = vpop.eup %3926  ;;  %v6088_v39 = vsub.f32 %v5917_v40, %v2541_v15  ;;  %v6092_v43 = vadd.f32 %v5343_v9, %v2121_v11  ;;  %v6123_v11 = vadd.f32 %v2388_v23, %v5659_v5 }
 0x5b8   :  { %v2017_v12 = vmul.f32 %v3925_v14, %v2016_v62  ;;  %v2023_v8 = vmul.f32 %v3927_v58, %v6057_v60  ;;  %v6096_v36 = vadd.f32 1e-05, %v1707_v52  ;;  %vm2029_vm2 = vweird.f32 %v3927_v58  ;;  %v2320_v62 = vpop.f32.mrf.mxu2  ;;  %v3212_v52 = vld [vmem:[%s6936_s3 + $0x8] sm:$0xff] }
 0x5b9   :  { %3753 = vmatmul.msk.f32.gmra.mxu2 %vm58_vm0, %v6092_v43  ;;  %v2605_v33 = vmul.f32 %v6088_v39, %v6088_v39  ;;  %vm2030_vm4 = vmor %vm2028_vm3, %vm2029_vm2 }
 0x5ba   :  { %v2021_v40 = vsel %vm2020_vm1, %v3925_v14, %v2017_v12  ;;  %v2024_v4 = vmul.f32 %v3927_v58, %v2023_v8  ;;  %3928 = vrsqrt.f32 %v6096_v36  ;;  %v3214_v14 = vld [vmem:[%s6936_s3 + $0x18] sm:$0xff]  ;;  %v2318_v8 = vadd.f32 %v2317_v63, %v5760_v50 }
 0x5bb   :  { %v2089_v41 = vmul.f32 %v2021_v40, %v5860_v21  ;;  %v2645_v56 = vsel %vm58_vm0, %v2605_v33, 0.0  ;;  %3323 = vmatpush.msrb.mxu3 %v3214_v14  ;;  %v3211_v40 = vld [vmem:[%s6936_s3] sm:$0xff]  ;;  %vm2038_vm6 = vweird.f32 %v6096_v36 }
 0x5bc   :  { %v2025_v61 = vmul.f32 0.5, %v2024_v4  ;;  %2646 = vadd.xlane.f32.xlu1 %v2645_v56  ;;  %2472 = vadd.xlane.f32.xlu2 %v2471_v44  ;;  %v2474_v4 = vsel %vm58_vm0, %v6123_v11, 0.0  ;;  %v2389_v23 = vmul.f32 %v4043_v3, %v2318_v8 }
 0x5bd   :  { %v1674_v34 = vpop.xlane.xlu2 %1673  ;;  %v2122_v53 = vmul.f32 %v5334_v20, %v2089_v41  ;;  %v2458_v21 = vpop.xlane.xlu0 %2457  ;;  %3324 = vmatpush.msrb.mxu3 %v3213_v26 }
 0x5be   :  { %v2026_v22 = vsub.f32 1.5, %v2025_v61  ;;  %v1708_v49 = vmul.f32 %v1674_v34, %v4255_v2  ;;  %v2542_v18 = vmul.f32 %v2458_v21, %v4255_v2 }
 0x5bf   :  { %v6120_v15 = vadd.f32 %v5343_v9, %v2122_v53  ;;  %3325 = vmatpush.msrb.mxu3 %v3212_v52 }
 0x5c0   :  { %v2027_v35 = vmul.f32 %v3927_v58, %v2026_v22  ;;  %v6126_v1 = vadd.f32 1e-05, %v1708_v49  ;;  %v3929_v12 = vpop.eup %3928  ;;  %v6134_v33 = vsub.f32 %v5956_v7, %v2542_v18  ;;  %v2321_v18 = vadd.f32 %v2320_v62, %v5760_v50 }
 0x5c1   :  { %3754 = vmatmul.msk.f32.gmra.mxu2 %vm58_vm0, %v6120_v15  ;;  %v2033_v60 = vmul.f32 %v3929_v12, %v6096_v36  ;;  %3326 = vmatpush.msrb.mxu3 %v3211_v40  ;;  %vm2039_vm5 = vweird.f32 %v3929_v12 }
 0x5c2   :  { %v2031_v5 = vsel %vm2030_vm4, %v3927_v58, %v2027_v35  ;;  %3930 = vrsqrt.f32 %v6126_v1  ;;  %v2606_v7 = vmul.f32 %v6134_v33, %v6134_v33  ;;  %vm2040_vm7 = vmor %vm2038_vm6, %vm2039_vm5  ;;  %vm2048_vm9 = vweird.f32 %v6126_v1 }
 0x5c3   :  { %v2090_v63 = vmul.f32 %v2031_v5, %v5888_v59  ;;  %v2034_v44 = vmul.f32 %v3929_v12, %v2033_v60  ;;  %v6169_v5 = vadd.f32 %v2389_v23, %v5682_v38  ;;  %v2323_v60 = vpop.f32.mrf.mxu2 }
 0x5c4   :  { %2475 = vadd.xlane.f32.xlu1 %v2474_v4  ;;  %v1677_v58 = vpop.xlane.xlu1 %1676  ;;  %v2648_v59 = vsel %vm58_vm0, %v2606_v7, 0.0  ;;  %v4044_v4 = vld [vmem:[%s6934_s0 + $0x68] sm:$0xff] }
 0x5c5   :  { %v1709_v41 = vmul.f32 %v1677_v58, %v4255_v2  ;;  %v2635_v56 = vpop.xlane.xlu2 %2634  ;;  %v2123_v61 = vmul.f32 %v5334_v20, %v2090_v63  ;;  %v2035_v14 = vmul.f32 0.5, %v2034_v44  ;;  %2649 = vadd.xlane.f32.xlu0 %v2648_v59  ;;  %v2461_v53 = vpop.xlane.xlu0 %2460  ;;  %v2390_v7 = vmul.f32 %v4044_v4, %v2321_v18 }
 0x5c6   :  { %v2729_v34 = vmul.f32 %v2635_v56, %v4255_v2  ;;  %v2543_v49 = vmul.f32 %v2461_v53, %v4255_v2  ;;  %v2324_v56 = vadd.f32 %v2323_v60, %v5760_v50 }
 0x5c7   :  { %v6155_v22 = vadd.f32 1e-05, %v1709_v41  ;;  %v6159_v21 = vadd.f32 %v5343_v9, %v2123_v61  ;;  %v2036_v35 = vsub.f32 1.5, %v2035_v14 }
 0x5c8   :  { %v3931_v26 = vpop.eup %3930  ;;  %v6162_v52 = vadd.f32 1e-05, %v2729_v34  ;;  %v6174_v62 = vsub.f32 %v5980_v51, %v2543_v49  ;;  %v2477_v51 = vsel %vm58_vm0, %v6169_v5, 0.0 }
 0x5c9   :  { %v2043_v8 = vmul.f32 %v3931_v26, %v6126_v1  ;;  %3932 = vrsqrt.f32 %v6155_v22  ;;  %3755 = vmatmul.msk.f32.gmra.mxu2 %vm58_vm0, %v6159_v21  ;;  %v2037_v40 = vmul.f32 %v3929_v12, %v2036_v35  ;;  %vm2049_vm8 = vweird.f32 %v3931_v26 }
 0x5ca   :  { %3934 = vrsqrt.f32 %v6162_v52  ;;  %v2607_v38 = vmul.f32 %v6174_v62, %v6174_v62  ;;  %v6196_v35 = vadd.f32 %v2390_v7, %v5708_v17  ;;  %vm2050_vm10 = vmor %vm2048_vm9, %vm2049_vm8  ;;  %vm2058_vm13 = vweird.f32 %v6155_v22 }
 0x5cb   :  { %v2044_v63 = vmul.f32 %v3931_v26, %v2043_v8  ;;  %v2041_v44 = vsel %vm2040_vm7, %v3929_v12, %v2037_v40  ;;  %v4045_v40 = vld [vmem:[%s6934_s0 + $0x70] sm:$0xff]  ;;  %v2326_v1 = vpop.f32.mrf.mxu2  ;;  %vm2799_vm15 = vweird.f32 %v6162_v52 }
 0x5cc   :  { %v2638_v58 = vpop.xlane.xlu1 %2637  ;;  %v2091_v3 = vmul.f32 %v2041_v44, %v5924_v24  ;;  %v2651_v12 = vsel %vm58_vm0, %v2607_v38, 0.0 }
 0x5cd   :  { %v2045_v36 = vmul.f32 0.5, %v2044_v63  ;;  %v2730_v23 = vmul.f32 %v2638_v58, %v4255_v2  ;;  %v2464_v41 = vpop.xlane.xlu2 %2463  ;;  %2478 = vadd.xlane.f32.xlu0 %v2477_v51  ;;  %2652 = vadd.xlane.f32.xlu2 %v2651_v12  ;;  %v2391_v63 = vmul.f32 %v4045_v40, %v2324_v56  ;;  %v2480_v51 = vsel %vm58_vm0, %v6196_v35, 0.0 }
 0x5ce   :  { %v2544_v59 = vmul.f32 %v2464_v41, %v4255_v2  ;;  %v2124_v24 = vmul.f32 %v5334_v20, %v2091_v3  ;;  %v2327_v12 = vadd.f32 %v2326_v1, %v5760_v50 }
 0x5cf   :  { %v3933_v61 = vpop.eup %3932  ;;  %v2046_v14 = vsub.f32 1.5, %v2045_v36  ;;  %v6188_v34 = vadd.f32 1e-05, %v2730_v23 }
 0x5d0   :  { %v3935_v53 = vpop.eup %3934  ;;  %v2053_v49 = vmul.f32 %v3933_v61, %v6155_v22  ;;  %v6193_v18 = vsub.f32 %v6011_v27, %v2544_v59  ;;  %v6205_v27 = vadd.f32 %v5343_v9, %v2124_v24  ;;  %vm2059_vm11 = vweird.f32 %v3933_v61 }
 0x5d1   :  { %v2047_v8 = vmul.f32 %v3931_v26, %v2046_v14  ;;  %v2794_v60 = vmul.f32 %v3935_v53, %v6162_v52  ;;  %3936 = vrsqrt.f32 %v6188_v34  ;;  %vm2800_vm12 = vweird.f32 %v3935_v53  ;;  %vm2060_vm14 = vmor %vm2058_vm13, %vm2059_vm11 }
 0x5d2   :  { %v2054_v4 = vmul.f32 %v3933_v61, %v2053_v49  ;;  %v2608_v17 = vmul.f32 %v6193_v18, %v6193_v18  ;;  %3756 = vmatmul.msk.f32.gmra.mxu2 %vm58_vm0, %v6205_v27  ;;  %vm2801_vm1 = vmor %vm2799_vm15, %vm2800_vm12  ;;  %vm2809_vm3 = vweird.f32 %v6188_v34 }
 0x5d3   :  { %v2051_v7 = vsel %vm2050_vm10, %v3931_v26, %v2047_v8  ;;  %v2795_v44 = vmul.f32 %v3935_v53, %v2794_v60 }
 0x5d4   :  { %v2092_v58 = vmul.f32 %v2051_v7, %v5949_v16  ;;  %v2055_v38 = vmul.f32 0.5, %v2054_v4  ;;  %v2467_v3 = vpop.xlane.xlu1 %2466  ;;  %v2654_v36 = vsel %vm58_vm0, %v2608_v17, 0.0  ;;  %v6218_v16 = vadd.f32 %v2391_v63, %v5738_v30  ;;  %v4046_v4 = vld [vmem:[%s6935_s2 + $0x8] sm:$0x7]  ;;  %v4047_v17 = vld [vmem:[%s6934_s0 + $0x78] sm:$0xff] }
 0x5d5   :  { %v2796_v23 = vmul.f32 0.5, %v2795_v44  ;;  %v2545_v41 = vmul.f32 %v2467_v3, %v4255_v2  ;;  %2655 = vadd.xlane.f32.xlu1 %v2654_v36  ;;  %2481 = vadd.xlane.f32.xlu2 %v2480_v51  ;;  %v6235_v22 = vperm.slane %v4046_v4, 1  ;;  %v2392_v7 = vmul.f32 %v4047_v17, %v2327_v12 }
 0x5d6   :  { %v2056_v56 = vsub.f32 1.5, %v2055_v38  ;;  %v2125_v26 = vmul.f32 %v5334_v20, %v2092_v58  ;;  %v2483_v38 = vsel %vm58_vm0, %v6218_v16, 0.0  ;;  %v6247_v3 = vperm.slane %v4046_v4, 2 }
 0x5d7   :  { %v3937_v59 = vpop.eup %3936  ;;  %v2797_v14 = vsub.f32 1.5, %v2796_v23  ;;  %v6222_v24 = vsub.f32 %v6029_v29, %v2545_v41 }
 0x5d8   :  { %v2057_v49 = vmul.f32 %v3933_v61, %v2056_v56  ;;  %v2804_v8 = vmul.f32 %v3937_v59, %v6188_v34  ;;  %v6227_v60 = vadd.f32 %v5343_v9, %v2125_v26  ;;  %vm2810_vm2 = vweird.f32 %v3937_v59  ;;  %v2329_v34 = vpop.f32.mrf.mxu2 }
 0x5d9   :  { %v2798_v30 = vmul.f32 %v3935_v53, %v2797_v14  ;;  %v2609_v40 = vmul.f32 %v6222_v24, %v6222_v24  ;;  %vm2811_vm4 = vmor %vm2809_vm3, %vm2810_vm2 }
 0x5da   :  { %v2061_v63 = vsel %vm2060_vm14, %v3933_v61, %v2057_v49  ;;  %v2805_v29 = vmul.f32 %v3937_v59, %v2804_v8  ;;  %3757 = vmatmul.msk.f32.gmra.mxu2 %vm58_vm0, %v6227_v60 }
 0x5db   :  { %v2093_v44 = vmul.f32 %v2061_v63, %v5971_v54  ;;  %v2802_v52 = vsel %vm2801_vm1, %v3935_v53, %v2798_v30  ;;  %v2657_v1 = vsel %vm58_vm0, %v2609_v40, 0.0  ;;  %v6252_v53 = vadd.f32 %v2392_v7, %v5775_v42  ;;  %v3471_v7 = vld [vmem:[%s6937_s4 + $0x78] sm:$0xff] }
 0x5dc   :  { %v3113_v61 = vmul.f32 %v2802_v52, %v5977_v45  ;;  %v2806_v58 = vmul.f32 0.5, %v2805_v29  ;;  %2658 = vadd.xlane.f32.xlu0 %v2657_v1  ;;  %v2330_v29 = vadd.f32 %v2329_v34, %v5760_v50  ;;  %3472 = vmatpush.msrb.mxu0 %v3471_v7  ;;  %v3470_v1 = vld [vmem:[%s6937_s4 + $0x70] sm:$0xff] }
 0x5dd   :  { %2484 = vadd.xlane.f32.xlu1 %v2483_v38  ;;  %v2126_v36 = vmul.f32 %v5334_v20, %v2093_v44  ;;  %v2486_v20 = vsel %vm58_vm0, %v6252_v53, 0.0 }
 0x5de   :  { %v2807_v23 = vsub.f32 1.5, %v2806_v58  ;;  %v3146_v54 = vmul.f32 %v6235_v22, %v3113_v61  ;;  %3473 = vmatpush.msrb.mxu0 %v3470_v1 }
 0x5df   :  { %v6256_v41 = vadd.f32 %v5343_v9, %v2126_v36 }
 0x5e0   :  { %v2808_v45 = vmul.f32 %v3937_v59, %v2807_v23  ;;  %v3179_v51 = vadd.f32 %v6247_v3, %v3146_v54  ;;  %v2332_v49 = vpop.f32.mrf.mxu2  ;;  %v3469_v23 = vld [vmem:[%s6937_s4 + $0x68] sm:$0xff] }
 0x5e1   :  { %3474 = vmatpush.msrb.mxu0 %v3469_v23  ;;  %v3464_v23 = vld [vmem:[%s6937_s4 + $0x40] sm:$0xff] }
 0x5e2   :  { %v2812_v56 = vsel %vm2811_vm4, %v3937_v59, %v2808_v45  ;;  %3759 = vmatmul.msk.f32.vlgmr.msrb.gmra.mxu3 %vm58_vm0, %v3179_v51  ;;  %3758 = vmatmul.msk.f32.gmra.mxu2 %vm58_vm0, %v6256_v41 }
 0x5e3   :  { %v3114_v26 = vmul.f32 %v2812_v56, %v6004_v19 }
 0x5e4   :  { %2487 = vadd.xlane.f32.xlu0 %v2486_v20 }
 0x5e5   :  { %v3147_v42 = vmul.f32 %v6235_v22, %v3114_v26  ;;  %v3468_v26 = vld [vmem:[%s6937_s4 + $0x60] sm:$0xff] }
 0x5e6   :  { %3475 = vmatpush.msrb.mxu0 %v3468_v26 }
 0x5e7   :  { %v3180_v9 = vadd.f32 %v6247_v3, %v3147_v42  ;;  %v2333_v42 = vadd.f32 %v2332_v49, %v5760_v50 }
 0x5e8   :  { %v2335_v38 = vpop.f32.mrf.mxu2 }
 0x5ea   :  { %3760 = vmatmul.msk.f32.gmra.mxu3 %vm58_vm0, %v3180_v9 }
 0x61f   :  { %v2641_v12 = vpop.xlane.xlu0 %2640 }
 0x620   :  { %v2731_v59 = vmul.f32 %v2641_v12, %v4255_v2 }
 0x622   :  { %v2763_v14 = vadd.f32 1e-05, %v2731_v59 }
 0x624   :  { %3938 = vrsqrt.f32 %v2763_v14  ;;  %vm2819_vm6 = vweird.f32 %v2763_v14 }
 0x627   :  { %v2644_v8 = vpop.xlane.xlu2 %2643  ;;  %v2470_v30 = vpop.xlane.xlu0 %2469 }
 0x628   :  { %v2732_v19 = vmul.f32 %v2644_v8, %v4255_v2  ;;  %v2546_v40 = vmul.f32 %v2470_v30, %v4255_v2  ;;  %v3467_v30 = vld [vmem:[%s6937_s4 + $0x58] sm:$0xff] }
 0x629   :  { %3476 = vmatpush.msrb.mxu0 %v3467_v30  ;;  %v3463_v30 = vld [vmem:[%s6937_s4 + $0x38] sm:$0xff] }
 0x62a   :  { %v3939_v63 = vpop.eup %3938  ;;  %v6272_v4 = vadd.f32 1e-05, %v2732_v19  ;;  %v6275_v17 = vsub.f32 %v6066_v46, %v2546_v40  ;;  %v4048_v46 = vld [vmem:[%s6934_s0 + $0x80] sm:$0xff] }
 0x62b   :  { %v2814_v44 = vmul.f32 %v3939_v63, %v2763_v14  ;;  %v2393_v58 = vmul.f32 %v4048_v46, %v2330_v29  ;;  %vm2820_vm5 = vweird.f32 %v3939_v63 }
 0x62c   :  { %3940 = vrsqrt.f32 %v6272_v4  ;;  %v2610_v52 = vmul.f32 %v6275_v17, %v6275_v17  ;;  %vm2821_vm7 = vmor %vm2819_vm6, %vm2820_vm5  ;;  %vm2829_vm9 = vweird.f32 %v6272_v4 }
 0x62d   :  { %v2815_v61 = vmul.f32 %v3939_v63, %v2814_v44  ;;  %v6305_v8 = vadd.f32 %v2393_v58, %v5802_v57  ;;  %v3466_v57 = vld [vmem:[%s6937_s4 + $0x50] sm:$0xff] }
 0x62e   :  { %v2660_v36 = vsel %vm58_vm0, %v2610_v52, 0.0  ;;  %3477 = vmatpush.msrb.mxu0 %v3466_v57 }
 0x62f   :  { %v2816_v54 = vmul.f32 0.5, %v2815_v61  ;;  %v2647_v45 = vpop.xlane.xlu1 %2646  ;;  %v2473_v51 = vpop.xlane.xlu2 %2472  ;;  %2661 = vadd.xlane.f32.xlu2 %v2660_v36  ;;  %v2489_v52 = vsel %vm58_vm0, %v6305_v8, 0.0  ;;  %v3465_v61 = vld [vmem:[%s6937_s4 + $0x48] sm:$0xff] }
 0x630   :  { %v2733_v56 = vmul.f32 %v2647_v45, %v4255_v2  ;;  %v2547_v20 = vmul.f32 %v2473_v51, %v4255_v2  ;;  %3478 = vmatpush.msrb.mxu0 %v3465_v61 }
 0x631   :  { %v2817_v9 = vsub.f32 1.5, %v2816_v54  ;;  %v2338_v54 = vpop.f32.mrf.mxu2 }
 0x632   :  { %v3941_v34 = vpop.eup %3940  ;;  %v6299_v12 = vadd.f32 1e-05, %v2733_v56  ;;  %v6302_v59 = vsub.f32 %v6084_v55, %v2547_v20  ;;  %v4049_v55 = vld [vmem:[%s6934_s0 + $0x88] sm:$0xff]  ;;  %v2336_v20 = vadd.f32 %v2335_v38, %v5760_v50  ;;  %3479 = vmatpush.msrb.mxu0 %v3464_v23  ;;  %v3462_v38 = vld [vmem:[%s6937_s4 + $0x30] sm:$0xff]  ;;  %v3459_v23 = vld [vmem:[%s6937_s4 + $0x18] sm:$0xff] }
 0x633   :  { %v2818_v19 = vmul.f32 %v3939_v63, %v2817_v9  ;;  %v2824_v49 = vmul.f32 %v3941_v34, %v6272_v4  ;;  %v2394_v29 = vmul.f32 %v4049_v55, %v2333_v42  ;;  %vm2830_vm8 = vweird.f32 %v3941_v34  ;;  %v4050_v55 = vld [vmem:[%s6934_s0 + $0x90] sm:$0xff] }
 0x634   :  { %3942 = vrsqrt.f32 %v6299_v12  ;;  %v2611_v40 = vmul.f32 %v6302_v59, %v6302_v59  ;;  %vm2831_vm10 = vmor %vm2829_vm9, %vm2830_vm8  ;;  %3480 = vmatpush.msrb.mxu0 %v3463_v30  ;;  %vm2839_vm12 = vweird.f32 %v6299_v12 }
 0x635   :  { %v2822_v7 = vsel %vm2821_vm7, %v3939_v63, %v2818_v19  ;;  %v2825_v14 = vmul.f32 %v3941_v34, %v2824_v49  ;;  %v6333_v51 = vadd.f32 %v2394_v29, %v5819_v47  ;;  %v2395_v29 = vmul.f32 %v4050_v55, %v2336_v20 }
 0x636   :  { %v2663_v44 = vsel %vm58_vm0, %v2611_v40, 0.0  ;;  %v3115_v1 = vmul.f32 %v2822_v7, %v6043_v25  ;;  %3481 = vmatpush.msrb.mxu0 %v3462_v38  ;;  %v3457_v38 = vld [vmem:[%s6937_s4 + $0x8] sm:$0xff] }
 0x637   :  { %v2826_v46 = vmul.f32 0.5, %v2825_v14  ;;  %v2476_v58 = vpop.xlane.xlu1 %2475  ;;  %2664 = vadd.xlane.f32.xlu1 %v2663_v44  ;;  %2490 = vadd.xlane.f32.xlu2 %v2489_v52  ;;  %v2492_v4 = vsel %vm58_vm0, %v6333_v51, 0.0 }
 0x638   :  { %v2548_v36 = vmul.f32 %v2476_v58, %v4255_v2  ;;  %v3148_v63 = vmul.f32 %v6235_v22, %v3115_v1  ;;  %v2650_v25 = vpop.xlane.xlu0 %2649  ;;  %v3460_v1 = vld [vmem:[%s6937_s4 + $0x20] sm:$0xff] }
 0x639   :  { %v2827_v45 = vsub.f32 1.5, %v2826_v46  ;;  %v2734_v42 = vmul.f32 %v2650_v25, %v4255_v2 }
 0x63a   :  { %v3943_v56 = vpop.eup %3942  ;;  %v6337_v26 = vsub.f32 %v6123_v11, %v2548_v36  ;;  %v3181_v9 = vadd.f32 %v6247_v3, %v3148_v63  ;;  %v6372_v63 = vadd.f32 %v2395_v29, %v5863_v6  ;;  %v3458_v6 = vld [vmem:[%s6937_s4 + $0x10] sm:$0xff] }
 0x63b   :  { %v2828_v19 = vmul.f32 %v3941_v34, %v2827_v45  ;;  %v2834_v47 = vmul.f32 %v3943_v56, %v6299_v12  ;;  %v6346_v49 = vadd.f32 1e-05, %v2734_v42  ;;  %vm2840_vm11 = vweird.f32 %v3943_v56  ;;  %v2341_v45 = vpop.f32.mrf.mxu2 }
 0x63c   :  { %3761 = vmatmul.msk.f32.gmra.mxu3 %vm58_vm0, %v3181_v9  ;;  %v2612_v11 = vmul.f32 %v6337_v26, %v6337_v26  ;;  %v2339_v9 = vadd.f32 %v2338_v54, %v5760_v50  ;;  %vm2841_vm13 = vmor %vm2839_vm12, %vm2840_vm11 }
 0x63d   :  { %v2832_v40 = vsel %vm2831_vm10, %v3941_v34, %v2828_v19  ;;  %v2835_v57 = vmul.f32 %v3943_v56, %v2834_v47  ;;  %3944 = vrsqrt.f32 %v6346_v49  ;;  %v3461_v34 = vld [vmem:[%s6937_s4 + $0x28] sm:$0xff]  ;;  %vm2849_vm15 = vweird.f32 %v6346_v49 }
 0x63e   :  { %v2666_v7 = vsel %vm58_vm0, %v2612_v11, 0.0  ;;  %v3116_v14 = vmul.f32 %v2832_v40, %v6060_v48  ;;  %3482 = vmatpush.msrb.mxu0 %v3461_v34  ;;  %v2495_v11 = vsel %vm58_vm0, %v6372_v63, 0.0 }
 0x63f   :  { %v2836_v44 = vmul.f32 0.5, %v2835_v57  ;;  %2493 = vadd.xlane.f32.xlu1 %v2492_v4  ;;  %2667 = vadd.xlane.f32.xlu0 %v2666_v7 }
 0x640   :  { %v3149_v52 = vmul.f32 %v6235_v22, %v3116_v14  ;;  %v2479_v46 = vpop.xlane.xlu0 %2478  ;;  %v2653_v58 = vpop.xlane.xlu2 %2652  ;;  %3483 = vmatpush.msrb.mxu0 %v3460_v1 }
 0x641   :  { %v2837_v61 = vsub.f32 1.5, %v2836_v44  ;;  %v2549_v48 = vmul.f32 %v2479_v46, %v4255_v2  ;;  %v2735_v20 = vmul.f32 %v2653_v58, %v4255_v2  ;;  %v2342_v46 = vadd.f32 %v2341_v45, %v5760_v50 }
 0x642   :  { %v3182_v36 = vadd.f32 %v6247_v3, %v3149_v52  ;;  %3484 = vmatpush.msrb.mxu0 %v3459_v23 }
 0x643   :  { %v2838_v25 = vmul.f32 %v3943_v56, %v2837_v61  ;;  %v3945_v42 = vpop.eup %3944  ;;  %v6381_v30 = vsub.f32 %v6169_v5, %v2549_v48  ;;  %v6388_v12 = vadd.f32 1e-05, %v2735_v20 }
 0x644   :  { %3762 = vmatmul.msk.f32.gmra.mxu3 %vm58_vm0, %v3182_v36  ;;  %v2844_v47 = vmul.f32 %v3945_v42, %v6346_v49  ;;  %3485 = vmatpush.msrb.mxu0 %v3458_v6  ;;  %vm2850_vm14 = vweird.f32 %v3945_v42  ;;  %v2344_v36 = vpop.f32.mrf.mxu2 }
 0x645   :  { %v2842_v19 = vsel %vm2841_vm13, %v3943_v56, %v2838_v25  ;;  %v2613_v54 = vmul.f32 %v6381_v30, %v6381_v30  ;;  %3946 = vrsqrt.f32 %v6388_v12  ;;  %v4051_v56 = vld [vmem:[%s6934_s0 + $0x98] sm:$0xff]  ;;  %vm2851_vm1 = vmor %vm2849_vm15, %vm2850_vm14  ;;  %vm2859_vm3 = vweird.f32 %v6388_v12 }
 0x646   :  { %v3117_v5 = vmul.f32 %v2842_v19, %v6088_v39  ;;  %v2845_v40 = vmul.f32 %v3945_v42, %v2844_v47  ;;  %v2396_v57 = vmul.f32 %v4051_v56, %v2339_v9  ;;  %3486 = vmatpush.msrb.mxu0 %v3457_v38  ;;  %v3456_v39 = vld [vmem:[%s6937_s4] sm:$0xff] }
 0x647   :  { %2496 = vadd.xlane.f32.xlu0 %v2495_v11  ;;  %v2669_v55 = vsel %vm58_vm0, %v2613_v54, 0.0 }
 0x648   :  { %v2656_v4 = vpop.xlane.xlu1 %2655  ;;  %v3150_v29 = vmul.f32 %v6235_v22, %v3117_v5  ;;  %v2846_v7 = vmul.f32 0.5, %v2845_v40  ;;  %2670 = vadd.xlane.f32.xlu2 %v2669_v55  ;;  %v2482_v34 = vpop.xlane.xlu2 %2481  ;;  %3487 = vmatpush.msrb.mxu0 %v3456_v39  ;;  %v6415_v58 = vadd.f32 %v2396_v57, %v5892_v37 }
 0x649   :  { %v2736_v14 = vmul.f32 %v2656_v4, %v4255_v2  ;;  %v2550_v61 = vmul.f32 %v2482_v34, %v4255_v2  ;;  %v2345_v4 = vadd.f32 %v2344_v36, %v5760_v50 }
 0x64a   :  { %v3183_v44 = vadd.f32 %v6247_v3, %v3150_v29  ;;  %v2847_v52 = vsub.f32 1.5, %v2846_v7  ;;  %v2498_v47 = vsel %vm58_vm0, %v6415_v58, 0.0 }
 0x64b   :  { %v6409_v1 = vadd.f32 1e-05, %v2736_v14  ;;  %v3947_v48 = vpop.eup %3946  ;;  %v6420_v25 = vsub.f32 %v6196_v35, %v2550_v61  ;;  %v4052_v35 = vld [vmem:[%s6934_s0 + $0xa0] sm:$0xff] }
 0x64c   :  { %3763 = vmatmul.msk.f32.gmra.mxu3 %vm58_vm0, %v3183_v44  ;;  %v2848_v23 = vmul.f32 %v3945_v42, %v2847_v52  ;;  %v2854_v20 = vmul.f32 %v3947_v48, %v6388_v12  ;;  %v2397_v54 = vmul.f32 %v4052_v35, %v2342_v46  ;;  %vm2860_vm2 = vweird.f32 %v3947_v48  ;;  %v2347_v61 = vpop.f32.mrf.mxu2 }
 0x64d   :  { %3948 = vrsqrt.f32 %v6409_v1  ;;  %v2614_v45 = vmul.f32 %v6420_v25, %v6420_v25  ;;  %vm2861_vm4 = vmor %vm2859_vm3, %vm2860_vm2  ;;  %vm2869_vm6 = vweird.f32 %v6409_v1 }
 0x64e   :  { %v2852_v9 = vsel %vm2851_vm1, %v3945_v42, %v2848_v23  ;;  %v2855_v37 = vmul.f32 %v3947_v48, %v2854_v20  ;;  %v6444_v14 = vadd.f32 %v2397_v54, %v5914_v31 }
 0x64f   :  { %v2659_v6 = vpop.xlane.xlu0 %2658  ;;  %v3118_v11 = vmul.f32 %v2852_v9, %v6134_v33  ;;  %v2672_v5 = vsel %vm58_vm0, %v2614_v45, 0.0 }
 0x650   :  { %v2485_v19 = vpop.xlane.xlu1 %2484  ;;  %v2737_v49 = vmul.f32 %v2659_v6, %v4255_v2  ;;  %2499 = vadd.xlane.f32.xlu2 %v2498_v47  ;;  %v2856_v38 = vmul.f32 0.5, %v2855_v37  ;;  %2673 = vadd.xlane.f32.xlu1 %v2672_v5  ;;  %v2501_v12 = vsel %vm58_vm0, %v6444_v14, 0.0  ;;  %v2348_v6 = vadd.f32 %v2347_v61, %v5760_v50 }
 0x651   :  { %v2551_v42 = vmul.f32 %v2485_v19, %v4255_v2  ;;  %v3151_v56 = vmul.f32 %v6235_v22, %v3118_v11 }
 0x652   :  { %v2769_v40 = vadd.f32 1e-05, %v2737_v49  ;;  %v2857_v55 = vsub.f32 1.5, %v2856_v38 }
 0x653   :  { %v3949_v57 = vpop.eup %3948  ;;  %v6437_v33 = vsub.f32 %v6218_v16, %v2551_v42  ;;  %v3184_v39 = vadd.f32 %v6247_v3, %v3151_v56  ;;  %v4053_v16 = vld [vmem:[%s6934_s0 + $0xa8] sm:$0xff] }
 0x654   :  { %v2864_v29 = vmul.f32 %v3949_v57, %v6409_v1  ;;  %3950 = vrsqrt.f32 %v2769_v40  ;;  %v2858_v34 = vmul.f32 %v3947_v48, %v2857_v55  ;;  %v2398_v52 = vmul.f32 %v4053_v16, %v2345_v4 }
 0x655   :  { %v2615_v7 = vmul.f32 %v6437_v33, %v6437_v33  ;;  %3764 = vmatmul.msk.f32.gmra.mxu3 %vm58_vm0, %v3184_v39  ;;  %vm2870_vm5 = vweird.f32 %v3949_v57  ;;  %vm2879_vm9 = vweird.f32 %v2769_v40 }
 0x656   :  { %v2865_v44 = vmul.f32 %v3949_v57, %v2864_v29  ;;  %v2862_v23 = vsel %vm2861_vm4, %v3947_v48, %v2858_v34  ;;  %v6462_v49 = vadd.f32 %v2398_v52, %v5945_v0  ;;  %vm2871_vm7 = vmor %vm2869_vm6, %vm2870_vm5 }
 0x657   :  { %v2675_v46 = vsel %vm58_vm0, %v2615_v7, 0.0  ;;  %v2488_v36 = vpop.xlane.xlu0 %2487  ;;  %v3119_v9 = vmul.f32 %v2862_v23, %v6174_v62 }
 0x658   :  { %v2866_v20 = vmul.f32 0.5, %v2865_v44  ;;  %2676 = vadd.xlane.f32.xlu0 %v2675_v46  ;;  %v2552_v31 = vmul.f32 %v2488_v36, %v4255_v2  ;;  %2502 = vadd.xlane.f32.xlu1 %v2501_v12  ;;  %v2504_v1 = vsel %vm58_vm0, %v6462_v49, 0.0  ;;  %v2350_v46 = vpop.f32.mrf.mxu2 }
 0x659   :  { %v3152_v48 = vmul.f32 %v6235_v22, %v3119_v9 }
 0x65a   :  { %v3951_v45 = vpop.eup %3950  ;;  %v2867_v37 = vsub.f32 1.5, %v2866_v20  ;;  %v6458_v19 = vsub.f32 %v6252_v53, %v2552_v31  ;;  %v4054_v53 = vld [vmem:[%s6934_s0 + $0xb0] sm:$0xff] }
 0x65b   :  { %v2874_v47 = vmul.f32 %v3951_v45, %v2769_v40  ;;  %v3185_v54 = vadd.f32 %v6247_v3, %v3152_v48  ;;  %v2399_v42 = vmul.f32 %v4054_v53, %v2348_v6  ;;  %vm2880_vm8 = vweird.f32 %v3951_v45 }
 0x65c   :  { %v2868_v11 = vmul.f32 %v3949_v57, %v2867_v37  ;;  %v2616_v62 = vmul.f32 %v6458_v19, %v6458_v19  ;;  %vm2881_vm10 = vmor %vm2879_vm9, %vm2880_vm8  ;;  %v2351_v37 = vadd.f32 %v2350_v46, %v5760_v50 }
 0x65d   :  { %v2875_v35 = vmul.f32 %v3951_v45, %v2874_v47  ;;  %3765 = vmatmul.msk.f32.gmra.mxu3 %vm58_vm0, %v3185_v54  ;;  %v6478_v29 = vadd.f32 %v2399_v42, %v5984_v28  ;;  %v4055_v54 = vld [vmem:[%s6934_s0 + $0xb8] sm:$0xff] }
 0x65e   :  { %v2872_v5 = vsel %vm2871_vm7, %v3949_v57, %v2868_v11  ;;  %v2678_v38 = vsel %vm58_vm0, %v2616_v62, 0.0  ;;  %v2400_v53 = vmul.f32 %v4055_v54, %v2351_v37 }
 0x65f   :  { %v2876_v0 = vmul.f32 0.5, %v2875_v35  ;;  %2679 = vadd.xlane.f32.xlu2 %v2678_v38  ;;  %v3120_v56 = vmul.f32 %v2872_v5, %v6193_v18  ;;  %v2507_v16 = vsel %vm58_vm0, %v6478_v29, 0.0 }
 0x660   :  { %2505 = vadd.xlane.f32.xlu0 %v2504_v1 }
 0x661   :  { %v2877_v4 = vsub.f32 1.5, %v2876_v0  ;;  %v3153_v55 = vmul.f32 %v6235_v22, %v3120_v56 }
 0x663   :  { %v2878_v57 = vmul.f32 %v3951_v45, %v2877_v4  ;;  %v3186_v39 = vadd.f32 %v6247_v3, %v3153_v55 }
 0x665   :  { %v2882_v7 = vsel %vm2881_vm10, %v3951_v45, %v2878_v57  ;;  %v3328_v34 = vpop.f32.mrf.mxu3  ;;  %3766 = vmatmul.msk.f32.gmra.mxu3 %vm58_vm0, %v3186_v39 }
 0x666   :  { %v3424_v44 = vmax.f32 %v3328_v34, 0.0  ;;  %v3121_v18 = vmul.f32 %v2882_v7, %v6222_v24  ;;  %v2353_v24 = vpop.f32.mrf.mxu2  ;;  %v6510_v34 = vadd.f32 %v2400_v53, %v6008_v10 }
 0x667   :  { %2508 = vadd.xlane.f32.xlu2 %v2507_v16  ;;  %v2354_v57 = vadd.f32 %v2353_v24, %v5760_v50 }
 0x668   :  { %3488 = vmatmul.f32.vlgmr.msrb.gmra.mxu0 %v3424_v44  ;;  %v3154_v28 = vmul.f32 %v6235_v22, %v3121_v18  ;;  %v2510_v10 = vsel %vm58_vm0, %v6510_v34, 0.0 }
 0x66a   :  { %v3187_v52 = vadd.f32 %v6247_v3, %v3154_v28 }
 0x66d   :  { %v3331_v40 = vpop.f32.mrf.mxu3  ;;  %3767 = vmatmul.msk.f32.gmra.mxu3 %vm58_vm0, %v3187_v52 }
 0x66e   :  { %v3425_v61 = vmax.f32 %v3331_v40, 0.0  ;;  %v2356_v42 = vpop.f32.mrf.mxu2 }
 0x670   :  { %3491 = vmatmul.f32.gmra.mxu0 %v3425_v61 }
 0x6a2   :  { %v2662_v36 = vpop.xlane.xlu2 %2661 }
 0x6a3   :  { %v2738_v23 = vmul.f32 %v2662_v36, %v4255_v2 }
 0x6a5   :  { %v2770_v20 = vadd.f32 1e-05, %v2738_v23 }
 0x6a7   :  { %3952 = vrsqrt.f32 %v2770_v20  ;;  %vm2889_vm12 = vweird.f32 %v2770_v20 }
 0x6aa   :  { %v2665_v31 = vpop.xlane.xlu1 %2664  ;;  %v2491_v12 = vpop.xlane.xlu2 %2490 }
 0x6ab   :  { %v2739_v9 = vmul.f32 %v2665_v31, %v4255_v2  ;;  %v2553_v45 = vmul.f32 %v2491_v12, %v4255_v2 }
 0x6ad   :  { %v3953_v6 = vpop.eup %3952  ;;  %v2771_v47 = vadd.f32 1e-05, %v2739_v9  ;;  %v6493_v48 = vsub.f32 %v6305_v8, %v2553_v45 }
 0x6ae   :  { %v2884_v11 = vmul.f32 %v3953_v6, %v2770_v20  ;;  %vm2890_vm11 = vweird.f32 %v3953_v6  ;;  %v2359_v20 = vpop.f32.mrf.mxu2 }
 0x6af   :  { %3954 = vrsqrt.f32 %v2771_v47  ;;  %v2617_v62 = vmul.f32 %v6493_v48, %v6493_v48  ;;  %vm2891_vm13 = vmor %vm2889_vm12, %vm2890_vm11  ;;  %vm2899_vm15 = vweird.f32 %v2771_v47 }
 0x6b0   :  { %v2885_v35 = vmul.f32 %v3953_v6, %v2884_v11 }
 0x6b1   :  { %v2681_v5 = vsel %vm58_vm0, %v2617_v62, 0.0  ;;  %v2357_v62 = vadd.f32 %v2356_v42, %v5760_v50 }
 0x6b2   :  { %v2886_v38 = vmul.f32 0.5, %v2885_v35  ;;  %v2494_v0 = vpop.xlane.xlu1 %2493  ;;  %2682 = vadd.xlane.f32.xlu1 %v2681_v5  ;;  %v2668_v1 = vpop.xlane.xlu0 %2667 }
 0x6b3   :  { %v2554_v8 = vmul.f32 %v2494_v0, %v4255_v2  ;;  %v2740_v56 = vmul.f32 %v2668_v1, %v4255_v2 }
 0x6b4   :  { %v2887_v4 = vsub.f32 1.5, %v2886_v38 }
 0x6b5   :  { %v3955_v55 = vpop.eup %3954  ;;  %v6505_v39 = vsub.f32 %v6333_v51, %v2554_v8  ;;  %v6507_v7 = vadd.f32 1e-05, %v2740_v56  ;;  %v4056_v51 = vld [vmem:[%s6934_s0 + $0xc0] sm:$0xff]  ;;  %v4057_v8 = vld [vmem:[%s6934_s0 + $0xc8] sm:$0xff] }
 0x6b6   :  { %v2888_v44 = vmul.f32 %v3953_v6, %v2887_v4  ;;  %v2894_v16 = vmul.f32 %v3955_v55, %v2771_v47  ;;  %v2401_v40 = vmul.f32 %v4056_v51, %v2354_v57  ;;  %vm2900_vm14 = vweird.f32 %v3955_v55 }
 0x6b7   :  { %3956 = vrsqrt.f32 %v6507_v7  ;;  %v2618_v18 = vmul.f32 %v6505_v39, %v6505_v39  ;;  %vm2901_vm1 = vmor %vm2899_vm15, %vm2900_vm14  ;;  %v2402_v56 = vmul.f32 %v4057_v8, %v2357_v62  ;;  %vm2909_vm3 = vweird.f32 %v6507_v7 }
 0x6b8   :  { %v2892_v28 = vsel %vm2891_vm13, %v3953_v6, %v2888_v44  ;;  %v2895_v52 = vmul.f32 %v3955_v55, %v2894_v16  ;;  %v6530_v11 = vadd.f32 %v2401_v40, %v6026_v13  ;;  %v2362_v16 = vpop.f32.mrf.mxu2 }
 0x6b9   :  { %v2684_v61 = vsel %vm58_vm0, %v2618_v18, 0.0  ;;  %v3122_v46 = vmul.f32 %v2892_v28, %v6275_v17  ;;  %v6553_v40 = vadd.f32 %v2402_v56, %v6063_v32 }
 0x6ba   :  { %v2896_v36 = vmul.f32 0.5, %v2895_v52  ;;  %2685 = vadd.xlane.f32.xlu0 %v2684_v61  ;;  %2511 = vadd.xlane.f32.xlu1 %v2510_v10  ;;  %v2497_v23 = vpop.xlane.xlu0 %2496  ;;  %v2513_v13 = vsel %vm58_vm0, %v6530_v11, 0.0  ;;  %v2360_v10 = vadd.f32 %v2359_v20, %v5760_v50  ;;  %v4058_v20 = vld [vmem:[%s6934_s0 + $0xd0] sm:$0xff] }
 0x6bb   :  { %v2555_v24 = vmul.f32 %v2497_v23, %v4255_v2  ;;  %v3155_v31 = vmul.f32 %v6235_v22, %v3122_v46  ;;  %v2671_v9 = vpop.xlane.xlu2 %2670 }
 0x6bc   :  { %v2897_v12 = vsub.f32 1.5, %v2896_v36  ;;  %v2741_v6 = vmul.f32 %v2671_v9, %v4255_v2 }
 0x6bd   :  { %v3957_v45 = vpop.eup %3956  ;;  %v6526_v37 = vsub.f32 %v6372_v63, %v2555_v24  ;;  %v3188_v17 = vadd.f32 %v6247_v3, %v3155_v31 }
 0x6be   :  { %v2898_v35 = vmul.f32 %v3955_v55, %v2897_v12  ;;  %v2904_v54 = vmul.f32 %v3957_v45, %v6507_v7  ;;  %v6534_v53 = vadd.f32 1e-05, %v2741_v6  ;;  %vm2910_vm2 = vweird.f32 %v3957_v45 }
 0x6bf   :  { %v3334_v5 = vpop.f32.mrf.mxu3  ;;  %3768 = vmatmul.msk.f32.gmra.mxu3 %vm58_vm0, %v3188_v17  ;;  %v2619_v63 = vmul.f32 %v6526_v37, %v6526_v37  ;;  %vm2911_vm4 = vmor %vm2909_vm3, %vm2910_vm2 }
 0x6c0   :  { %v2902_v38 = vsel %vm2901_vm1, %v3955_v55, %v2898_v35  ;;  %v2905_v0 = vmul.f32 %v3957_v45, %v2904_v54  ;;  %v3426_v1 = vmax.f32 %v3334_v5, 0.0  ;;  %3958 = vrsqrt.f32 %v6534_v53 }
 0x6c1   :  { %v2687_v47 = vsel %vm58_vm0, %v2619_v63, 0.0  ;;  %v3123_v42 = vmul.f32 %v2902_v38, %v6302_v59  ;;  %vm2919_vm6 = vweird.f32 %v6534_v53 }
 0x6c2   :  { %v2906_v4 = vmul.f32 0.5, %v2905_v0  ;;  %2514 = vadd.xlane.f32.xlu0 %v2513_v13  ;;  %3494 = vmatmul.f32.gmra.mxu0 %v3426_v1  ;;  %v2363_v1 = vadd.f32 %v2362_v16, %v5760_v50  ;;  %v2365_v13 = vpop.f32.mrf.mxu2 }
 0x6c3   :  { %2688 = vadd.xlane.f32.xlu2 %v2687_v47  ;;  %v3156_v55 = vmul.f32 %v6235_v22, %v3123_v42  ;;  %v2500_v44 = vpop.xlane.xlu2 %2499  ;;  %v2674_v18 = vpop.xlane.xlu1 %2673 }
 0x6c4   :  { %v2907_v57 = vsub.f32 1.5, %v2906_v4  ;;  %v2556_v28 = vmul.f32 %v2500_v44, %v4255_v2  ;;  %v2742_v51 = vmul.f32 %v2674_v18, %v4255_v2 }
 0x6c5   :  { %v3189_v59 = vadd.f32 %v6247_v3, %v3156_v55 }
 0x6c6   :  { %v2908_v52 = vmul.f32 %v3957_v45, %v2907_v57  ;;  %v3959_v61 = vpop.eup %3958  ;;  %v6557_v46 = vsub.f32 %v6415_v58, %v2556_v28  ;;  %v6561_v31 = vadd.f32 1e-05, %v2742_v51  ;;  %v2516_v58 = vsel %vm58_vm0, %v6553_v40, 0.0 }
 0x6c7   :  { %v3337_v36 = vpop.f32.mrf.mxu3  ;;  %3769 = vmatmul.msk.f32.gmra.mxu3 %vm58_vm0, %v3189_v59  ;;  %v2914_v24 = vmul.f32 %v3959_v61, %v6534_v53  ;;  %vm2920_vm5 = vweird.f32 %v3959_v61 }
 0x6c8   :  { %v2912_v23 = vsel %vm2911_vm4, %v3957_v45, %v2908_v52  ;;  %v3427_v7 = vmax.f32 %v3337_v36, 0.0  ;;  %v2620_v32 = vmul.f32 %v6557_v46, %v6557_v46  ;;  %3960 = vrsqrt.f32 %v6561_v31  ;;  %vm2921_vm7 = vmor %vm2919_vm6, %vm2920_vm5  ;;  %v4059_v52 = vld [vmem:[%s6934_s0 + $0xd8] sm:$0xff] }
 0x6c9   :  { %v3124_v12 = vmul.f32 %v2912_v23, %v6337_v26  ;;  %v2915_v9 = vmul.f32 %v3959_v61, %v2914_v24  ;;  %v2403_v45 = vmul.f32 %v4058_v20, %v2360_v10  ;;  %v2404_v51 = vmul.f32 %v4059_v52, %v2363_v1 }
 0x6ca   :  { %3497 = vmatmul.f32.gmra.mxu0 %v3427_v7  ;;  %v2690_v6 = vsel %vm58_vm0, %v2620_v32, 0.0  ;;  %v2366_v32 = vadd.f32 %v2365_v13, %v5760_v50  ;;  %vm2929_vm9 = vweird.f32 %v6561_v31 }
 0x6cb   :  { %2517 = vadd.xlane.f32.xlu2 %v2516_v58  ;;  %v2677_v17 = vpop.xlane.xlu0 %2676  ;;  %v3157_v62 = vmul.f32 %v6235_v22, %v3124_v12  ;;  %v2916_v35 = vmul.f32 0.5, %v2915_v9  ;;  %2691 = vadd.xlane.f32.xlu1 %v2690_v6  ;;  %v2503_v54 = vpop.xlane.xlu1 %2502  ;;  %v6582_v42 = vadd.f32 %v2403_v45, %v6092_v43  ;;  %v6612_v20 = vadd.f32 %v2404_v51, %v6120_v15 }
 0x6cc   :  { %v2743_v26 = vmul.f32 %v2677_v17, %v4255_v2  ;;  %v2557_v38 = vmul.f32 %v2503_v54, %v4255_v2  ;;  %v2368_v6 = vpop.f32.mrf.mxu2 }
 0x6cd   :  { %v3190_v5 = vadd.f32 %v6247_v3, %v3157_v62  ;;  %v2917_v63 = vsub.f32 1.5, %v2916_v35  ;;  %v2519_v28 = vsel %vm58_vm0, %v6582_v42, 0.0  ;;  %v4060_v62 = vld [vmem:[%s6934_s0 + $0xe0] sm:$0xff] }
 0x6ce   :  { %v6577_v0 = vadd.f32 1e-05, %v2743_v26  ;;  %v3961_v8 = vpop.eup %3960  ;;  %v6586_v4 = vsub.f32 %v6444_v14, %v2557_v38  ;;  %v2405_v35 = vmul.f32 %v4060_v62, %v2366_v32 }
 0x6cf   :  { %v3340_v47 = vpop.f32.mrf.mxu3  ;;  %3770 = vmatmul.msk.f32.gmra.mxu3 %vm58_vm0, %v3190_v5  ;;  %v2918_v56 = vmul.f32 %v3959_v61, %v2917_v63  ;;  %v2924_v55 = vmul.f32 %v3961_v8, %v6561_v31  ;;  %vm2930_vm8 = vweird.f32 %v3961_v8  ;;  %v2522_v31 = vsel %vm58_vm0, %v6612_v20, 0.0 }
 0x6d0   :  { %3962 = vrsqrt.f32 %v6577_v0  ;;  %v3428_v57 = vmax.f32 %v3340_v47, 0.0  ;;  %v2621_v16 = vmul.f32 %v6586_v4, %v6586_v4  ;;  %vm2931_vm10 = vmor %vm2929_vm9, %vm2930_vm8  ;;  %vm2939_vm12 = vweird.f32 %v6577_v0 }
 0x6d1   :  { %v2922_v44 = vsel %vm2921_vm7, %v3959_v61, %v2918_v56  ;;  %v2925_v43 = vmul.f32 %v3961_v8, %v2924_v55  ;;  %v2369_v56 = vadd.f32 %v2368_v6, %v5760_v50 }
 0x6d2   :  { %v2680_v18 = vpop.xlane.xlu2 %2679  ;;  %3500 = vmatmul.f32.gmra.mxu0 %v3428_v57  ;;  %v3125_v59 = vmul.f32 %v2922_v44, %v6381_v30  ;;  %v2693_v61 = vsel %vm58_vm0, %v2621_v16, 0.0  ;;  %v6633_v16 = vadd.f32 %v2405_v35, %v6159_v21 }
 0x6d3   :  { %v2744_v53 = vmul.f32 %v2680_v18, %v4255_v2  ;;  %v2506_v14 = vpop.xlane.xlu0 %2505  ;;  %2520 = vadd.xlane.f32.xlu1 %v2519_v28  ;;  %v2926_v36 = vmul.f32 0.5, %v2925_v43  ;;  %2694 = vadd.xlane.f32.xlu0 %v2693_v61 }
 0x6d4   :  { %v2558_v10 = vmul.f32 %v2506_v14, %v4255_v2  ;;  %v3158_v24 = vmul.f32 %v6235_v22, %v3125_v59 }
 0x6d5   :  { %v6601_v23 = vadd.f32 1e-05, %v2744_v53  ;;  %v2927_v12 = vsub.f32 1.5, %v2926_v36 }
 0x6d6   :  { %v3963_v7 = vpop.eup %3962  ;;  %v6606_v30 = vsub.f32 %v6462_v49, %v2558_v10  ;;  %v3191_v58 = vadd.f32 %v6247_v3, %v3158_v24 }
 0x6d7   :  { %v2934_v9 = vmul.f32 %v3963_v7, %v6577_v0  ;;  %3964 = vrsqrt.f32 %v6601_v23  ;;  %v2928_v17 = vmul.f32 %v3961_v8, %v2927_v12  ;;  %vm2940_vm11 = vweird.f32 %v3963_v7 }
 0x6d8   :  { %v2622_v45 = vmul.f32 %v6606_v30, %v6606_v30  ;;  %v3343_v26 = vpop.f32.mrf.mxu3  ;;  %3771 = vmatmul.msk.f32.gmra.mxu3 %vm58_vm0, %v3191_v58  ;;  %vm2941_vm13 = vmor %vm2939_vm12, %vm2940_vm11  ;;  %v2525_v0 = vsel %vm58_vm0, %v6633_v16, 0.0  ;;  %vm2949_vm15 = vweird.f32 %v6601_v23 }
 0x6d9   :  { %v2935_v49 = vmul.f32 %v3963_v7, %v2934_v9  ;;  %v2932_v5 = vsel %vm2931_vm10, %v3961_v8, %v2928_v17  ;;  %v3429_v38 = vmax.f32 %v3343_v26, 0.0 }
 0x6da   :  { %v2509_v54 = vpop.xlane.xlu2 %2508  ;;  %v2696_v15 = vsel %vm58_vm0, %v2622_v45, 0.0  ;;  %v3126_v13 = vmul.f32 %v2932_v5, %v6420_v25  ;;  %v2371_v5 = vpop.f32.mrf.mxu2 }
 0x6db   :  { %v2936_v63 = vmul.f32 0.5, %v2935_v49  ;;  %v2559_v1 = vmul.f32 %v2509_v54, %v4255_v2  ;;  %2697 = vadd.xlane.f32.xlu2 %v2696_v15  ;;  %2523 = vadd.xlane.f32.xlu0 %v2522_v31 }
 0x6dc   :  { %3503 = vmatmul.f32.gmra.mxu0 %v3429_v38  ;;  %v3159_v44 = vmul.f32 %v6235_v22, %v3126_v13 }
 0x6dd   :  { %v3965_v47 = vpop.eup %3964  ;;  %v2937_v55 = vsub.f32 1.5, %v2936_v63  ;;  %v6628_v57 = vsub.f32 %v6478_v29, %v2559_v1  ;;  %v4061_v29 = vld [vmem:[%s6934_s0 + $0xe8] sm:$0xff] }
 0x6de   :  { %v2944_v8 = vmul.f32 %v3965_v47, %v6601_v23  ;;  %v3192_v28 = vadd.f32 %v6247_v3, %v3159_v44  ;;  %v2406_v53 = vmul.f32 %v4061_v29, %v2369_v56  ;;  %vm2950_vm14 = vweird.f32 %v3965_v47 }
 0x6df   :  { %v2938_v18 = vmul.f32 %v3963_v7, %v2937_v55  ;;  %v2623_v25 = vmul.f32 %v6628_v57, %v6628_v57  ;;  %vm2951_vm1 = vmor %vm2949_vm15, %vm2950_vm14 }
 0x6e0   :  { %v2945_v43 = vmul.f32 %v3965_v47, %v2944_v8  ;;  %v3346_v52 = vpop.f32.mrf.mxu3  ;;  %3772 = vmatmul.msk.f32.gmra.mxu3 %vm58_vm0, %v3192_v28 }
 0x6e1   :  { %v2942_v14 = vsel %vm2941_vm13, %v3963_v7, %v2938_v18  ;;  %v2699_v59 = vsel %vm58_vm0, %v2623_v25, 0.0  ;;  %v3430_v61 = vmax.f32 %v3346_v52, 0.0  ;;  %v6649_v7 = vadd.f32 %v2406_v53, %v6205_v27  ;;  %v4062_v25 = vld [vmem:[%s6934_s0 + $0xf0] sm:$0xff] }
 0x6e2   :  { %v2946_v21 = vmul.f32 0.5, %v2945_v43  ;;  %2700 = vadd.xlane.f32.xlu1 %v2699_v59  ;;  %v3127_v51 = vmul.f32 %v2942_v14, %v6437_v33  ;;  %v2374_v29 = vpop.f32.mrf.mxu2 }
 0x6e3   :  { %2526 = vadd.xlane.f32.xlu2 %v2525_v0  ;;  %v2528_v33 = vsel %vm58_vm0, %v6649_v7, 0.0 }
 0x6e4   :  { %v2947_v10 = vsub.f32 1.5, %v2946_v21  ;;  %v3160_v36 = vmul.f32 %v6235_v22, %v3127_v51  ;;  %3506 = vmatmul.f32.gmra.mxu0 %v3430_v61  ;;  %v2375_v51 = vadd.f32 %v2374_v29, %v5760_v50 }
 0x6e5   :  { %v3489_v24 = vpop.f32.mrf.mxu0 }
 0x6e6   :  { %v2948_v32 = vmul.f32 %v3965_v47, %v2947_v10  ;;  %v3585_v12 = vmax.f32 %v3489_v24, 0.0  ;;  %v3193_v9 = vadd.f32 %v6247_v3, %v3160_v36 }
 0x6e8   :  { %v2952_v58 = vsel %vm2951_vm1, %v3965_v47, %v2948_v32  ;;  %3617 = vst [vmem:[%s6938_s5] sm:$0xff] %v3585_v12  ;;  %v3349_v6 = vpop.f32.mrf.mxu3  ;;  %3773 = vmatmul.msk.f32.gmra.mxu3 %vm58_vm0, %v3193_v9  ;;  %v2372_v47 = vadd.f32 %v2371_v5, %v5760_v50  ;;  %v4063_v50 = vld [vmem:[%s6934_s0 + $0xf8] sm:$0xff] }
 0x6e9   :  { %v3128_v45 = vmul.f32 %v2952_v58, %v6458_v19  ;;  %v3431_v27 = vmax.f32 %v3349_v6, 0.0 }
 0x6ea   :  { %2529 = vadd.xlane.f32.xlu1 %v2528_v33  ;;  %v2407_v43 = vmul.f32 %v4062_v25, %v2372_v47 }
 0x6eb   :  { %v3161_v23 = vmul.f32 %v6235_v22, %v3128_v45 }
 0x6ec   :  { %3509 = vmatmul.f32.gmra.mxu0 %v3431_v27  ;;  %v6686_v10 = vadd.f32 %v2407_v43, %v6227_v60 }
 0x6ed   :  { %v3492_v17 = vpop.f32.mrf.mxu0  ;;  %v3194_v62 = vadd.f32 %v6247_v3, %v3161_v23 }
 0x6ee   :  { %v3586_v49 = vmax.f32 %v3492_v17, 0.0  ;;  %v2531_v33 = vsel %vm58_vm0, %v6686_v10, 0.0 }
 0x6f0   :  { %3618 = vst [vmem:[%s6938_s5 + $0x8] sm:$0xff] %v3586_v49  ;;  %v3352_v35 = vpop.f32.mrf.mxu3  ;;  %3774 = vmatmul.msk.f32.gmra.mxu3 %vm58_vm0, %v3194_v62 }
 0x6f1   :  { %v3432_v19 = vmax.f32 %v3352_v35, 0.0 }
 0x6f4   :  { %3512 = vmatmul.f32.gmra.mxu0 %v3432_v19 }
 0x725   :  { %v2683_v26 = vpop.xlane.xlu1 %2682 }
 0x726   :  { %v2745_v54 = vmul.f32 %v2683_v26, %v4255_v2 }
 0x728   :  { %v2777_v15 = vadd.f32 1e-05, %v2745_v54 }
 0x72a   :  { %3966 = vrsqrt.f32 %v2777_v15  ;;  %vm2959_vm3 = vweird.f32 %v2777_v15 }
 0x72d   :  { %v2512_v63 = vpop.xlane.xlu1 %2511  ;;  %v2686_v38 = vpop.xlane.xlu0 %2685 }
 0x72e   :  { %v2560_v1 = vmul.f32 %v2512_v63, %v4255_v2  ;;  %v2746_v31 = vmul.f32 %v2686_v38, %v4255_v2 }
 0x730   :  { %v3967_v13 = vpop.eup %3966  ;;  %v6671_v56 = vsub.f32 %v6510_v34, %v2560_v1  ;;  %v2778_v55 = vadd.f32 1e-05, %v2746_v31 }
 0x731   :  { %v2954_v8 = vmul.f32 %v3967_v13, %v2777_v15  ;;  %vm2960_vm2 = vweird.f32 %v3967_v13 }
 0x732   :  { %3968 = vrsqrt.f32 %v2778_v55  ;;  %v2624_v44 = vmul.f32 %v6671_v56, %v6671_v56  ;;  %vm2961_vm4 = vmor %vm2959_vm3, %vm2960_vm2  ;;  %vm2969_vm6 = vweird.f32 %v2778_v55 }
 0x733   :  { %v2955_v18 = vmul.f32 %v3967_v13, %v2954_v8 }
 0x734   :  { %v2702_v28 = vsel %vm58_vm0, %v2624_v44, 0.0 }
 0x735   :  { %v2956_v53 = vmul.f32 0.5, %v2955_v18  ;;  %2703 = vadd.xlane.f32.xlu0 %v2702_v28  ;;  %v2515_v14 = vpop.xlane.xlu0 %2514 }
 0x736   :  { %v2689_v34 = vpop.xlane.xlu2 %2688  ;;  %v2561_v59 = vmul.f32 %v2515_v14, %v4255_v2 }
 0x737   :  { %v2957_v21 = vsub.f32 1.5, %v2956_v53  ;;  %v2747_v52 = vmul.f32 %v2689_v34, %v4255_v2 }
 0x738   :  { %v3969_v0 = vpop.eup %3968  ;;  %v6683_v61 = vsub.f32 %v6530_v11, %v2561_v59  ;;  %v2408_v11 = vmul.f32 %v4063_v50, %v2375_v51 }
 0x739   :  { %v2958_v36 = vmul.f32 %v3967_v13, %v2957_v21  ;;  %v2964_v24 = vmul.f32 %v3969_v0, %v2778_v55  ;;  %v6688_v32 = vadd.f32 1e-05, %v2747_v52  ;;  %vm2970_vm5 = vweird.f32 %v3969_v0 }
 0x73a   :  { %v2625_v12 = vmul.f32 %v6683_v61, %v6683_v61  ;;  %v6705_v54 = vadd.f32 %v2408_v11, %v6256_v41  ;;  %vm2971_vm7 = vmor %vm2969_vm6, %vm2970_vm5 }
 0x73b   :  { %v2962_v9 = vsel %vm2961_vm4, %v3967_v13, %v2958_v36  ;;  %v2965_v58 = vmul.f32 %v3969_v0, %v2964_v24  ;;  %3970 = vrsqrt.f32 %v6688_v32  ;;  %vm2979_vm9 = vweird.f32 %v6688_v32 }
 0x73c   :  { %v3129_v60 = vmul.f32 %v2962_v9, %v6493_v48  ;;  %v2705_v45 = vsel %vm58_vm0, %v2625_v12, 0.0  ;;  %v2534_v8 = vsel %vm58_vm0, %v6705_v54, 0.0 }
 0x73d   :  { %v2966_v6 = vmul.f32 0.5, %v2965_v58  ;;  %2532 = vadd.xlane.f32.xlu0 %v2531_v33  ;;  %2706 = vadd.xlane.f32.xlu2 %v2705_v45 }
 0x73e   :  { %v2518_v27 = vpop.xlane.xlu2 %2517  ;;  %v3162_v23 = vmul.f32 %v6235_v22, %v3129_v60  ;;  %v2692_v49 = vpop.xlane.xlu1 %2691 }
 0x73f   :  { %v2967_v17 = vsub.f32 1.5, %v2966_v6  ;;  %v2562_v62 = vmul.f32 %v2518_v27, %v4255_v2  ;;  %v3495_v35 = vpop.f32.mrf.mxu0  ;;  %v2748_v19 = vmul.f32 %v2692_v49, %v4255_v2 }
 0x740   :  { %v3587_v48 = vmax.f32 %v3495_v35, 0.0  ;;  %v3195_v26 = vadd.f32 %v6247_v3, %v3162_v23 }
 0x741   :  { %v3971_v15 = vpop.eup %3970  ;;  %v2968_v5 = vmul.f32 %v3969_v0, %v2967_v17  ;;  %v6708_v63 = vsub.f32 %v6553_v40, %v2562_v62  ;;  %v6711_v1 = vadd.f32 1e-05, %v2748_v19 }
 0x742   :  { %v2974_v38 = vmul.f32 %v3971_v15, %v6688_v32  ;;  %3619 = vst [vmem:[%s6938_s5 + $0x10] sm:$0xff] %v3587_v48  ;;  %v3355_v31 = vpop.f32.mrf.mxu3  ;;  %3775 = vmatmul.msk.f32.gmra.mxu3 %vm58_vm0, %v3195_v26  ;;  %vm2980_vm8 = vweird.f32 %v3971_v15 }
 0x743   :  { %v2972_v41 = vsel %vm2971_vm7, %v3969_v0, %v2968_v5  ;;  %v3433_v13 = vmax.f32 %v3355_v31, 0.0  ;;  %v2626_v47 = vmul.f32 %v6708_v63, %v6708_v63  ;;  %3972 = vrsqrt.f32 %v6711_v1  ;;  %vm2981_vm10 = vmor %vm2979_vm9, %vm2980_vm8 }
 0x744   :  { %v3130_v40 = vmul.f32 %v2972_v41, %v6505_v39  ;;  %v2975_v55 = vmul.f32 %v3971_v15, %v2974_v38  ;;  %vm2989_vm12 = vweird.f32 %v6711_v1 }
 0x745   :  { %3515 = vmatmul.f32.gmra.mxu0 %v3433_v13  ;;  %v2708_v44 = vsel %vm58_vm0, %v2626_v47, 0.0  ;;  %2535 = vadd.xlane.f32.xlu2 %v2534_v8 }
 0x746   :  { %v2976_v18 = vmul.f32 0.5, %v2975_v55  ;;  %2709 = vadd.xlane.f32.xlu1 %v2708_v44  ;;  %v3163_v25 = vmul.f32 %v6235_v22, %v3130_v40  ;;  %v2521_v43 = vpop.xlane.xlu1 %2520  ;;  %v2695_v39 = vpop.xlane.xlu0 %2694 }
 0x747   :  { %v2563_v29 = vmul.f32 %v2521_v43, %v4255_v2  ;;  %v3498_v53 = vpop.f32.mrf.mxu0  ;;  %v2749_v34 = vmul.f32 %v2695_v39, %v4255_v2 }
 0x748   :  { %v2977_v28 = vsub.f32 1.5, %v2976_v18  ;;  %v3196_v14 = vadd.f32 %v6247_v3, %v3163_v25  ;;  %v3588_v59 = vmax.f32 %v3498_v53, 0.0 }
 0x749   :  { %v3973_v21 = vpop.eup %3972  ;;  %v6730_v0 = vsub.f32 %v6582_v42, %v2563_v29  ;;  %v2781_v24 = vadd.f32 1e-05, %v2749_v34 }
 0x74a   :  { %v2978_v52 = vmul.f32 %v3971_v15, %v2977_v28  ;;  %v3358_v51 = vpop.f32.mrf.mxu3  ;;  %3776 = vmatmul.msk.f32.gmra.mxu3 %vm58_vm0, %v3196_v14  ;;  %v2984_v36 = vmul.f32 %v3973_v21, %v6711_v1  ;;  %3620 = vst [vmem:[%s6938_s5 + $0x18] sm:$0xff] %v3588_v59  ;;  %vm2990_vm11 = vweird.f32 %v3973_v21 }
 0x74b   :  { %v3434_v12 = vmax.f32 %v3358_v51, 0.0  ;;  %v2627_v58 = vmul.f32 %v6730_v0, %v6730_v0  ;;  %3974 = vrsqrt.f32 %v2781_v24  ;;  %vm2991_vm13 = vmor %vm2989_vm12, %vm2990_vm11  ;;  %vm2999_vm15 = vweird.f32 %v2781_v24 }
 0x74c   :  { %v2982_v9 = vsel %vm2981_vm10, %v3971_v15, %v2978_v52  ;;  %v2985_v42 = vmul.f32 %v3973_v21, %v2984_v36 }
 0x74d   :  { %v3131_v32 = vmul.f32 %v2982_v9, %v6526_v37  ;;  %3518 = vmatmul.f32.gmra.mxu0 %v3434_v12  ;;  %v2711_v50 = vsel %vm58_vm0, %v2627_v58, 0.0 }
 0x74e   :  { %v2698_v11 = vpop.xlane.xlu2 %2697  ;;  %v2986_v60 = vmul.f32 0.5, %v2985_v42  ;;  %2712 = vadd.xlane.f32.xlu0 %v2711_v50  ;;  %v2524_v6 = vpop.xlane.xlu0 %2523 }
 0x74f   :  { %v2750_v33 = vmul.f32 %v2698_v11, %v4255_v2  ;;  %v3164_v45 = vmul.f32 %v6235_v22, %v3131_v32  ;;  %v3501_v27 = vpop.f32.mrf.mxu0  ;;  %v2564_v37 = vmul.f32 %v2524_v6, %v4255_v2 }
 0x750   :  { %v2987_v23 = vsub.f32 1.5, %v2986_v60  ;;  %v3589_v49 = vmax.f32 %v3501_v27, 0.0 }
 0x751   :  { %v6743_v17 = vadd.f32 1e-05, %v2750_v33  ;;  %v3197_v35 = vadd.f32 %v6247_v3, %v3164_v45  ;;  %v3975_v19 = vpop.eup %3974  ;;  %v6750_v26 = vsub.f32 %v6612_v20, %v2564_v37 }
 0x752   :  { %v3361_v62 = vpop.f32.mrf.mxu3  ;;  %v2988_v48 = vmul.f32 %v3973_v21, %v2987_v23  ;;  %3621 = vst [vmem:[%s6938_s5 + $0x20] sm:$0xff] %v3589_v49  ;;  %v2994_v15 = vmul.f32 %v3975_v19, %v2781_v24  ;;  %vm3000_vm14 = vweird.f32 %v3975_v19 }
 0x753   :  { %3976 = vrsqrt.f32 %v6743_v17  ;;  %v3435_v5 = vmax.f32 %v3361_v62, 0.0  ;;  %3777 = vmatmul.msk.f32.gmra.mxu3 %vm58_vm0, %v3197_v35  ;;  %v2628_v1 = vmul.f32 %v6750_v26, %v6750_v26  ;;  %vm3001_vm1 = vmor %vm2999_vm15, %vm3000_vm14  ;;  %vm3009_vm3 = vweird.f32 %v6743_v17 }
 0x754   :  { %v2992_v38 = vsel %vm2991_vm13, %v3973_v21, %v2988_v48  ;;  %v2995_v13 = vmul.f32 %v3975_v19, %v2994_v15 }
 0x755   :  { %v2701_v31 = vpop.xlane.xlu1 %2700  ;;  %v3132_v41 = vmul.f32 %v2992_v38, %v6557_v46  ;;  %3521 = vmatmul.f32.gmra.mxu0 %v3435_v5  ;;  %v2714_v55 = vsel %vm58_vm0, %v2628_v1, 0.0 }
 0x756   :  { %v2751_v20 = vmul.f32 %v2701_v31, %v4255_v2  ;;  %v2527_v47 = vpop.xlane.xlu2 %2526  ;;  %v2996_v8 = vmul.f32 0.5, %v2995_v13  ;;  %2715 = vadd.xlane.f32.xlu1 %v2714_v55 }
 0x757   :  { %v2565_v40 = vmul.f32 %v2527_v47, %v4255_v2  ;;  %v3165_v18 = vmul.f32 %v6235_v22, %v3132_v41 }
 0x758   :  { %v2783_v44 = vadd.f32 1e-05, %v2751_v20  ;;  %v2997_v28 = vsub.f32 1.5, %v2996_v8 }
 0x759   :  { %v3977_v25 = vpop.eup %3976  ;;  %v6765_v43 = vsub.f32 %v6633_v16, %v2565_v40  ;;  %v3504_v29 = vpop.f32.mrf.mxu0  ;;  %v3198_v53 = vadd.f32 %v6247_v3, %v3165_v18 }
 0x75a   :  { %v3004_v46 = vmul.f32 %v3977_v25, %v6743_v17  ;;  %3978 = vrsqrt.f32 %v2783_v44  ;;  %v3590_v39 = vmax.f32 %v3504_v29, 0.0  ;;  %v2998_v34 = vmul.f32 %v3975_v19, %v2997_v28 }
 0x75b   :  { %v2629_v14 = vmul.f32 %v6765_v43, %v6765_v43  ;;  %v3364_v16 = vpop.f32.mrf.mxu3  ;;  %3778 = vmatmul.msk.f32.gmra.mxu3 %vm58_vm0, %v3198_v53  ;;  %vm3010_vm2 = vweird.f32 %v3977_v25  ;;  %vm3019_vm6 = vweird.f32 %v2783_v44 }
 0x75c   :  { %v3005_v59 = vmul.f32 %v3977_v25, %v3004_v46  ;;  %3622 = vst [vmem:[%s6938_s5 + $0x28] sm:$0xff] %v3590_v39  ;;  %v3002_v51 = vsel %vm3001_vm1, %v3975_v19, %v2998_v34  ;;  %v3436_v12 = vmax.f32 %v3364_v16, 0.0  ;;  %vm3011_vm4 = vmor %vm3009_vm3, %vm3010_vm2 }
 0x75d   :  { %v2530_v21 = vpop.xlane.xlu1 %2529  ;;  %v2717_v52 = vsel %vm58_vm0, %v2629_v14, 0.0  ;;  %v3133_v24 = vmul.f32 %v3002_v51, %v6586_v4 }
 0x75e   :  { %v3006_v36 = vmul.f32 0.5, %v3005_v59  ;;  %v2566_v9 = vmul.f32 %v2530_v21, %v4255_v2  ;;  %2718 = vadd.xlane.f32.xlu2 %v2717_v52  ;;  %3524 = vmatmul.f32.gmra.mxu0 %v3436_v12 }
 0x75f   :  { %v3166_v11 = vmul.f32 %v6235_v22, %v3133_v24 }
 0x760   :  { %v3979_v58 = vpop.eup %3978  ;;  %v3007_v32 = vsub.f32 1.5, %v3006_v36  ;;  %v6779_v42 = vsub.f32 %v6649_v7, %v2566_v9 }
 0x761   :  { %v3014_v50 = vmul.f32 %v3979_v58, %v2783_v44  ;;  %v3507_v33 = vpop.f32.mrf.mxu0  ;;  %v3199_v27 = vadd.f32 %v6247_v3, %v3166_v11  ;;  %vm3020_vm5 = vweird.f32 %v3979_v58 }
 0x762   :  { %v3008_v60 = vmul.f32 %v3977_v25, %v3007_v32  ;;  %v2630_v45 = vmul.f32 %v6779_v42, %v6779_v42  ;;  %v3591_v4 = vmax.f32 %v3507_v33, 0.0  ;;  %vm3021_vm7 = vmor %vm3019_vm6, %vm3020_vm5 }
 0x763   :  { %v3015_v6 = vmul.f32 %v3979_v58, %v3014_v50  ;;  %v3367_v17 = vpop.f32.mrf.mxu3  ;;  %3779 = vmatmul.msk.f32.gmra.mxu3 %vm58_vm0, %v3199_v27 }
 0x764   :  { %v3012_v23 = vsel %vm3011_vm4, %v3977_v25, %v3008_v60  ;;  %v2720_v7 = vsel %vm58_vm0, %v2630_v45, 0.0  ;;  %3623 = vst [vmem:[%s6938_s5 + $0x30] sm:$0xff] %v3591_v4  ;;  %v3437_v62 = vmax.f32 %v3367_v17, 0.0 }
 0x765   :  { %v3134_v37 = vmul.f32 %v3012_v23, %v6606_v30  ;;  %v3016_v49 = vmul.f32 0.5, %v3015_v6  ;;  %2721 = vadd.xlane.f32.xlu0 %v2720_v7 }
 0x766   :  { %3527 = vmatmul.f32.gmra.mxu0 %v3437_v62 }
 0x767   :  { %v3017_v35 = vsub.f32 1.5, %v3016_v49  ;;  %v3167_v19 = vmul.f32 %v6235_v22, %v3134_v37 }
 0x769   :  { %v3018_v48 = vmul.f32 %v3979_v58, %v3017_v35  ;;  %v3200_v15 = vadd.f32 %v6247_v3, %v3167_v19  ;;  %v3510_v30 = vpop.f32.mrf.mxu0 }
 0x76a   :  { %v3592_v38 = vmax.f32 %v3510_v30, 0.0 }
 0x76b   :  { %v3022_v5 = vsel %vm3021_vm7, %v3979_v58, %v3018_v48  ;;  %v3370_v1 = vpop.f32.mrf.mxu3  ;;  %3780 = vmatmul.msk.f32.gmra.mxu3 %vm58_vm0, %v3200_v15 }
 0x76c   :  { %v3135_v31 = vmul.f32 %v3022_v5, %v6628_v57  ;;  %3624 = vst [vmem:[%s6938_s5 + $0x38] sm:$0xff] %v3592_v38  ;;  %v3438_v41 = vmax.f32 %v3370_v1, 0.0 }
 0x76e   :  { %v3168_v13 = vmul.f32 %v6235_v22, %v3135_v31  ;;  %3530 = vmatmul.f32.gmra.mxu0 %v3438_v41 }
 0x770   :  { %v3201_v20 = vadd.f32 %v6247_v3, %v3168_v13 }
 0x771   :  { %v3513_v47 = vpop.f32.mrf.mxu0 }
 0x772   :  { %v3593_v40 = vmax.f32 %v3513_v47, 0.0 }
 0x773   :  { %v3373_v57 = vpop.f32.mrf.mxu3  ;;  %3781 = vmatmul.msk.f32.gmra.mxu3 %vm58_vm0, %v3201_v20 }
 0x774   :  { %3625 = vst [vmem:[%s6938_s5 + $0x40] sm:$0xff] %v3593_v40  ;;  %v3439_v55 = vmax.f32 %v3373_v57, 0.0 }
 0x776   :  { %3533 = vmatmul.f32.gmra.mxu0 %v3439_v55 }
 0x7a8   :  { %v2704_v8 = vpop.xlane.xlu0 %2703 }
 0x7a9   :  { %v2752_v44 = vmul.f32 %v2704_v8, %v4255_v2 }
 0x7ab   :  { %v2784_v18 = vadd.f32 1e-05, %v2752_v44 }
 0x7ad   :  { %3980 = vrsqrt.f32 %v2784_v18  ;;  %vm3029_vm9 = vweird.f32 %v2784_v18 }
 0x7b0   :  { %v2707_v25 = vpop.xlane.xlu2 %2706  ;;  %v2533_v28 = vpop.xlane.xlu0 %2532 }
 0x7b1   :  { %v2753_v46 = vmul.f32 %v2707_v25, %v4255_v2  ;;  %v2567_v29 = vmul.f32 %v2533_v28, %v4255_v2 }
 0x7b3   :  { %v3981_v39 = vpop.eup %3980  ;;  %v2785_v53 = vadd.f32 1e-05, %v2753_v46  ;;  %v6809_v14 = vsub.f32 %v6686_v10, %v2567_v29 }
 0x7b4   :  { %v3024_v34 = vmul.f32 %v3981_v39, %v2784_v18  ;;  %vm3030_vm8 = vweird.f32 %v3981_v39 }
 0x7b5   :  { %3982 = vrsqrt.f32 %v2785_v53  ;;  %v2631_v59 = vmul.f32 %v6809_v14, %v6809_v14  ;;  %vm3031_vm10 = vmor %vm3029_vm9, %vm3030_vm8  ;;  %vm3039_vm12 = vweird.f32 %v2785_v53 }
 0x7b6   :  { %v3025_v16 = vmul.f32 %v3981_v39, %v3024_v34 }
 0x7b7   :  { %v2723_v21 = vsel %vm58_vm0, %v2631_v59, 0.0 }
 0x7b8   :  { %v3026_v52 = vmul.f32 0.5, %v3025_v16  ;;  %v2536_v51 = vpop.xlane.xlu2 %2535  ;;  %2724 = vadd.xlane.f32.xlu1 %v2723_v21 }
 0x7b9   :  { %v2710_v36 = vpop.xlane.xlu1 %2709  ;;  %v2568_v12 = vmul.f32 %v2536_v51, %v4255_v2 }
 0x7ba   :  { %v3027_v9 = vsub.f32 1.5, %v3026_v52  ;;  %v2754_v24 = vmul.f32 %v2710_v36, %v4255_v2 }
 0x7bb   :  { %v3983_v10 = vpop.eup %3982  ;;  %v6817_v58 = vsub.f32 %v6705_v54, %v2568_v12 }
 0x7bc   :  { %v3028_v32 = vmul.f32 %v3981_v39, %v3027_v9  ;;  %v3034_v50 = vmul.f32 %v3983_v10, %v2785_v53  ;;  %v2786_v11 = vadd.f32 1e-05, %v2754_v24  ;;  %vm3040_vm11 = vweird.f32 %v3983_v10 }
 0x7bd   :  { %v2632_v60 = vmul.f32 %v6817_v58, %v6817_v58  ;;  %vm3041_vm13 = vmor %vm3039_vm12, %vm3040_vm11 }
 0x7be   :  { %v3032_v33 = vsel %vm3031_vm10, %v3981_v39, %v3028_v32  ;;  %v3035_v45 = vmul.f32 %v3983_v10, %v3034_v50  ;;  %3984 = vrsqrt.f32 %v2786_v11  ;;  %vm3049_vm15 = vweird.f32 %v2786_v11 }
 0x7bf   :  { %v3136_v6 = vmul.f32 %v3032_v33, %v6671_v56  ;;  %v2726_v4 = vsel %vm58_vm0, %v2632_v60, 0.0 }
 0x7c0   :  { %v3036_v27 = vmul.f32 0.5, %v3035_v45  ;;  %2727 = vadd.xlane.f32.xlu2 %v2726_v4 }
 0x7c1   :  { %v3169_v54 = vmul.f32 %v6235_v22, %v3136_v6  ;;  %v2713_v7 = vpop.xlane.xlu0 %2712 }
 0x7c2   :  { %v3037_v23 = vsub.f32 1.5, %v3036_v27  ;;  %v3516_v37 = vpop.f32.mrf.mxu0  ;;  %v2755_v49 = vmul.f32 %v2713_v7, %v4255_v2 }
 0x7c3   :  { %v3594_v17 = vmax.f32 %v3516_v37, 0.0  ;;  %v3202_v62 = vadd.f32 %v6247_v3, %v3169_v54 }
 0x7c4   :  { %v3985_v35 = vpop.eup %3984  ;;  %v3038_v19 = vmul.f32 %v3983_v10, %v3037_v23  ;;  %v2787_v48 = vadd.f32 1e-05, %v2755_v49 }
 0x7c5   :  { %v3044_v56 = vmul.f32 %v3985_v35, %v2786_v11  ;;  %3626 = vst [vmem:[%s6938_s5 + $0x48] sm:$0xff] %v3594_v17  ;;  %v3376_v15 = vpop.f32.mrf.mxu3  ;;  %3782 = vmatmul.msk.f32.gmra.mxu3 %vm58_vm0, %v3202_v62  ;;  %vm3050_vm14 = vweird.f32 %v3985_v35 }
 0x7c6   :  { %v3042_v30 = vsel %vm3041_vm13, %v3983_v10, %v3038_v19  ;;  %v3440_v5 = vmax.f32 %v3376_v15, 0.0  ;;  %3986 = vrsqrt.f32 %v2787_v48  ;;  %vm3051_vm1 = vmor %vm3049_vm15, %vm3050_vm14  ;;  %vm3059_vm3 = vweird.f32 %v2787_v48 }
 0x7c7   :  { %v3137_v38 = vmul.f32 %v3042_v30, %v6683_v61  ;;  %v3045_v31 = vmul.f32 %v3985_v35, %v3044_v56 }
 0x7c8   :  { %3536 = vmatmul.f32.gmra.mxu0 %v3440_v5 }
 0x7c9   :  { %v3046_v1 = vmul.f32 0.5, %v3045_v31  ;;  %v3170_v41 = vmul.f32 %v6235_v22, %v3137_v38  ;;  %v2716_v47 = vpop.xlane.xlu1 %2715 }
 0x7ca   :  { %v3519_v13 = vpop.f32.mrf.mxu0  ;;  %v2756_v55 = vmul.f32 %v2716_v47, %v4255_v2 }
 0x7cb   :  { %v3047_v20 = vsub.f32 1.5, %v3046_v1  ;;  %v3595_v40 = vmax.f32 %v3519_v13, 0.0  ;;  %v3203_v57 = vadd.f32 %v6247_v3, %v3170_v41 }
 0x7cc   :  { %v3987_v8 = vpop.eup %3986  ;;  %v2788_v25 = vadd.f32 1e-05, %v2756_v55 }
 0x7cd   :  { %v3048_v44 = vmul.f32 %v3985_v35, %v3047_v20  ;;  %3627 = vst [vmem:[%s6938_s5 + $0x50] sm:$0xff] %v3595_v40  ;;  %v3379_v61 = vpop.f32.mrf.mxu3  ;;  %3783 = vmatmul.msk.f32.gmra.mxu3 %vm58_vm0, %v3203_v57  ;;  %v3054_v18 = vmul.f32 %v3987_v8, %v2787_v48  ;;  %vm3060_vm2 = vweird.f32 %v3987_v8 }
 0x7ce   :  { %v3441_v28 = vmax.f32 %v3379_v61, 0.0  ;;  %3988 = vrsqrt.f32 %v2788_v25  ;;  %vm3061_vm4 = vmor %vm3059_vm3, %vm3060_vm2  ;;  %vm3069_vm6 = vweird.f32 %v2788_v25 }
 0x7cf   :  { %v3052_v46 = vsel %vm3051_vm1, %v3985_v35, %v3048_v44  ;;  %v3055_v39 = vmul.f32 %v3987_v8, %v3054_v18 }
 0x7d0   :  { %v3138_v29 = vmul.f32 %v3052_v46, %v6708_v63  ;;  %3539 = vmatmul.f32.gmra.mxu0 %v3441_v28 }
 0x7d1   :  { %v2719_v53 = vpop.xlane.xlu2 %2718  ;;  %v3056_v34 = vmul.f32 0.5, %v3055_v39 }
 0x7d2   :  { %v2757_v59 = vmul.f32 %v2719_v53, %v4255_v2  ;;  %v3171_v16 = vmul.f32 %v6235_v22, %v3138_v29  ;;  %v3522_v21 = vpop.f32.mrf.mxu0 }
 0x7d3   :  { %v3057_v52 = vsub.f32 1.5, %v3056_v34  ;;  %v3596_v36 = vmax.f32 %v3522_v21, 0.0 }
 0x7d4   :  { %v2789_v51 = vadd.f32 1e-05, %v2757_v59  ;;  %v3204_v12 = vadd.f32 %v6247_v3, %v3171_v16  ;;  %v3989_v9 = vpop.eup %3988 }
 0x7d5   :  { %v3058_v24 = vmul.f32 %v3987_v8, %v3057_v52  ;;  %3628 = vst [vmem:[%s6938_s5 + $0x58] sm:$0xff] %v3596_v36  ;;  %v3064_v63 = vmul.f32 %v3989_v9, %v2788_v25  ;;  %vm3070_vm5 = vweird.f32 %v3989_v9 }
 0x7d6   :  { %3990 = vrsqrt.f32 %v2789_v51  ;;  %3784 = vmatmul.msk.f32.gmra.mxu3 %vm58_vm0, %v3204_v12  ;;  %v3382_v10 = vpop.f32.mrf.mxu3  ;;  %vm3071_vm7 = vmor %vm3069_vm6, %vm3070_vm5  ;;  %vm3079_vm9 = vweird.f32 %v2789_v51 }
 0x7d7   :  { %v3062_v32 = vsel %vm3061_vm4, %v3987_v8, %v3058_v24  ;;  %v3442_v50 = vmax.f32 %v3382_v10, 0.0  ;;  %v3065_v33 = vmul.f32 %v3989_v9, %v3064_v63 }
 0x7d8   :  { %v2722_v11 = vpop.xlane.xlu0 %2721  ;;  %v3139_v60 = vmul.f32 %v3062_v32, %v6730_v0 }
 0x7d9   :  { %v2758_v45 = vmul.f32 %v2722_v11, %v4255_v2  ;;  %3542 = vmatmul.f32.gmra.mxu0 %v3442_v50  ;;  %v3066_v6 = vmul.f32 0.5, %v3065_v33 }
 0x7da   :  { %v3172_v27 = vmul.f32 %v6235_v22, %v3139_v60 }
 0x7db   :  { %v2790_v4 = vadd.f32 1e-05, %v2758_v45  ;;  %v3067_v23 = vsub.f32 1.5, %v3066_v6  ;;  %v3525_v37 = vpop.f32.mrf.mxu0 }
 0x7dc   :  { %v3991_v54 = vpop.eup %3990  ;;  %v3597_v49 = vmax.f32 %v3525_v37, 0.0  ;;  %v3205_v17 = vadd.f32 %v6247_v3, %v3172_v27 }
 0x7dd   :  { %v3074_v7 = vmul.f32 %v3991_v54, %v2789_v51  ;;  %3992 = vrsqrt.f32 %v2790_v4  ;;  %v3068_v62 = vmul.f32 %v3989_v9, %v3067_v23  ;;  %vm3080_vm8 = vweird.f32 %v3991_v54 }
 0x7de   :  { %3629 = vst [vmem:[%s6938_s5 + $0x60] sm:$0xff] %v3597_v49  ;;  %v3385_v35 = vpop.f32.mrf.mxu3  ;;  %3785 = vmatmul.msk.f32.gmra.mxu3 %vm58_vm0, %v3205_v17  ;;  %vm3081_vm10 = vmor %vm3079_vm9, %vm3080_vm8  ;;  %vm3089_vm12 = vweird.f32 %v2790_v4 }
 0x7df   :  { %v3075_v0 = vmul.f32 %v3991_v54, %v3074_v7  ;;  %v3072_v19 = vsel %vm3071_vm7, %v3989_v9, %v3068_v62  ;;  %v3443_v48 = vmax.f32 %v3385_v35, 0.0 }
 0x7e0   :  { %v3140_v15 = vmul.f32 %v3072_v19, %v6750_v26 }
 0x7e1   :  { %v3076_v56 = vmul.f32 0.5, %v3075_v0  ;;  %3545 = vmatmul.f32.gmra.mxu0 %v3443_v48 }
 0x7e2   :  { %v3173_v31 = vmul.f32 %v6235_v22, %v3140_v15 }
 0x7e3   :  { %v3993_v30 = vpop.eup %3992  ;;  %v3077_v5 = vsub.f32 1.5, %v3076_v56  ;;  %v3528_v41 = vpop.f32.mrf.mxu0 }
 0x7e4   :  { %v3084_v38 = vmul.f32 %v3993_v30, %v2790_v4  ;;  %v3598_v20 = vmax.f32 %v3528_v41, 0.0  ;;  %v3206_v47 = vadd.f32 %v6247_v3, %v3173_v31  ;;  %vm3090_vm11 = vweird.f32 %v3993_v30 }
 0x7e5   :  { %v3078_v1 = vmul.f32 %v3991_v54, %v3077_v5  ;;  %vm3091_vm13 = vmor %vm3089_vm12, %vm3090_vm11 }
 0x7e6   :  { %v3085_v13 = vmul.f32 %v3993_v30, %v3084_v38  ;;  %3630 = vst [vmem:[%s6938_s5 + $0x68] sm:$0xff] %v3598_v20  ;;  %v3388_v26 = vpop.f32.mrf.mxu3  ;;  %3786 = vmatmul.msk.f32.gmra.mxu3 %vm58_vm0, %v3206_v47 }
 0x7e7   :  { %v3082_v40 = vsel %vm3081_vm10, %v3991_v54, %v3078_v1  ;;  %v3444_v8 = vmax.f32 %v3388_v26, 0.0 }
 0x7e8   :  { %v3141_v57 = vmul.f32 %v3082_v40, %v6765_v43  ;;  %v3086_v55 = vmul.f32 0.5, %v3085_v13 }
 0x7e9   :  { %3548 = vmatmul.f32.gmra.mxu0 %v3444_v8 }
 0x7ea   :  { %v3087_v44 = vsub.f32 1.5, %v3086_v55  ;;  %v3174_v61 = vmul.f32 %v6235_v22, %v3141_v57 }
 0x7eb   :  { %v3531_v43 = vpop.f32.mrf.mxu0 }
 0x7ec   :  { %v3088_v18 = vmul.f32 %v3993_v30, %v3087_v44  ;;  %v3207_v25 = vadd.f32 %v6247_v3, %v3174_v61  ;;  %v3599_v46 = vmax.f32 %v3531_v43, 0.0 }
 0x7ee   :  { %v3092_v28 = vsel %vm3091_vm13, %v3993_v30, %v3088_v18  ;;  %3631 = vst [vmem:[%s6938_s5 + $0x70] sm:$0xff] %v3599_v46  ;;  %v3391_v39 = vpop.f32.mrf.mxu3  ;;  %3787 = vmatmul.msk.f32.gmra.mxu3 %vm58_vm0, %v3207_v25 }
 0x7ef   :  { %v3142_v29 = vmul.f32 %v3092_v28, %v6779_v42  ;;  %v3445_v53 = vmax.f32 %v3391_v39, 0.0 }
 0x7f1   :  { %v3175_v34 = vmul.f32 %v6235_v22, %v3142_v29  ;;  %3551 = vmatmul.f32.gmra.mxu0 %v3445_v53 }
 0x7f3   :  { %v3208_v59 = vadd.f32 %v6247_v3, %v3175_v34  ;;  %v3534_v16 = vpop.f32.mrf.mxu0 }
 0x7f4   :  { %v3600_v21 = vmax.f32 %v3534_v16, 0.0 }
 0x7f6   :  { %3632 = vst [vmem:[%s6938_s5 + $0x78] sm:$0xff] %v3600_v21  ;;  %v3394_v42 = vpop.f32.mrf.mxu3  ;;  %3788 = vmatmul.msk.f32.gmra.mxu3 %vm58_vm0, %v3208_v59 }
 0x7f7   :  { %v3446_v52 = vmax.f32 %v3394_v42, 0.0 }
 0x7f9   :  { %3554 = vmatmul.f32.gmra.mxu0 %v3446_v52 }
 0x82b   :  { %v2725_v51 = vpop.xlane.xlu1 %2724 }
 0x82c   :  { %v2759_v36 = vmul.f32 %v2725_v51, %v4255_v2 }
 0x82e   :  { %v2791_v12 = vadd.f32 1e-05, %v2759_v36 }
 0x830   :  { %3994 = vrsqrt.f32 %v2791_v12  ;;  %vm3099_vm15 = vweird.f32 %v2791_v12 }
 0x833   :  { %v2728_v9 = vpop.xlane.xlu2 %2727 }
 0x834   :  { %v2760_v24 = vmul.f32 %v2728_v9, %v4255_v2 }
 0x836   :  { %v3995_v63 = vpop.eup %3994  ;;  %v2792_v10 = vadd.f32 1e-05, %v2760_v24 }
 0x837   :  { %v3094_v32 = vmul.f32 %v3995_v63, %v2791_v12  ;;  %vm3100_vm14 = vweird.f32 %v3995_v63 }
 0x838   :  { %3996 = vrsqrt.f32 %v2792_v10  ;;  %vm3101_vm1 = vmor %vm3099_vm15, %vm3100_vm14  ;;  %vm3109_vm3 = vweird.f32 %v2792_v10 }
 0x839   :  { %v3095_v50 = vmul.f32 %v3995_v63, %v3094_v32 }
 0x83b   :  { %v3096_v11 = vmul.f32 0.5, %v3095_v50 }
 0x83d   :  { %v3097_v60 = vsub.f32 1.5, %v3096_v11 }
 0x83e   :  { %v3997_v33 = vpop.eup %3996 }
 0x83f   :  { %v3098_v45 = vmul.f32 %v3995_v63, %v3097_v60  ;;  %v3104_v6 = vmul.f32 %v3997_v33, %v2792_v10  ;;  %vm3110_vm2 = vweird.f32 %v3997_v33 }
 0x840   :  { %vm3111_vm4 = vmor %vm3109_vm3, %vm3110_vm2 }
 0x841   :  { %v3102_v4 = vsel %vm3101_vm1, %v3995_v63, %v3098_v45  ;;  %v3105_v27 = vmul.f32 %v3997_v33, %v3104_v6 }
 0x842   :  { %v3143_v54 = vmul.f32 %v3102_v4, %v6809_v14 }
 0x843   :  { %v3106_v23 = vmul.f32 0.5, %v3105_v27 }
 0x844   :  { %v3176_v2 = vmul.f32 %v6235_v22, %v3143_v54 }
 0x845   :  { %v3107_v7 = vsub.f32 1.5, %v3106_v23  ;;  %v3537_v37 = vpop.f32.mrf.mxu0 }
 0x846   :  { %v3601_v49 = vmax.f32 %v3537_v37, 0.0  ;;  %v3209_v17 = vadd.f32 %v6247_v3, %v3176_v2 }
 0x847   :  { %v3108_v62 = vmul.f32 %v3997_v33, %v3107_v7 }
 0x848   :  { %3633 = vst [vmem:[%s6938_s5 + $0x80] sm:$0xff] %v3601_v49  ;;  %v3397_v0 = vpop.f32.mrf.mxu3  ;;  %3789 = vmatmul.msk.f32.gmra.mxu3 %vm58_vm0, %v3209_v17 }
 0x849   :  { %v3112_v14 = vsel %vm3111_vm4, %v3997_v33, %v3108_v62  ;;  %v3447_v35 = vmax.f32 %v3397_v0, 0.0 }
 0x84a   :  { %v3144_v19 = vmul.f32 %v3112_v14, %v6817_v58 }
 0x84b   :  { %3557 = vmatmul.f32.gmra.mxu0 %v3447_v35 }
 0x84c   :  { %v3177_v56 = vmul.f32 %v6235_v22, %v3144_v19 }
 0x84d   :  { %v3540_v48 = vpop.f32.mrf.mxu0 }
 0x84e   :  { %v3602_v15 = vmax.f32 %v3540_v48, 0.0  ;;  %v3210_v30 = vadd.f32 %v6247_v3, %v3177_v56 }
 0x850   :  { %3634 = vst [vmem:[%s6938_s5 + $0x88] sm:$0xff] %v3602_v15  ;;  %v3400_v5 = vpop.f32.mrf.mxu3  ;;  %3790 = vmatmul.msk.f32.gmra.mxu3 %vm58_vm0, %v3210_v30 }
 0x851   :  { %v3448_v38 = vmax.f32 %v3400_v5, 0.0 }
 0x853   :  { %3560 = vmatmul.f32.gmra.mxu0 %v3448_v38 }
 0x856   :  { %v3543_v31 = vpop.f32.mrf.mxu0 }
 0x857   :  { %v3603_v1 = vmax.f32 %v3543_v31, 0.0 }
 0x859   :  { %v3403_v41 = vpop.f32.mrf.mxu3  ;;  %3635 = vst [vmem:[%s6938_s5 + $0x90] sm:$0xff] %v3603_v1 }
 0x85a   :  { %v3449_v22 = vmax.f32 %v3403_v41, 0.0 }
 0x85c   :  { %3563 = vmatmul.f32.gmra.mxu0 %v3449_v22 }
 0x85e   :  { %v3546_v58 = vpop.f32.mrf.mxu0 }
 0x85f   :  { %v3604_v3 = vmax.f32 %v3546_v58, 0.0 }
 0x861   :  { %3636 = vst [vmem:[%s6938_s5 + $0x98] sm:$0xff] %v3604_v3  ;;  %v3406_v13 = vpop.f32.mrf.mxu3 }
 0x862   :  { %v3450_v20 = vmax.f32 %v3406_v13, 0.0 }
 0x864   :  { %3566 = vmatmul.f32.gmra.mxu0 %v3450_v20 }
 0x866   :  { %v3549_v47 = vpop.f32.mrf.mxu0 }
 0x867   :  { %v3605_v40 = vmax.f32 %v3549_v47, 0.0 }
 0x869   :  { %3637 = vst [vmem:[%s6938_s5 + $0xa0] sm:$0xff] %v3605_v40  ;;  %v3409_v57 = vpop.f32.mrf.mxu3 }
 0x86a   :  { %v3451_v55 = vmax.f32 %v3409_v57, 0.0 }
 0x86c   :  { %3569 = vmatmul.f32.gmra.mxu0 %v3451_v55 }
 0x86e   :  { %v3552_v26 = vpop.f32.mrf.mxu0 }
 0x86f   :  { %v3606_v8 = vmax.f32 %v3552_v26, 0.0 }
 0x871   :  { %3638 = vst [vmem:[%s6938_s5 + $0xa8] sm:$0xff] %v3606_v8  ;;  %v3412_v44 = vpop.f32.mrf.mxu3 }
 0x872   :  { %v3452_v61 = vmax.f32 %v3412_v44, 0.0 }
 0x874   :  { %3572 = vmatmul.f32.gmra.mxu0 %v3452_v61 }
 0x876   :  { %v3555_v18 = vpop.f32.mrf.mxu0 }
 0x877   :  { %v3607_v25 = vmax.f32 %v3555_v18, 0.0 }
 0x879   :  { %3639 = vst [vmem:[%s6938_s5 + $0xb0] sm:$0xff] %v3607_v25  ;;  %v3415_v43 = vpop.f32.mrf.mxu3 }
 0x87a   :  { %v3453_v28 = vmax.f32 %v3415_v43, 0.0 }
 0x87c   :  { %3575 = vmatmul.f32.gmra.mxu0 %v3453_v28 }
 0x8c8   :  { %v3558_v46 = vpop.f32.mrf.mxu0 }
 0x8c9   :  { %v3608_v29 = vmax.f32 %v3558_v46, 0.0 }
 0x8cb   :  { %3640 = vst [vmem:[%s6938_s5 + $0xb8] sm:$0xff] %v3608_v29  ;;  %v3418_v39 = vpop.f32.mrf.mxu3 }
 0x8cc   :  { %v3454_v53 = vmax.f32 %v3418_v39, 0.0 }
 0x8ce   :  { %3578 = vmatmul.f32.gmra.mxu0 %v3454_v53 }
 0x8d0   :  { %v3561_v34 = vpop.f32.mrf.mxu0 }
 0x8d1   :  { %v3609_v59 = vmax.f32 %v3561_v34, 0.0 }
 0x8d3   :  { %3641 = vst [vmem:[%s6938_s5 + $0xc0] sm:$0xff] %v3609_v59  ;;  %v3421_v16 = vpop.f32.mrf.mxu3 }
 0x8d4   :  { %v3455_v21 = vmax.f32 %v3421_v16, 0.0 }
 0x8d6   :  { %3581 = vmatmul.f32.gmra.mxu0 %v3455_v21 }
 0x8d9   :  { %v3564_v42 = vpop.f32.mrf.mxu0 }
 0x8da   :  { %v3610_v52 = vmax.f32 %v3564_v42, 0.0 }
 0x8dc   :  { %3642 = vst [vmem:[%s6938_s5 + $0xc8] sm:$0xff] %v3610_v52 }
 0x8e1   :  { %v3567_v51 = vpop.f32.mrf.mxu0 }
 0x8e2   :  { %v3611_v36 = vmax.f32 %v3567_v51, 0.0 }
 0x8e4   :  { %3643 = vst [vmem:[%s6938_s5 + $0xd0] sm:$0xff] %v3611_v36 }
 0x8e9   :  { %v3570_v12 = vpop.f32.mrf.mxu0 }
 0x8ea   :  { %v3612_v9 = vmax.f32 %v3570_v12, 0.0 }
 0x8ec   :  { %3644 = vst [vmem:[%s6938_s5 + $0xd8] sm:$0xff] %v3612_v9 }
 0x8f1   :  { %v3573_v24 = vpop.f32.mrf.mxu0 }
 0x8f2   :  { %v3613_v63 = vmax.f32 %v3573_v24, 0.0 }
 0x8f4   :  { %3645 = vst [vmem:[%s6938_s5 + $0xe0] sm:$0xff] %v3613_v63 }
 0x8f9   :  { %v3576_v10 = vpop.f32.mrf.mxu0 }
 0x8fa   :  { %v3614_v32 = vmax.f32 %v3576_v10, 0.0 }
 0x8fc   :  { %3646 = vst [vmem:[%s6938_s5 + $0xe8] sm:$0xff] %v3614_v32 }
 0x94b   :  { %v3579_v50 = vpop.f32.mrf.mxu0 }
 0x94c   :  { %v3615_v11 = vmax.f32 %v3579_v50, 0.0 }
 0x94e   :  { %3647 = vst [vmem:[%s6938_s5 + $0xf0] sm:$0xff] %v3615_v11 }
 0x953   :  { %v3582_v60 = vpop.f32.mrf.mxu0 }
 0x954   :  { %v3616_v33 = vmax.f32 %v3582_v60, 0.0 }
 0x956   :  { %3648 = vst [vmem:[%s6938_s5 + $0xf8] sm:$0xff] %v3616_v33 }

</bundles_post_ra>
